<compile_context>
chip_gen: v7x
topology: tpu7x:2x2x1
jax: 0.10.0
libtpu: 0.0.40
codegen_flags: <defaults>
</compile_context>

<pallas_src>
import math
import functools

import jax
import jax.numpy as jnp
from jax.experimental import pallas as pl
from jax.experimental.pallas import tpu as pltpu

_LN_EPS = 1e-5
_NEG_INF = jnp.float32(-1e30)   # exp() underflows to 0 in f32, same effect as -inf


# ----------------------------- block-size helpers ---------------------------

def _pick_rows_block(m, pref):
    """Row-block that divides m (multiple of 8 when possible)."""
    if m <= pref:
        return m
    for d in range(pref, 7, -1):
        if m % d == 0 and d % 8 == 0:
            return d
    for d in range(pref, 0, -1):
        if m % d == 0:
            return d
    return pref


def _pick_cols_block(n, pref=512):
    """Column (lane) block: full dim, or a 128-multiple divisor, else pref (ragged)."""
    if n <= pref:
        return n
    for d in range(pref, 127, -1):
        if n % d == 0 and d % 128 == 0:
            return d
    return pref


def _pick_batch_block(n, pref=8):
    """Batch block that divides n, <= pref (keeps >=2 grid steps for megacore when possible)."""
    if n <= pref:
        return n
    for d in range(pref, 0, -1):
        if n % d == 0:
            return d
    return 1


# ----------------------------- Pallas kernels ------------------------------

def _linear_kernel(x_ref, w_ref, b_ref, o_ref):
    y = jnp.dot(x_ref[...].astype(jnp.bfloat16), w_ref[...],
                preferred_element_type=jnp.float32) + b_ref[...]
    o_ref[...] = y.astype(o_ref.dtype)


def pallas_linear(x, w, b, out_dtype=jnp.bfloat16, block_m=256, block_n=512):
    """x:(M,K) @ w:(K,N) + b -> (M,N).  w is bf16; output bf16 unless overridden."""
    M, K = x.shape
    N = w.shape[1]
    bm = _pick_rows_block(M, block_m)
    bn = _pick_cols_block(N, block_n)
    return pl.pallas_call(
        _linear_kernel,
        out_shape=jax.ShapeDtypeStruct((M, N), out_dtype),
        grid=(pl.cdiv(M, bm), pl.cdiv(N, bn)),
        in_specs=[
            pl.BlockSpec((bm, K), lambda i, j: (i, 0)),
            pl.BlockSpec((K, bn), lambda i, j: (0, j)),
            pl.BlockSpec((1, bn), lambda i, j: (0, j)),
        ],
        out_specs=pl.BlockSpec((bm, bn), lambda i, j: (i, j)),
        compiler_params=pltpu.CompilerParams(
            dimension_semantics=("parallel", "parallel")),
    )(x, w, b.reshape(1, N))


def _mha_out_ln_core(q_ref, q_off, kv_ref, k_off, v_off, m_ref, kpm_ref,
                     wo_ref, bo_ref, res_ref, g_ref, bt_ref, o_ref,
                     *, nhead, hd, scale, eps):
    """Attention (per-head loop) + out_proj + residual + LayerNorm, fully fused.

    q_ref : (Nb, Lq, *) block with queries at lane offset q_off
    kv_ref: (Nb, S , *) block with keys at k_off and values at v_off
    """
    Nb, Lq, E = res_ref.shape
    bias = m_ref[...][None, :, :] + kpm_ref[...]          # (1,Lq,S)+(Nb,1,S) -> (Nb,Lq,S)

    acc = jnp.zeros((Nb, Lq, E), jnp.float32)             # out_proj accumulator
    for h in range(nhead):
        qh = q_ref[:, :, q_off + h * hd: q_off + (h + 1) * hd]   # (Nb, Lq, hd) bf16
        kh = kv_ref[:, :, k_off + h * hd: k_off + (h + 1) * hd]  # (Nb, S , hd) bf16
        vh = kv_ref[:, :, v_off + h * hd: v_off + (h + 1) * hd]  # (Nb, S , hd) bf16

        s = jnp.einsum('bqd,bkd->bqk', qh, kh,
                       preferred_element_type=jnp.float32)       # (Nb, Lq, S)
        s = s * scale + bias
        s = s - jnp.max(s, axis=-1, keepdims=True)
        p = jnp.exp(s)
        p = p * pl.reciprocal(jnp.sum(p, axis=-1, keepdims=True), approx=True)

        oh = jnp.einsum('bqk,bkd->bqd', p.astype(jnp.bfloat16), vh,
                        preferred_element_type=jnp.float32)      # (Nb, Lq, hd)
        # out_proj folded per head: concat_h(o_h) @ W_o == sum_h o_h @ W_o[h*hd:(h+1)*hd]
        acc = acc + jnp.einsum('bqd,de->bqe', oh.astype(jnp.bfloat16),
                               wo_ref[h * hd:(h + 1) * hd, :],
                               preferred_element_type=jnp.float32)

    z = res_ref[...].astype(jnp.float32) + acc + bo_ref[...]
    mu = jnp.mean(z, axis=-1, keepdims=True)
    var = jnp.mean(jnp.square(z - mu), axis=-1, keepdims=True)
    zn = (z - mu) * jax.lax.rsqrt(var + eps)
    o_ref[...] = (zn * g_ref[...] + bt_ref[...]).astype(o_ref.dtype)


def _self_attn_kernel(qkv_ref, m_ref, kpm_ref, wo_ref, bo_ref, res_ref,
                      g_ref, bt_ref, o_ref, *, nhead, hd, scale, eps):
    E = nhead * hd
    _mha_out_ln_core(qkv_ref, 0, qkv_ref, E, 2 * E, m_ref, kpm_ref,
                     wo_ref, bo_ref, res_ref, g_ref, bt_ref, o_ref,
                     nhead=nhead, hd=hd, scale=scale, eps=eps)


def _cross_attn_kernel(q_ref, kv_ref, m_ref, kpm_ref, wo_ref, bo_ref, res_ref,
                       g_ref, bt_ref, o_ref, *, nhead, hd, scale, eps):
    E = nhead * hd
    _mha_out_ln_core(q_ref, 0, kv_ref, 0, E, m_ref, kpm_ref,
                     wo_ref, bo_ref, res_ref, g_ref, bt_ref, o_ref,
                     nhead=nhead, hd=hd, scale=scale, eps=eps)


def pallas_self_attn_block(qkv, res, attn_mask, kpm, wo, bo, gamma, beta, nhead):
    """qkv:(N,L,3E), res:(N,L,E) -> LayerNorm(res + out_proj(MHA(q,k,v))) in bf16."""
    N, L, E3 = qkv.shape
    E = E3 // 3
    hd = E // nhead
    Nb = _pick_batch_block(N)
    kernel = functools.partial(_self_attn_kernel, nhead=nhead, hd=hd,
                               scale=1.0 / math.sqrt(hd), eps=_LN_EPS)
    return pl.pallas_call(
        kernel,
        out_shape=jax.ShapeDtypeStruct((N, L, E), jnp.bfloat16),
        grid=(N // Nb,),
        in_specs=[
            pl.BlockSpec((Nb, L, E3), lambda b: (b, 0, 0)),   # fused qkv
            pl.BlockSpec((L, L), lambda b: (0, 0)),           # attn mask (additive)
            pl.BlockSpec((Nb, 1, L), lambda b: (b, 0, 0)),    # key-padding mask (additive)
            pl.BlockSpec((E, E), lambda b: (0, 0)),           # w_o (bf16)
            pl.BlockSpec((1, E), lambda b: (0, 0)),           # b_o
            pl.BlockSpec((Nb, L, E), lambda b: (b, 0, 0)),    # residual
            pl.BlockSpec((1, E), lambda b: (0, 0)),           # gamma
            pl.BlockSpec((1, E), lambda b: (0, 0)),           # beta
        ],
        out_specs=pl.BlockSpec((Nb, L, E), lambda b: (b, 0, 0)),
        compiler_params=pltpu.CompilerParams(dimension_semantics=("parallel",)),
    )(qkv, attn_mask, kpm, wo, bo.reshape(1, E), res,
      gamma.reshape(1, E), beta.reshape(1, E))


def pallas_cross_attn_block(q, kv, res, attn_mask, kpm, wo, bo, gamma, beta, nhead):
    """q:(N,T,E), kv:(N,S,2E), res:(N,T,E) -> LayerNorm(res + out_proj(MHA))."""
    N, T, E = q.shape
    S = kv.shape[1]
    hd = E // nhead
    Nb = _pick_batch_block(N)
    kernel = functools.partial(_cross_attn_kernel, nhead=nhead, hd=hd,
                               scale=1.0 / math.sqrt(hd), eps=_LN_EPS)
    return pl.pallas_call(
        kernel,
        out_shape=jax.ShapeDtypeStruct((N, T, E), jnp.bfloat16),
        grid=(N // Nb,),
        in_specs=[
            pl.BlockSpec((Nb, T, E), lambda b: (b, 0, 0)),
            pl.BlockSpec((Nb, S, 2 * E), lambda b: (b, 0, 0)),
            pl.BlockSpec((T, S), lambda b: (0, 0)),
            pl.BlockSpec((Nb, 1, S), lambda b: (b, 0, 0)),
            pl.BlockSpec((E, E), lambda b: (0, 0)),
            pl.BlockSpec((1, E), lambda b: (0, 0)),
            pl.BlockSpec((Nb, T, E), lambda b: (b, 0, 0)),
            pl.BlockSpec((1, E), lambda b: (0, 0)),
            pl.BlockSpec((1, E), lambda b: (0, 0)),
        ],
        out_specs=pl.BlockSpec((Nb, T, E), lambda b: (b, 0, 0)),
        compiler_params=pltpu.CompilerParams(dimension_semantics=("parallel",)),
    )(q, kv, attn_mask, kpm, wo, bo.reshape(1, E), res,
      gamma.reshape(1, E), beta.reshape(1, E))


def _ffn_add_ln_kernel(x_ref, w1_ref, b1_ref, w2_ref, b2_ref, g_ref, bt_ref,
                       g2_ref, bt2_ref, o_ref, *, eps, f_chunk, n_chunks, final_ln):
    x_raw = x_ref[...]
    xb = x_raw.astype(jnp.bfloat16)
    bm = x_ref.shape[0]
    E = w2_ref.shape[1]

    # d_ff chunking: never materialize the full (bm, F) intermediate in f32.
    acc = jnp.zeros((bm, E), jnp.float32)
    for c in range(n_chunks):
        lo, hi = c * f_chunk, (c + 1) * f_chunk
        h = jnp.dot(xb, w1_ref[:, lo:hi], preferred_element_type=jnp.float32)
        h = jnp.maximum(h + b1_ref[:, lo:hi], 0.0).astype(jnp.bfloat16)
        acc = acc + jnp.dot(h, w2_ref[lo:hi, :], preferred_element_type=jnp.float32)

    z = x_raw.astype(jnp.float32) + acc + b2_ref[...]
    mu = jnp.mean(z, axis=-1, keepdims=True)
    var = jnp.mean(jnp.square(z - mu), axis=-1, keepdims=True)
    z = (z - mu) * jax.lax.rsqrt(var + eps) * g_ref[...] + bt_ref[...]
    if final_ln:   # fused encoder-/decoder-level final LayerNorm
        mu = jnp.mean(z, axis=-1, keepdims=True)
        var = jnp.mean(jnp.square(z - mu), axis=-1, keepdims=True)
        z = (z - mu) * jax.lax.rsqrt(var + eps) * g2_ref[...] + bt2_ref[...]
    o_ref[...] = z.astype(o_ref.dtype)


def pallas_ffn_add_ln(x, w1, b1, w2, b2, gamma, beta,
                      final_gamma=None, final_beta=None, block_m=128):
    """LayerNorm(x + relu(x@w1+b1)@w2+b2), optionally followed by a second LayerNorm."""
    M, E = x.shape
    F = w1.shape[1]
    bm = _pick_rows_block(M, block_m)
    f_chunk = 512 if (F > 512 and F % 512 == 0) else F
    n_chunks = F // f_chunk
    final_ln = final_gamma is not None
    if not final_ln:
        final_gamma, final_beta = gamma, beta
    kernel = functools.partial(_ffn_add_ln_kernel, eps=_LN_EPS,
                               f_chunk=f_chunk, n_chunks=n_chunks, final_ln=final_ln)
    return pl.pallas_call(
        kernel,
        out_shape=jax.ShapeDtypeStruct((M, E), jnp.bfloat16),
        grid=(pl.cdiv(M, bm),),
        in_specs=[
            pl.BlockSpec((bm, E), lambda i: (i, 0)),
            pl.BlockSpec((E, F), lambda i: (0, 0)),
            pl.BlockSpec((1, F), lambda i: (0, 0)),
            pl.BlockSpec((F, E), lambda i: (0, 0)),
            pl.BlockSpec((1, E), lambda i: (0, 0)),
            pl.BlockSpec((1, E), lambda i: (0, 0)),
            pl.BlockSpec((1, E), lambda i: (0, 0)),
            pl.BlockSpec((1, E), lambda i: (0, 0)),
            pl.BlockSpec((1, E), lambda i: (0, 0)),
        ],
        out_specs=pl.BlockSpec((bm, E), lambda i: (i, 0)),
        compiler_params=pltpu.CompilerParams(dimension_semantics=("parallel",)),
    )(x, w1, b1.reshape(1, F), w2, b2.reshape(1, E),
      gamma.reshape(1, E), beta.reshape(1, E),
      final_gamma.reshape(1, E), final_beta.reshape(1, E))


# --------------------------- Transformer (glue) -----------------------------

def generate_square_subsequent_mask(sz):
    upper = jnp.triu(jnp.ones((sz, sz), jnp.bool_), k=1)
    return jnp.where(upper, _NEG_INF, 0.0).astype(jnp.float32)


def positional_encoding(max_len, d_model):
    position = jnp.arange(max_len, dtype=jnp.float32)[:, None]
    div_term = jnp.exp(
        jnp.arange(0, d_model, 2, dtype=jnp.float32) * (-math.log(10000.0) / d_model))
    pe = jnp.zeros((max_len, d_model), jnp.float32)
    pe = pe.at[:, 0::2].set(jnp.sin(position * div_term))
    pe = pe.at[:, 1::2].set(jnp.cos(position * div_term))
    return pe            # (max_len, d_model)


def encoder_layer(x, p, attn_mask, kpm, nhead, final_norm):
    N, L, E = x.shape
    qkv = pallas_linear(x.reshape(N * L, E), p["self_attn"]["w_qkv"],
                        p["self_attn"]["b_qkv"])                       # (N*L, 3E) bf16
    x = pallas_self_attn_block(qkv.reshape(N, L, 3 * E), x, attn_mask, kpm,
                               p["self_attn"]["w_o"], p["self_attn"]["b_o"],
                               p["norm1_g"], p["norm1_b"], nhead)      # (N, L, E)
    fg, fb = final_norm if final_norm is not None else (None, None)
    x2 = pallas_ffn_add_ln(x.reshape(N * L, E), p["lin1_w"], p["lin1_b"],
                           p["lin2_w"], p["lin2_b"], p["norm2_g"], p["norm2_b"],
                           final_gamma=fg, final_beta=fb)
    return x2.reshape(N, L, E)


def decoder_layer(y, memory, p, tgt_mask, cross_mask, tgt_kpm, mem_kpm, nhead, final_norm):
    N, T, E = y.shape
    S = memory.shape[1]
    qkv = pallas_linear(y.reshape(N * T, E), p["self_attn"]["w_qkv"],
                        p["self_attn"]["b_qkv"])
    y = pallas_self_attn_block(qkv.reshape(N, T, 3 * E), y, tgt_mask, tgt_kpm,
                               p["self_attn"]["w_o"], p["self_attn"]["b_o"],
                               p["norm1_g"], p["norm1_b"], nhead)
    q = pallas_linear(y.reshape(N * T, E), p["cross_attn"]["w_q"], p["cross_attn"]["b_q"])
    kv = pallas_linear(memory.reshape(N * S, E), p["cross_attn"]["w_kv"],
                       p["cross_attn"]["b_kv"])
    y = pallas_cross_attn_block(q.reshape(N, T, E), kv.reshape(N, S, 2 * E), y,
                                cross_mask, mem_kpm,
                                p["cross_attn"]["w_o"], p["cross_attn"]["b_o"],
                                p["norm2_g"], p["norm2_b"], nhead)
    fg, fb = final_norm if final_norm is not None else (None, None)
    y2 = pallas_ffn_add_ln(y.reshape(N * T, E), p["lin1_w"], p["lin1_b"],
                           p["lin2_w"], p["lin2_b"], p["norm3_g"], p["norm3_b"],
                           final_gamma=fg, final_beta=fb)
    return y2.reshape(N, T, E)


def transformer_forward(params, src, tgt, src_mask, tgt_mask,
                        src_padding_mask, tgt_padding_mask, memory_key_padding_mask,
                        *, d_model, nhead):
    S_len, N = src.shape
    T_len = tgt.shape[0]
    scale = math.sqrt(d_model)
    pe = params["pe"]

    # Embedding + positional encoding (plain JAX gather), batch-major, bf16 activations.
    src_emb = (params["src_emb"][src.T] * scale + pe[:S_len][None]).astype(jnp.bfloat16)
    tgt_emb = (params["tgt_emb"][tgt.T] * scale + pe[:T_len][None]).astype(jnp.bfloat16)

    # Additive masks (combined with scores inside the attention kernels).
    src_kpm = jnp.where(src_padding_mask, _NEG_INF, 0.0).astype(jnp.float32).reshape(N, 1, S_len)
    tgt_kpm = jnp.where(tgt_padding_mask, _NEG_INF, 0.0).astype(jnp.float32).reshape(N, 1, T_len)
    mem_kpm = jnp.where(memory_key_padding_mask, _NEG_INF, 0.0).astype(jnp.float32).reshape(N, 1, S_len)
    src_m = jnp.maximum(src_mask.astype(jnp.float32), _NEG_INF)   # clamp any -inf
    tgt_m = jnp.maximum(tgt_mask.astype(jnp.float32), _NEG_INF)
    cross_m = jnp.zeros((T_len, S_len), jnp.float32)

    # Encoder stack (final encoder LayerNorm fused into the last layer's FFN kernel).
    x = src_emb
    n_enc = len(params["enc_layers"])
    for li, lp in enumerate(params["enc_layers"]):
        fin = (params["enc_norm_g"], params["enc_norm_b"]) if li == n_enc - 1 else None
        x = encoder_layer(x, lp, src_m, src_kpm, nhead, fin)
    memory = x                                        # (N, S, E) bf16

    # Decoder stack (final decoder LayerNorm fused likewise).
    y = tgt_emb
    n_dec = len(params["dec_layers"])
    for li, lp in enumerate(params["dec_layers"]):
        fin = (params["dec_norm_g"], params["dec_norm_b"]) if li == n_dec - 1 else None
        y = decoder_layer(y, memory, lp, tgt_m, cross_m, tgt_kpm, mem_kpm, nhead, fin)

    E = y.shape[-1]
    out = pallas_linear(y.reshape(N * T_len, E), params["fc_w"], params["fc_b"],
                        out_dtype=jnp.float32)
    return out.reshape(N, T_len, -1).transpose(1, 0, 2)   # (T, N, V)


# ------------------------------ Parameter init ------------------------------

def init_params(key, input_dim, output_dim, d_model, nhead, n_enc, n_dec, d_ff,
                max_len=512):
    keys = iter(jax.random.split(key, 1024))

    def wgt(shape, scale):   # matmul weights live in bf16 in HBM
        return (jax.random.normal(next(keys), shape, jnp.float32) * scale).astype(jnp.bfloat16)

    s = 1.0 / math.sqrt(d_model)
    zE = jnp.zeros((d_model,), jnp.float32)
    oneE = jnp.ones((d_model,), jnp.float32)

    def self_attn_p():
        return dict(w_qkv=wgt((d_model, 3 * d_model), s),
                    b_qkv=jnp.zeros((3 * d_model,), jnp.float32),
                    w_o=wgt((d_model, d_model), s), b_o=zE)

    def cross_attn_p():
        return dict(w_q=wgt((d_model, d_model), s), b_q=zE,
                    w_kv=wgt((d_model, 2 * d_model), s),
                    b_kv=jnp.zeros((2 * d_model,), jnp.float32),
                    w_o=wgt((d_model, d_model), s), b_o=zE)

    def enc_layer_p():
        return dict(
            self_attn=self_attn_p(),
            lin1_w=wgt((d_model, d_ff), s),
            lin1_b=jnp.zeros((d_ff,), jnp.float32),
            lin2_w=wgt((d_ff, d_model), 1.0 / math.sqrt(d_ff)),
            lin2_b=zE,
            norm1_g=oneE, norm1_b=zE, norm2_g=oneE, norm2_b=zE,
        )

    def dec_layer_p():
        d = enc_layer_p()
        d["cross_attn"] = cross_attn_p()
        d["norm3_g"] = oneE
        d["norm3_b"] = zE
        return d

    return dict(
        src_emb=jax.random.normal(next(keys), (input_dim, d_model), jnp.float32),
        tgt_emb=jax.random.normal(next(keys), (output_dim, d_model), jnp.float32),
        pe=positional_encoding(max_len, d_model),
        enc_layers=[enc_layer_p() for _ in range(n_enc)],
        dec_layers=[dec_layer_p() for _ in range(n_dec)],
        enc_norm_g=oneE, enc_norm_b=zE,
        dec_norm_g=oneE, dec_norm_b=zE,
        fc_w=wgt((d_model, output_dim), s),
        fc_b=jnp.zeros((output_dim,), jnp.float32),
    )


# ----------------------------------- main -----------------------------------

if __name__ == "__main__":
    # Small, structure-preserving config (reference uses d_model=512, nhead=8,
    # 6+6 layers, d_ff=2048, vocab=1000, seq=32, batch=10).
    input_dim, output_dim = 100, 100
    d_model, nhead = 64, 4
    n_enc, n_dec = 2, 2
    d_ff = 128
    src_seq_len = tgt_seq_len = 8
    batch = 2

    root = jax.random.PRNGKey(0)
    pkey, skey, tkey = jax.random.split(root, 3)

    params = init_params(pkey, input_dim, output_dim, d_model, nhead, n_enc, n_dec, d_ff)

    src = jax.random.randint(skey, (src_seq_len, batch), 0, input_dim, dtype=jnp.int32)
    tgt = jax.random.randint(tkey, (tgt_seq_len, batch), 0, output_dim, dtype=jnp.int32)
    src_mask = generate_square_subsequent_mask(src_seq_len)
    tgt_mask = generate_square_subsequent_mask(tgt_seq_len)
    src_padding_mask = jnp.zeros((batch, src_seq_len), jnp.bool_)
    tgt_padding_mask = jnp.zeros((batch, tgt_seq_len), jnp.bool_)
    memory_key_padding_mask = jnp.zeros((batch, src_seq_len), jnp.bool_)

    fwd = jax.jit(functools.partial(transformer_forward, d_model=d_model, nhead=nhead))
    out = fwd(params, src, tgt, src_mask, tgt_mask,
              src_padding_mask, tgt_padding_mask, memory_key_padding_mask)
    out = jax.block_until_ready(out)

    assert out.shape == (tgt_seq_len, batch, output_dim), out.shape
    assert bool(jnp.all(jnp.isfinite(out)))
    print("KERNEL_OK")
</pallas_src>

<mosaic_0001>
module attributes {stable_mosaic.version = 11 : i64} {
  func.func @_linear_kernel(%arg0: i32, %arg1: i32, %arg2: memref<16x64xbf16, #tpu.memory_space<vmem>>, %arg3: memref<64x192xbf16, #tpu.memory_space<vmem>>, %arg4: memref<1x192xf32, #tpu.memory_space<vmem>>, %arg5: memref<16x192xbf16, #tpu.memory_space<vmem>>) attributes {dimension_semantics = [#tpu.dimension_semantics<parallel>, #tpu.dimension_semantics<parallel>], iteration_bounds = array<i64: 1, 1>, scalar_prefetch = 0 : i64, scratch_operands = 0 : i64, tpu.core_type = #tpu.core_type<tc>, window_params = [{transform_indices = @transform_0, window_bounds = array<i64: 16, 64>}, {transform_indices = @transform_1, window_bounds = array<i64: 64, 192>}, {transform_indices = @transform_2, window_bounds = array<i64: 1, 192>}, {transform_indices = @transform_3, window_bounds = array<i64: 16, 192>}]} {
    %c0 = arith.constant 0 : index
    %c0_0 = arith.constant 0 : index
    %0 = vector.load %arg2[%c0, %c0_0] : memref<16x64xbf16, #tpu.memory_space<vmem>>, vector<16x64xbf16>
    %c0_1 = arith.constant 0 : index
    %c0_2 = arith.constant 0 : index
    %1 = vector.load %arg3[%c0_1, %c0_2] : memref<64x192xbf16, #tpu.memory_space<vmem>>, vector<64x192xbf16>
    %cst = arith.constant dense<0.000000e+00> : vector<16x192xf32>
    %2 = tpu.matmul %0, %1, %cst {dimension_numbers = #tpu.dot_dimension_numbers<[1], [0], [0], [1], [0, 0, 1, 1], [], []>} : vector<16x64xbf16>, vector<64x192xbf16>, vector<16x192xf32> -> vector<16x192xf32>
    %c0_3 = arith.constant 0 : index
    %c0_4 = arith.constant 0 : index
    %3 = vector.load %arg4[%c0_3, %c0_4] : memref<1x192xf32, #tpu.memory_space<vmem>>, vector<1x192xf32>
    %4 = vector.broadcast %3 : vector<1x192xf32> to vector<16x192xf32>
    %5 = arith.addf %2, %4 : vector<16x192xf32>
    %6 = arith.truncf %5 : vector<16x192xf32> to vector<16x192xbf16>
    %c0_5 = arith.constant 0 : index
    %c0_6 = arith.constant 0 : index
    %7 = vector.load %arg5[%c0_5, %c0_6] : memref<16x192xbf16, #tpu.memory_space<vmem>>, vector<16x192xbf16>
    tpu.vector_store %arg5[%c0_5, %c0_6], %6 {strides = array<i32>} : memref<16x192xbf16, #tpu.memory_space<vmem>>, vector<16x192xbf16>,
    return
  }
  func.func @transform_0(%arg0: i32, %arg1: i32) -> (i32, i32) {
    %c0_i32 = arith.constant 0 : i32
    %c0_i32_0 = arith.constant 0 : i32
    return %arg0, %c0_i32 : i32, i32
  }
  func.func @transform_1(%arg0: i32, %arg1: i32) -> (i32, i32) {
    %c0_i32 = arith.constant 0 : i32
    %c0_i32_0 = arith.constant 0 : i32
    return %c0_i32, %arg1 : i32, i32
  }
  func.func @transform_2(%arg0: i32, %arg1: i32) -> (i32, i32) {
    %c0_i32 = arith.constant 0 : i32
    %c0_i32_0 = arith.constant 0 : i32
    return %c0_i32, %arg1 : i32, i32
  }
  func.func @transform_3(%arg0: i32, %arg1: i32) -> (i32, i32) {
    %c0_i32 = arith.constant 0 : i32
    return %arg0, %arg1 : i32, i32
  }
}

module attributes {stable_mosaic.version = 11 : i64} {
  func.func @_ffn_add_ln_kernel(%arg0: i32, %arg1: memref<16x64xbf16, #tpu.memory_space<vmem>>, %arg2: memref<64x128xbf16, #tpu.memory_space<vmem>>, %arg3: memref<1x128xf32, #tpu.memory_space<vmem>>, %arg4: memref<128x64xbf16, #tpu.memory_space<vmem>>, %arg5: memref<1x64xf32, #tpu.memory_space<vmem>>, %arg6: memref<1x64xf32, #tpu.memory_space<vmem>>, %arg7: memref<1x64xf32, #tpu.memory_space<vmem>>, %arg8: memref<1x64xf32, #tpu.memory_space<vmem>>, %arg9: memref<1x64xf32, #tpu.memory_space<vmem>>, %arg10: memref<16x64xbf16, #tpu.memory_space<vmem>>) attributes {dimension_semantics = [#tpu.dimension_semantics<parallel>], iteration_bounds = array<i64: 1>, scalar_prefetch = 0 : i64, scratch_operands = 0 : i64, tpu.core_type = #tpu.core_type<tc>, window_params = [{transform_indices = @transform_0, window_bounds = array<i64: 16, 64>}, {pipeline_mode = #tpu.pipeline_mode<synchronous>, transform_indices = @transform_1, window_bounds = array<i64: 64, 128>}, {pipeline_mode = #tpu.pipeline_mode<synchronous>, transform_indices = @transform_2, window_bounds = array<i64: 1, 128>}, {pipeline_mode = #tpu.pipeline_mode<synchronous>, transform_indices = @transform_3, window_bounds = array<i64: 128, 64>}, {pipeline_mode = #tpu.pipeline_mode<synchronous>, transform_indices = @transform_4, window_bounds = array<i64: 1, 64>}, {pipeline_mode = #tpu.pipeline_mode<synchronous>, transform_indices = @transform_5, window_bounds = array<i64: 1, 64>}, {pipeline_mode = #tpu.pipeline_mode<synchronous>, transform_indices = @transform_6, window_bounds = array<i64: 1, 64>}, {pipeline_mode = #tpu.pipeline_mode<synchronous>, transform_indices = @transform_7, window_bounds = array<i64: 1, 64>}, {pipeline_mode = #tpu.pipeline_mode<synchronous>, transform_indices = @transform_8, window_bounds = array<i64: 1, 64>}, {transform_indices = @transform_9, window_bounds = array<i64: 16, 64>}]} {
    %c0 = arith.constant 0 : index
    %c0_0 = arith.constant 0 : index
    %0 = vector.load %arg1[%c0, %c0_0] : memref<16x64xbf16, #tpu.memory_space<vmem>>, vector<16x64xbf16>
    %cst = arith.constant 0.000000e+00 : f32
    %1 = vector.broadcast %cst : f32 to vector<16x64xf32>
    %c0_1 = arith.constant 0 : index
    %c0_2 = arith.constant 0 : index
    %2 = vector.load %arg2[%c0_1, %c0_2] : memref<64x128xbf16, #tpu.memory_space<vmem>>, vector<64x128xbf16>
    %cst_3 = arith.constant dense<0.000000e+00> : vector<16x128xf32>
    %3 = tpu.matmul %0, %2, %cst_3 {dimension_numbers = #tpu.dot_dimension_numbers<[1], [0], [0], [1], [0, 0, 1, 1], [], []>} : vector<16x64xbf16>, vector<64x128xbf16>, vector<16x128xf32> -> vector<16x128xf32>
    %c0_4 = arith.constant 0 : index
    %c0_5 = arith.constant 0 : index
    %4 = vector.load %arg3[%c0_4, %c0_5] : memref<1x128xf32, #tpu.memory_space<vmem>>, vector<1x128xf32>
    %5 = vector.broadcast %4 : vector<1x128xf32> to vector<16x128xf32>
    %6 = arith.addf %3, %5 : vector<16x128xf32>
    %cst_6 = arith.constant 0.000000e+00 : f32
    %7 = vector.broadcast %cst_6 : f32 to vector<16x128xf32>
    %8 = arith.maximumf %6, %7 : vector<16x128xf32>
    %9 = arith.truncf %8 : vector<16x128xf32> to vector<16x128xbf16>
    %c0_7 = arith.constant 0 : index
    %c0_8 = arith.constant 0 : index
    %10 = vector.load %arg4[%c0_7, %c0_8] : memref<128x64xbf16, #tpu.memory_space<vmem>>, vector<128x64xbf16>
    %cst_9 = arith.constant dense<0.000000e+00> : vector<16x64xf32>
    %11 = tpu.matmul %9, %10, %cst_9 {dimension_numbers = #tpu.dot_dimension_numbers<[1], [0], [0], [1], [0, 0, 1, 1], [], []>} : vector<16x128xbf16>, vector<128x64xbf16>, vector<16x64xf32> -> vector<16x64xf32>
    %12 = arith.addf %1, %11 : vector<16x64xf32>
    %13 = arith.extf %0 : vector<16x64xbf16> to vector<16x64xf32>
    %14 = arith.addf %13, %12 : vector<16x64xf32>
    %c0_10 = arith.constant 0 : index
    %c0_11 = arith.constant 0 : index
    %15 = vector.load %arg5[%c0_10, %c0_11] : memref<1x64xf32, #tpu.memory_space<vmem>>, vector<1x64xf32>
    %16 = vector.broadcast %15 : vector<1x64xf32> to vector<16x64xf32>
    %17 = arith.addf %14, %16 : vector<16x64xf32>
    %cst_12 = arith.constant dense<0.000000e+00> : vector<16xf32>
    %18 = vector.multi_reduction <add>, %17, %cst_12 [1] : vector<16x64xf32> to vector<16xf32>
    %19 = vector.shape_cast %18 : vector<16xf32> to vector<16x1xf32>
    %cst_13 = arith.constant 6.400000e+01 : f32
    %20 = vector.broadcast %cst_13 : f32 to vector<16x1xf32>
    %21 = arith.divf %19, %20 : vector<16x1xf32>
    %22 = vector.broadcast %21 : vector<16x1xf32> to vector<16x64xf32>
    %23 = arith.subf %17, %22 : vector<16x64xf32>
    %24 = arith.mulf %23, %23 : vector<16x64xf32>
    %cst_14 = arith.constant dense<0.000000e+00> : vector<16xf32>
    %25 = vector.multi_reduction <add>, %24, %cst_14 [1] : vector<16x64xf32> to vector<16xf32>
    %26 = vector.shape_cast %25 : vector<16xf32> to vector<16x1xf32>
    %cst_15 = arith.constant 6.400000e+01 : f32
    %27 = vector.broadcast %cst_15 : f32 to vector<16x1xf32>
    %28 = arith.divf %26, %27 : vector<16x1xf32>
    %29 = vector.broadcast %21 : vector<16x1xf32> to vector<16x64xf32>
    %30 = arith.subf %17, %29 : vector<16x64xf32>
    %cst_16 = arith.constant 9.99999974E-6 : f32
    %31 = vector.broadcast %cst_16 : f32 to vector<16x1xf32>
    %32 = arith.addf %28, %31 : vector<16x1xf32>
    %33 = math.rsqrt %32 : vector<16x1xf32>
    %34 = vector.broadcast %33 : vector<16x1xf32> to vector<16x64xf32>
    %35 = arith.mulf %30, %34 : vector<16x64xf32>
    %c0_17 = arith.constant 0 : index
    %c0_18 = arith.constant 0 : index
    %36 = vector.load %arg6[%c0_17, %c0_18] : memref<1x64xf32, #tpu.memory_space<vmem>>, vector<1x64xf32>
    %37 = vector.broadcast %36 : vector<1x64xf32> to vector<16x64xf32>
    %38 = arith.mulf %35, %37 : vector<16x64xf32>
    %c0_19 = arith.constant 0 : index
    %c0_20 = arith.constant 0 : index
    %39 = vector.load %arg7[%c0_19, %c0_20] : memref<1x64xf32, #tpu.memory_space<vmem>>, vector<1x64xf32>
    %40 = vector.broadcast %39 : vector<1x64xf32> to vector<16x64xf32>
    %41 = arith.addf %38, %40 : vector<16x64xf32>
    %42 = arith.truncf %41 : vector<16x64xf32> to vector<16x64xbf16>
    %c0_21 = arith.constant 0 : index
    %c0_22 = arith.constant 0 : index
    %43 = vector.load %arg10[%c0_21, %c0_22] : memref<16x64xbf16, #tpu.memory_space<vmem>>, vector<16x64xbf16>
    tpu.vector_store %arg10[%c0_21, %c0_22], %42 {strides = array<i32>} : memref<16x64xbf16, #tpu.memory_space<vmem>>, vector<16x64xbf16>,
    return
  }
  func.func @transform_0(%arg0: i32) -> (i32, i32) {
    %c0_i32 = arith.constant 0 : i32
    %c0_i32_0 = arith.constant 0 : i32
    return %arg0, %c0_i32 : i32, i32
  }
  func.func @transform_1(%arg0: i32) -> (i32, i32) {
    %c0_i32 = arith.constant 0 : i32
    %c0_i32_0 = arith.constant 0 : i32
    %c0_i32_1 = arith.constant 0 : i32
    return %c0_i32, %c0_i32_0 : i32, i32
  }
  func.func @transform_2(%arg0: i32) -> (i32, i32) {
    %c0_i32 = arith.constant 0 : i32
    %c0_i32_0 = arith.constant 0 : i32
    %c0_i32_1 = arith.constant 0 : i32
    return %c0_i32, %c0_i32_0 : i32, i32
  }
  func.func @transform_3(%arg0: i32) -> (i32, i32) {
    %c0_i32 = arith.constant 0 : i32
    %c0_i32_0 = arith.constant 0 : i32
    %c0_i32_1 = arith.constant 0 : i32
    return %c0_i32, %c0_i32_0 : i32, i32
  }
  func.func @transform_4(%arg0: i32) -> (i32, i32) {
    %c0_i32 = arith.constant 0 : i32
    %c0_i32_0 = arith.constant 0 : i32
    %c0_i32_1 = arith.constant 0 : i32
    return %c0_i32, %c0_i32_0 : i32, i32
  }
  func.func @transform_5(%arg0: i32) -> (i32, i32) {
    %c0_i32 = arith.constant 0 : i32
    %c0_i32_0 = arith.constant 0 : i32
    %c0_i32_1 = arith.constant 0 : i32
    return %c0_i32, %c0_i32_0 : i32, i32
  }
  func.func @transform_6(%arg0: i32) -> (i32, i32) {
    %c0_i32 = arith.constant 0 : i32
    %c0_i32_0 = arith.constant 0 : i32
    %c0_i32_1 = arith.constant 0 : i32
    return %c0_i32, %c0_i32_0 : i32, i32
  }
  func.func @transform_7(%arg0: i32) -> (i32, i32) {
    %c0_i32 = arith.constant 0 : i32
    %c0_i32_0 = arith.constant 0 : i32
    %c0_i32_1 = arith.constant 0 : i32
    return %c0_i32, %c0_i32_0 : i32, i32
  }
  func.func @transform_8(%arg0: i32) -> (i32, i32) {
    %c0_i32 = arith.constant 0 : i32
    %c0_i32_0 = arith.constant 0 : i32
    %c0_i32_1 = arith.constant 0 : i32
    return %c0_i32, %c0_i32_0 : i32, i32
  }
  func.func @transform_9(%arg0: i32) -> (i32, i32) {
    %c0_i32 = arith.constant 0 : i32
    %c0_i32_0 = arith.constant 0 : i32
    return %arg0, %c0_i32 : i32, i32
  }
}

module attributes {stable_mosaic.version = 11 : i64} {
  func.func @_ffn_add_ln_kernel(%arg0: i32, %arg1: memref<16x64xbf16, #tpu.memory_space<vmem>>, %arg2: memref<64x128xbf16, #tpu.memory_space<vmem>>, %arg3: memref<1x128xf32, #tpu.memory_space<vmem>>, %arg4: memref<128x64xbf16, #tpu.memory_space<vmem>>, %arg5: memref<1x64xf32, #tpu.memory_space<vmem>>, %arg6: memref<1x64xf32, #tpu.memory_space<vmem>>, %arg7: memref<1x64xf32, #tpu.memory_space<vmem>>, %arg8: memref<1x64xf32, #tpu.memory_space<vmem>>, %arg9: memref<1x64xf32, #tpu.memory_space<vmem>>, %arg10: memref<16x64xbf16, #tpu.memory_space<vmem>>) attributes {dimension_semantics = [#tpu.dimension_semantics<parallel>], iteration_bounds = array<i64: 1>, scalar_prefetch = 0 : i64, scratch_operands = 0 : i64, tpu.core_type = #tpu.core_type<tc>, window_params = [{transform_indices = @transform_0, window_bounds = array<i64: 16, 64>}, {pipeline_mode = #tpu.pipeline_mode<synchronous>, transform_indices = @transform_1, window_bounds = array<i64: 64, 128>}, {pipeline_mode = #tpu.pipeline_mode<synchronous>, transform_indices = @transform_2, window_bounds = array<i64: 1, 128>}, {pipeline_mode = #tpu.pipeline_mode<synchronous>, transform_indices = @transform_3, window_bounds = array<i64: 128, 64>}, {pipeline_mode = #tpu.pipeline_mode<synchronous>, transform_indices = @transform_4, window_bounds = array<i64: 1, 64>}, {pipeline_mode = #tpu.pipeline_mode<synchronous>, transform_indices = @transform_5, window_bounds = array<i64: 1, 64>}, {pipeline_mode = #tpu.pipeline_mode<synchronous>, transform_indices = @transform_6, window_bounds = array<i64: 1, 64>}, {pipeline_mode = #tpu.pipeline_mode<synchronous>, transform_indices = @transform_7, window_bounds = array<i64: 1, 64>}, {pipeline_mode = #tpu.pipeline_mode<synchronous>, transform_indices = @transform_8, window_bounds = array<i64: 1, 64>}, {transform_indices = @transform_9, window_bounds = array<i64: 16, 64>}]} {
    %c0 = arith.constant 0 : index
    %c0_0 = arith.constant 0 : index
    %0 = vector.load %arg1[%c0, %c0_0] : memref<16x64xbf16, #tpu.memory_space<vmem>>, vector<16x64xbf16>
    %cst = arith.constant 0.000000e+00 : f32
    %1 = vector.broadcast %cst : f32 to vector<16x64xf32>
    %c0_1 = arith.constant 0 : index
    %c0_2 = arith.constant 0 : index
    %2 = vector.load %arg2[%c0_1, %c0_2] : memref<64x128xbf16, #tpu.memory_space<vmem>>, vector<64x128xbf16>
    %cst_3 = arith.constant dense<0.000000e+00> : vector<16x128xf32>
    %3 = tpu.matmul %0, %2, %cst_3 {dimension_numbers = #tpu.dot_dimension_numbers<[1], [0], [0], [1], [0, 0, 1, 1], [], []>} : vector<16x64xbf16>, vector<64x128xbf16>, vector<16x128xf32> -> vector<16x128xf32>
    %c0_4 = arith.constant 0 : index
    %c0_5 = arith.constant 0 : index
    %4 = vector.load %arg3[%c0_4, %c0_5] : memref<1x128xf32, #tpu.memory_space<vmem>>, vector<1x128xf32>
    %5 = vector.broadcast %4 : vector<1x128xf32> to vector<16x128xf32>
    %6 = arith.addf %3, %5 : vector<16x128xf32>
    %cst_6 = arith.constant 0.000000e+00 : f32
    %7 = vector.broadcast %cst_6 : f32 to vector<16x128xf32>
    %8 = arith.maximumf %6, %7 : vector<16x128xf32>
    %9 = arith.truncf %8 : vector<16x128xf32> to vector<16x128xbf16>
    %c0_7 = arith.constant 0 : index
    %c0_8 = arith.constant 0 : index
    %10 = vector.load %arg4[%c0_7, %c0_8] : memref<128x64xbf16, #tpu.memory_space<vmem>>, vector<128x64xbf16>
    %cst_9 = arith.constant dense<0.000000e+00> : vector<16x64xf32>
    %11 = tpu.matmul %9, %10, %cst_9 {dimension_numbers = #tpu.dot_dimension_numbers<[1], [0], [0], [1], [0, 0, 1, 1], [], []>} : vector<16x128xbf16>, vector<128x64xbf16>, vector<16x64xf32> -> vector<16x64xf32>
    %12 = arith.addf %1, %11 : vector<16x64xf32>
    %13 = arith.extf %0 : vector<16x64xbf16> to vector<16x64xf32>
    %14 = arith.addf %13, %12 : vector<16x64xf32>
    %c0_10 = arith.constant 0 : index
    %c0_11 = arith.constant 0 : index
    %15 = vector.load %arg5[%c0_10, %c0_11] : memref<1x64xf32, #tpu.memory_space<vmem>>, vector<1x64xf32>
    %16 = vector.broadcast %15 : vector<1x64xf32> to vector<16x64xf32>
    %17 = arith.addf %14, %16 : vector<16x64xf32>
    %cst_12 = arith.constant dense<0.000000e+00> : vector<16xf32>
    %18 = vector.multi_reduction <add>, %17, %cst_12 [1] : vector<16x64xf32> to vector<16xf32>
    %19 = vector.shape_cast %18 : vector<16xf32> to vector<16x1xf32>
    %cst_13 = arith.constant 6.400000e+01 : f32
    %20 = vector.broadcast %cst_13 : f32 to vector<16x1xf32>
    %21 = arith.divf %19, %20 : vector<16x1xf32>
    %22 = vector.broadcast %21 : vector<16x1xf32> to vector<16x64xf32>
    %23 = arith.subf %17, %22 : vector<16x64xf32>
    %24 = arith.mulf %23, %23 : vector<16x64xf32>
    %cst_14 = arith.constant dense<0.000000e+00> : vector<16xf32>
    %25 = vector.multi_reduction <add>, %24, %cst_14 [1] : vector<16x64xf32> to vector<16xf32>
    %26 = vector.shape_cast %25 : vector<16xf32> to vector<16x1xf32>
    %cst_15 = arith.constant 6.400000e+01 : f32
    %27 = vector.broadcast %cst_15 : f32 to vector<16x1xf32>
    %28 = arith.divf %26, %27 : vector<16x1xf32>
    %29 = vector.broadcast %21 : vector<16x1xf32> to vector<16x64xf32>
    %30 = arith.subf %17, %29 : vector<16x64xf32>
    %cst_16 = arith.constant 9.99999974E-6 : f32
    %31 = vector.broadcast %cst_16 : f32 to vector<16x1xf32>
    %32 = arith.addf %28, %31 : vector<16x1xf32>
    %33 = math.rsqrt %32 : vector<16x1xf32>
    %34 = vector.broadcast %33 : vector<16x1xf32> to vector<16x64xf32>
    %35 = arith.mulf %30, %34 : vector<16x64xf32>
    %c0_17 = arith.constant 0 : index
    %c0_18 = arith.constant 0 : index
    %36 = vector.load %arg6[%c0_17, %c0_18] : memref<1x64xf32, #tpu.memory_space<vmem>>, vector<1x64xf32>
    %37 = vector.broadcast %36 : vector<1x64xf32> to vector<16x64xf32>
    %38 = arith.mulf %35, %37 : vector<16x64xf32>
    %c0_19 = arith.constant 0 : index
    %c0_20 = arith.constant 0 : index
    %39 = vector.load %arg7[%c0_19, %c0_20] : memref<1x64xf32, #tpu.memory_space<vmem>>, vector<1x64xf32>
    %40 = vector.broadcast %39 : vector<1x64xf32> to vector<16x64xf32>
    %41 = arith.addf %38, %40 : vector<16x64xf32>
    %cst_21 = arith.constant dense<0.000000e+00> : vector<16xf32>
    %42 = vector.multi_reduction <add>, %41, %cst_21 [1] : vector<16x64xf32> to vector<16xf32>
    %43 = vector.shape_cast %42 : vector<16xf32> to vector<16x1xf32>
    %cst_22 = arith.constant 6.400000e+01 : f32
    %44 = vector.broadcast %cst_22 : f32 to vector<16x1xf32>
    %45 = arith.divf %43, %44 : vector<16x1xf32>
    %46 = vector.broadcast %45 : vector<16x1xf32> to vector<16x64xf32>
    %47 = arith.subf %41, %46 : vector<16x64xf32>
    %48 = arith.mulf %47, %47 : vector<16x64xf32>
    %cst_23 = arith.constant dense<0.000000e+00> : vector<16xf32>
    %49 = vector.multi_reduction <add>, %48, %cst_23 [1] : vector<16x64xf32> to vector<16xf32>
    %50 = vector.shape_cast %49 : vector<16xf32> to vector<16x1xf32>
    %cst_24 = arith.constant 6.400000e+01 : f32
    %51 = vector.broadcast %cst_24 : f32 to vector<16x1xf32>
    %52 = arith.divf %50, %51 : vector<16x1xf32>
    %53 = vector.broadcast %45 : vector<16x1xf32> to vector<16x64xf32>
    %54 = arith.subf %41, %53 : vector<16x64xf32>
    %cst_25 = arith.constant 9.99999974E-6 : f32
    %55 = vector.broadcast %cst_25 : f32 to vector<16x1xf32>
    %56 = arith.addf %52, %55 : vector<16x1xf32>
    %57 = math.rsqrt %56 : vector<16x1xf32>
    %58 = vector.broadcast %57 : vector<16x1xf32> to vector<16x64xf32>
    %59 = arith.mulf %54, %58 : vector<16x64xf32>
    %c0_26 = arith.constant 0 : index
    %c0_27 = arith.constant 0 : index
    %60 = vector.load %arg8[%c0_26, %c0_27] : memref<1x64xf32, #tpu.memory_space<vmem>>, vector<1x64xf32>
    %61 = vector.broadcast %60 : vector<1x64xf32> to vector<16x64xf32>
    %62 = arith.mulf %59, %61 : vector<16x64xf32>
    %c0_28 = arith.constant 0 : index
    %c0_29 = arith.constant 0 : index
    %63 = vector.load %arg9[%c0_28, %c0_29] : memref<1x64xf32, #tpu.memory_space<vmem>>, vector<1x64xf32>
    %64 = vector.broadcast %63 : vector<1x64xf32> to vector<16x64xf32>
    %65 = arith.addf %62, %64 : vector<16x64xf32>
    %66 = arith.truncf %65 : vector<16x64xf32> to vector<16x64xbf16>
    %c0_30 = arith.constant 0 : index
    %c0_31 = arith.constant 0 : index
    %67 = vector.load %arg10[%c0_30, %c0_31] : memref<16x64xbf16, #tpu.memory_space<vmem>>, vector<16x64xbf16>
    tpu.vector_store %arg10[%c0_30, %c0_31], %66 {strides = array<i32>} : memref<16x64xbf16, #tpu.memory_space<vmem>>, vector<16x64xbf16>,
    return
  }
  func.func @transform_0(%arg0: i32) -> (i32, i32) {
    %c0_i32 = arith.constant 0 : i32
    %c0_i32_0 = arith.constant 0 : i32
    return %arg0, %c0_i32 : i32, i32
  }
  func.func @transform_1(%arg0: i32) -> (i32, i32) {
    %c0_i32 = arith.constant 0 : i32
    %c0_i32_0 = arith.constant 0 : i32
    %c0_i32_1 = arith.constant 0 : i32
    return %c0_i32, %c0_i32_0 : i32, i32
  }
  func.func @transform_2(%arg0: i32) -> (i32, i32) {
    %c0_i32 = arith.constant 0 : i32
    %c0_i32_0 = arith.constant 0 : i32
    %c0_i32_1 = arith.constant 0 : i32
    return %c0_i32, %c0_i32_0 : i32, i32
  }
  func.func @transform_3(%arg0: i32) -> (i32, i32) {
    %c0_i32 = arith.constant 0 : i32
    %c0_i32_0 = arith.constant 0 : i32
    %c0_i32_1 = arith.constant 0 : i32
    return %c0_i32, %c0_i32_0 : i32, i32
  }
  func.func @transform_4(%arg0: i32) -> (i32, i32) {
    %c0_i32 = arith.constant 0 : i32
    %c0_i32_0 = arith.constant 0 : i32
    %c0_i32_1 = arith.constant 0 : i32
    return %c0_i32, %c0_i32_0 : i32, i32
  }
  func.func @transform_5(%arg0: i32) -> (i32, i32) {
    %c0_i32 = arith.constant 0 : i32
    %c0_i32_0 = arith.constant 0 : i32
    %c0_i32_1 = arith.constant 0 : i32
    return %c0_i32, %c0_i32_0 : i32, i32
  }
  func.func @transform_6(%arg0: i32) -> (i32, i32) {
    %c0_i32 = arith.constant 0 : i32
    %c0_i32_0 = arith.constant 0 : i32
    %c0_i32_1 = arith.constant 0 : i32
    return %c0_i32, %c0_i32_0 : i32, i32
  }
  func.func @transform_7(%arg0: i32) -> (i32, i32) {
    %c0_i32 = arith.constant 0 : i32
    %c0_i32_0 = arith.constant 0 : i32
    %c0_i32_1 = arith.constant 0 : i32
    return %c0_i32, %c0_i32_0 : i32, i32
  }
  func.func @transform_8(%arg0: i32) -> (i32, i32) {
    %c0_i32 = arith.constant 0 : i32
    %c0_i32_0 = arith.constant 0 : i32
    %c0_i32_1 = arith.constant 0 : i32
    return %c0_i32, %c0_i32_0 : i32, i32
  }
  func.func @transform_9(%arg0: i32) -> (i32, i32) {
    %c0_i32 = arith.constant 0 : i32
    %c0_i32_0 = arith.constant 0 : i32
    return %arg0, %c0_i32 : i32, i32
  }
}

module attributes {stable_mosaic.version = 11 : i64} {
  func.func @_self_attn_kernel(%arg0: i32, %arg1: memref<2x8x192xbf16, #tpu.memory_space<vmem>>, %arg2: memref<8x8xf32, #tpu.memory_space<vmem>>, %arg3: memref<2x1x8xf32, #tpu.memory_space<vmem>>, %arg4: memref<64x64xbf16, #tpu.memory_space<vmem>>, %arg5: memref<1x64xf32, #tpu.memory_space<vmem>>, %arg6: memref<2x8x64xbf16, #tpu.memory_space<vmem>>, %arg7: memref<1x64xf32, #tpu.memory_space<vmem>>, %arg8: memref<1x64xf32, #tpu.memory_space<vmem>>, %arg9: memref<2x8x64xbf16, #tpu.memory_space<vmem>>) attributes {dimension_semantics = [#tpu.dimension_semantics<parallel>], iteration_bounds = array<i64: 1>, scalar_prefetch = 0 : i64, scratch_operands = 0 : i64, tpu.core_type = #tpu.core_type<tc>, window_params = [{transform_indices = @transform_0, window_bounds = array<i64: 2, 8, 192>}, {pipeline_mode = #tpu.pipeline_mode<synchronous>, transform_indices = @transform_1, window_bounds = array<i64: 8, 8>}, {transform_indices = @transform_2, window_bounds = array<i64: 2, 1, 8>}, {pipeline_mode = #tpu.pipeline_mode<synchronous>, transform_indices = @transform_3, window_bounds = array<i64: 64, 64>}, {pipeline_mode = #tpu.pipeline_mode<synchronous>, transform_indices = @transform_4, window_bounds = array<i64: 1, 64>}, {transform_indices = @transform_5, window_bounds = array<i64: 2, 8, 64>}, {pipeline_mode = #tpu.pipeline_mode<synchronous>, transform_indices = @transform_6, window_bounds = array<i64: 1, 64>}, {pipeline_mode = #tpu.pipeline_mode<synchronous>, transform_indices = @transform_7, window_bounds = array<i64: 1, 64>}, {transform_indices = @transform_8, window_bounds = array<i64: 2, 8, 64>}]} {
    %c0 = arith.constant 0 : index
    %c0_0 = arith.constant 0 : index
    %0 = vector.load %arg2[%c0, %c0_0] : memref<8x8xf32, #tpu.memory_space<vmem>>, vector<8x8xf32>
    %1 = vector.shape_cast %0 : vector<8x8xf32> to vector<1x8x8xf32>
    %c0_1 = arith.constant 0 : index
    %c0_2 = arith.constant 0 : index
    %c0_3 = arith.constant 0 : index
    %2 = vector.load %arg3[%c0_1, %c0_2, %c0_3] : memref<2x1x8xf32, #tpu.memory_space<vmem>>, vector<2x1x8xf32>
    %3 = vector.broadcast %1 : vector<1x8x8xf32> to vector<2x8x8xf32>
    %4 = vector.broadcast %2 : vector<2x1x8xf32> to vector<2x8x8xf32>
    %5 = arith.addf %3, %4 : vector<2x8x8xf32>
    %cst = arith.constant 0.000000e+00 : f32
    %6 = vector.broadcast %cst : f32 to vector<2x8x64xf32>
    %c0_4 = arith.constant 0 : index
    %c0_5 = arith.constant 0 : index
    %c0_6 = arith.constant 0 : index
    %7 = vector.load %arg1[%c0_4, %c0_5, %c0_6] : memref<2x8x192xbf16, #tpu.memory_space<vmem>>, vector<2x8x16xbf16>
    %c0_7 = arith.constant 0 : index
    %c0_8 = arith.constant 0 : index
    %c64 = arith.constant 64 : index
    %8 = vector.load %arg1[%c0_7, %c0_8, %c64] : memref<2x8x192xbf16, #tpu.memory_space<vmem>>, vector<2x8x16xbf16>
    %c0_9 = arith.constant 0 : index
    %c0_10 = arith.constant 0 : index
    %c128 = arith.constant 128 : index
    %9 = vector.load %arg1[%c0_9, %c0_10, %c128] : memref<2x8x192xbf16, #tpu.memory_space<vmem>>, vector<2x8x16xbf16>
    "tpu.trace_start"() <{level = 10 : i32, message = "bqd,bkd->bqk"}> : () -> ()
    %cst_11 = arith.constant dense<0.000000e+00> : vector<2x8x8xf32>
    %10 = tpu.matmul %7, %8, %cst_11 {dimension_numbers = #tpu.dot_dimension_numbers<[2], [2], [1], [1], [0, 0, 0, 1, 1, 1], [0], [0]>} : vector<2x8x16xbf16>, vector<2x8x16xbf16>, vector<2x8x8xf32> -> vector<2x8x8xf32>
    "tpu.trace_stop"() : () -> ()
    %cst_12 = arith.constant 2.500000e-01 : f32
    %11 = vector.broadcast %cst_12 : f32 to vector<2x8x8xf32>
    %12 = arith.mulf %10, %11 : vector<2x8x8xf32>
    %13 = arith.addf %12, %5 : vector<2x8x8xf32>
    %cst_13 = arith.constant dense<0xFF800000> : vector<2x8xf32>
    %14 = vector.multi_reduction <maximumf>, %13, %cst_13 [2] : vector<2x8x8xf32> to vector<2x8xf32>
    %15 = vector.shape_cast %14 : vector<2x8xf32> to vector<2x8x1xf32>
    %16 = vector.broadcast %15 : vector<2x8x1xf32> to vector<2x8x8xf32>
    %17 = arith.subf %13, %16 : vector<2x8x8xf32>
    %18 = math.exp %17 : vector<2x8x8xf32>
    %cst_14 = arith.constant dense<0.000000e+00> : vector<2x8xf32>
    %19 = vector.multi_reduction <add>, %18, %cst_14 [2] : vector<2x8x8xf32> to vector<2x8xf32>
    %20 = vector.shape_cast %19 : vector<2x8xf32> to vector<2x8x1xf32>
    %21 = tpu.reciprocal %20 {approx = true} : vector<2x8x1xf32> -> vector<2x8x1xf32>
    %22 = vector.broadcast %21 : vector<2x8x1xf32> to vector<2x8x8xf32>
    %23 = arith.mulf %18, %22 : vector<2x8x8xf32>
    %24 = arith.truncf %23 : vector<2x8x8xf32> to vector<2x8x8xbf16>
    "tpu.trace_start"() <{level = 10 : i32, message = "bqk,bkd->bqd"}> : () -> ()
    %cst_15 = arith.constant dense<0.000000e+00> : vector<2x8x16xf32>
    %25 = tpu.matmul %24, %9, %cst_15 {dimension_numbers = #tpu.dot_dimension_numbers<[2], [1], [1], [2], [0, 0, 0, 1, 1, 2], [0], [0]>} : vector<2x8x8xbf16>, vector<2x8x16xbf16>, vector<2x8x16xf32> -> vector<2x8x16xf32>
    "tpu.trace_stop"() : () -> ()
    %26 = arith.truncf %25 : vector<2x8x16xf32> to vector<2x8x16xbf16>
    %c0_16 = arith.constant 0 : index
    %c0_17 = arith.constant 0 : index
    %27 = vector.load %arg4[%c0_16, %c0_17] : memref<64x64xbf16, #tpu.memory_space<vmem>>, vector<16x64xbf16>
    "tpu.trace_start"() <{level = 10 : i32, message = "bqd,de->bqe"}> : () -> ()
    %cst_18 = arith.constant dense<0.000000e+00> : vector<2x8x64xf32>
    %28 = tpu.matmul %26, %27, %cst_18 {dimension_numbers = #tpu.dot_dimension_numbers<[2], [0], [0, 1], [1], [0, 0, 0, 1, 1, 1], [], []>} : vector<2x8x16xbf16>, vector<16x64xbf16>, vector<2x8x64xf32> -> vector<2x8x64xf32>
    "tpu.trace_stop"() : () -> ()
    %29 = arith.addf %6, %28 : vector<2x8x64xf32>
    %c0_19 = arith.constant 0 : index
    %c0_20 = arith.constant 0 : index
    %c16 = arith.constant 16 : index
    %30 = vector.load %arg1[%c0_19, %c0_20, %c16] : memref<2x8x192xbf16, #tpu.memory_space<vmem>>, vector<2x8x16xbf16>
    %c0_21 = arith.constant 0 : index
    %c0_22 = arith.constant 0 : index
    %c80 = arith.constant 80 : index
    %31 = vector.load %arg1[%c0_21, %c0_22, %c80] : memref<2x8x192xbf16, #tpu.memory_space<vmem>>, vector<2x8x16xbf16>
    %c0_23 = arith.constant 0 : index
    %c0_24 = arith.constant 0 : index
    %c144 = arith.constant 144 : index
    %32 = vector.load %arg1[%c0_23, %c0_24, %c144] : memref<2x8x192xbf16, #tpu.memory_space<vmem>>, vector<2x8x16xbf16>
    "tpu.trace_start"() <{level = 10 : i32, message = "bqd,bkd->bqk"}> : () -> ()
    %cst_25 = arith.constant dense<0.000000e+00> : vector<2x8x8xf32>
    %33 = tpu.matmul %30, %31, %cst_25 {dimension_numbers = #tpu.dot_dimension_numbers<[2], [2], [1], [1], [0, 0, 0, 1, 1, 1], [0], [0]>} : vector<2x8x16xbf16>, vector<2x8x16xbf16>, vector<2x8x8xf32> -> vector<2x8x8xf32>
    "tpu.trace_stop"() : () -> ()
    %cst_26 = arith.constant 2.500000e-01 : f32
    %34 = vector.broadcast %cst_26 : f32 to vector<2x8x8xf32>
    %35 = arith.mulf %33, %34 : vector<2x8x8xf32>
    %36 = arith.addf %35, %5 : vector<2x8x8xf32>
    %cst_27 = arith.constant dense<0xFF800000> : vector<2x8xf32>
    %37 = vector.multi_reduction <maximumf>, %36, %cst_27 [2] : vector<2x8x8xf32> to vector<2x8xf32>
    %38 = vector.shape_cast %37 : vector<2x8xf32> to vector<2x8x1xf32>
    %39 = vector.broadcast %38 : vector<2x8x1xf32> to vector<2x8x8xf32>
    %40 = arith.subf %36, %39 : vector<2x8x8xf32>
    %41 = math.exp %40 : vector<2x8x8xf32>
    %cst_28 = arith.constant dense<0.000000e+00> : vector<2x8xf32>
    %42 = vector.multi_reduction <add>, %41, %cst_28 [2] : vector<2x8x8xf32> to vector<2x8xf32>
    %43 = vector.shape_cast %42 : vector<2x8xf32> to vector<2x8x1xf32>
    %44 = tpu.reciprocal %43 {approx = true} : vector<2x8x1xf32> -> vector<2x8x1xf32>
    %45 = vector.broadcast %44 : vector<2x8x1xf32> to vector<2x8x8xf32>
    %46 = arith.mulf %41, %45 : vector<2x8x8xf32>
    %47 = arith.truncf %46 : vector<2x8x8xf32> to vector<2x8x8xbf16>
    "tpu.trace_start"() <{level = 10 : i32, message = "bqk,bkd->bqd"}> : () -> ()
    %cst_29 = arith.constant dense<0.000000e+00> : vector<2x8x16xf32>
    %48 = tpu.matmul %47, %32, %cst_29 {dimension_numbers = #tpu.dot_dimension_numbers<[2], [1], [1], [2], [0, 0, 0, 1, 1, 2], [0], [0]>} : vector<2x8x8xbf16>, vector<2x8x16xbf16>, vector<2x8x16xf32> -> vector<2x8x16xf32>
    "tpu.trace_stop"() : () -> ()
    %49 = arith.truncf %48 : vector<2x8x16xf32> to vector<2x8x16xbf16>
    %c16_30 = arith.constant 16 : index
    %c0_31 = arith.constant 0 : index
    %50 = vector.load %arg4[%c16_30, %c0_31] : memref<64x64xbf16, #tpu.memory_space<vmem>>, vector<16x64xbf16>
    "tpu.trace_start"() <{level = 10 : i32, message = "bqd,de->bqe"}> : () -> ()
    %cst_32 = arith.constant dense<0.000000e+00> : vector<2x8x64xf32>
    %51 = tpu.matmul %49, %50, %cst_32 {dimension_numbers = #tpu.dot_dimension_numbers<[2], [0], [0, 1], [1], [0, 0, 0, 1, 1, 1], [], []>} : vector<2x8x16xbf16>, vector<16x64xbf16>, vector<2x8x64xf32> -> vector<2x8x64xf32>
    "tpu.trace_stop"() : () -> ()
    %52 = arith.addf %29, %51 : vector<2x8x64xf32>
    %c0_33 = arith.constant 0 : index
    %c0_34 = arith.constant 0 : index
    %c32 = arith.constant 32 : index
    %53 = vector.load %arg1[%c0_33, %c0_34, %c32] : memref<2x8x192xbf16, #tpu.memory_space<vmem>>, vector<2x8x16xbf16>
    %c0_35 = arith.constant 0 : index
    %c0_36 = arith.constant 0 : index
    %c96 = arith.constant 96 : index
    %54 = vector.load %arg1[%c0_35, %c0_36, %c96] : memref<2x8x192xbf16, #tpu.memory_space<vmem>>, vector<2x8x16xbf16>
    %c0_37 = arith.constant 0 : index
    %c0_38 = arith.constant 0 : index
    %c160 = arith.constant 160 : index
    %55 = vector.load %arg1[%c0_37, %c0_38, %c160] : memref<2x8x192xbf16, #tpu.memory_space<vmem>>, vector<2x8x16xbf16>
    "tpu.trace_start"() <{level = 10 : i32, message = "bqd,bkd->bqk"}> : () -> ()
    %cst_39 = arith.constant dense<0.000000e+00> : vector<2x8x8xf32>
    %56 = tpu.matmul %53, %54, %cst_39 {dimension_numbers = #tpu.dot_dimension_numbers<[2], [2], [1], [1], [0, 0, 0, 1, 1, 1], [0], [0]>} : vector<2x8x16xbf16>, vector<2x8x16xbf16>, vector<2x8x8xf32> -> vector<2x8x8xf32>
    "tpu.trace_stop"() : () -> ()
    %cst_40 = arith.constant 2.500000e-01 : f32
    %57 = vector.broadcast %cst_40 : f32 to vector<2x8x8xf32>
    %58 = arith.mulf %56, %57 : vector<2x8x8xf32>
    %59 = arith.addf %58, %5 : vector<2x8x8xf32>
    %cst_41 = arith.constant dense<0xFF800000> : vector<2x8xf32>
    %60 = vector.multi_reduction <maximumf>, %59, %cst_41 [2] : vector<2x8x8xf32> to vector<2x8xf32>
    %61 = vector.shape_cast %60 : vector<2x8xf32> to vector<2x8x1xf32>
    %62 = vector.broadcast %61 : vector<2x8x1xf32> to vector<2x8x8xf32>
    %63 = arith.subf %59, %62 : vector<2x8x8xf32>
    %64 = math.exp %63 : vector<2x8x8xf32>
    %cst_42 = arith.constant dense<0.000000e+00> : vector<2x8xf32>
    %65 = vector.multi_reduction <add>, %64, %cst_42 [2] : vector<2x8x8xf32> to vector<2x8xf32>
    %66 = vector.shape_cast %65 : vector<2x8xf32> to vector<2x8x1xf32>
    %67 = tpu.reciprocal %66 {approx = true} : vector<2x8x1xf32> -> vector<2x8x1xf32>
    %68 = vector.broadcast %67 : vector<2x8x1xf32> to vector<2x8x8xf32>
    %69 = arith.mulf %64, %68 : vector<2x8x8xf32>
    %70 = arith.truncf %69 : vector<2x8x8xf32> to vector<2x8x8xbf16>
    "tpu.trace_start"() <{level = 10 : i32, message = "bqk,bkd->bqd"}> : () -> ()
    %cst_43 = arith.constant dense<0.000000e+00> : vector<2x8x16xf32>
    %71 = tpu.matmul %70, %55, %cst_43 {dimension_numbers = #tpu.dot_dimension_numbers<[2], [1], [1], [2], [0, 0, 0, 1, 1, 2], [0], [0]>} : vector<2x8x8xbf16>, vector<2x8x16xbf16>, vector<2x8x16xf32> -> vector<2x8x16xf32>
    "tpu.trace_stop"() : () -> ()
    %72 = arith.truncf %71 : vector<2x8x16xf32> to vector<2x8x16xbf16>
    %c32_44 = arith.constant 32 : index
    %c0_45 = arith.constant 0 : index
    %73 = vector.load %arg4[%c32_44, %c0_45] : memref<64x64xbf16, #tpu.memory_space<vmem>>, vector<16x64xbf16>
    "tpu.trace_start"() <{level = 10 : i32, message = "bqd,de->bqe"}> : () -> ()
    %cst_46 = arith.constant dense<0.000000e+00> : vector<2x8x64xf32>
    %74 = tpu.matmul %72, %73, %cst_46 {dimension_numbers = #tpu.dot_dimension_numbers<[2], [0], [0, 1], [1], [0, 0, 0, 1, 1, 1], [], []>} : vector<2x8x16xbf16>, vector<16x64xbf16>, vector<2x8x64xf32> -> vector<2x8x64xf32>
    "tpu.trace_stop"() : () -> ()
    %75 = arith.addf %52, %74 : vector<2x8x64xf32>
    %c0_47 = arith.constant 0 : index
    %c0_48 = arith.constant 0 : index
    %c48 = arith.constant 48 : index
    %76 = vector.load %arg1[%c0_47, %c0_48, %c48] : memref<2x8x192xbf16, #tpu.memory_space<vmem>>, vector<2x8x16xbf16>
    %c0_49 = arith.constant 0 : index
    %c0_50 = arith.constant 0 : index
    %c112 = arith.constant 112 : index
    %77 = vector.load %arg1[%c0_49, %c0_50, %c112] : memref<2x8x192xbf16, #tpu.memory_space<vmem>>, vector<2x8x16xbf16>
    %c0_51 = arith.constant 0 : index
    %c0_52 = arith.constant 0 : index
    %c176 = arith.constant 176 : index
    %78 = vector.load %arg1[%c0_51, %c0_52, %c176] : memref<2x8x192xbf16, #tpu.memory_space<vmem>>, vector<2x8x16xbf16>
    "tpu.trace_start"() <{level = 10 : i32, message = "bqd,bkd->bqk"}> : () -> ()
    %cst_53 = arith.constant dense<0.000000e+00> : vector<2x8x8xf32>
    %79 = tpu.matmul %76, %77, %cst_53 {dimension_numbers = #tpu.dot_dimension_numbers<[2], [2], [1], [1], [0, 0, 0, 1, 1, 1], [0], [0]>} : vector<2x8x16xbf16>, vector<2x8x16xbf16>, vector<2x8x8xf32> -> vector<2x8x8xf32>
    "tpu.trace_stop"() : () -> ()
    %cst_54 = arith.constant 2.500000e-01 : f32
    %80 = vector.broadcast %cst_54 : f32 to vector<2x8x8xf32>
    %81 = arith.mulf %79, %80 : vector<2x8x8xf32>
    %82 = arith.addf %81, %5 : vector<2x8x8xf32>
    %cst_55 = arith.constant dense<0xFF800000> : vector<2x8xf32>
    %83 = vector.multi_reduction <maximumf>, %82, %cst_55 [2] : vector<2x8x8xf32> to vector<2x8xf32>
    %84 = vector.shape_cast %83 : vector<2x8xf32> to vector<2x8x1xf32>
    %85 = vector.broadcast %84 : vector<2x8x1xf32> to vector<2x8x8xf32>
    %86 = arith.subf %82, %85 : vector<2x8x8xf32>
    %87 = math.exp %86 : vector<2x8x8xf32>
    %cst_56 = arith.constant dense<0.000000e+00> : vector<2x8xf32>
    %88 = vector.multi_reduction <add>, %87, %cst_56 [2] : vector<2x8x8xf32> to vector<2x8xf32>
    %89 = vector.shape_cast %88 : vector<2x8xf32> to vector<2x8x1xf32>
    %90 = tpu.reciprocal %89 {approx = true} : vector<2x8x1xf32> -> vector<2x8x1xf32>
    %91 = vector.broadcast %90 : vector<2x8x1xf32> to vector<2x8x8xf32>
    %92 = arith.mulf %87, %91 : vector<2x8x8xf32>
    %93 = arith.truncf %92 : vector<2x8x8xf32> to vector<2x8x8xbf16>
    "tpu.trace_start"() <{level = 10 : i32, message = "bqk,bkd->bqd"}> : () -> ()
    %cst_57 = arith.constant dense<0.000000e+00> : vector<2x8x16xf32>
    %94 = tpu.matmul %93, %78, %cst_57 {dimension_numbers = #tpu.dot_dimension_numbers<[2], [1], [1], [2], [0, 0, 0, 1, 1, 2], [0], [0]>} : vector<2x8x8xbf16>, vector<2x8x16xbf16>, vector<2x8x16xf32> -> vector<2x8x16xf32>
    "tpu.trace_stop"() : () -> ()
    %95 = arith.truncf %94 : vector<2x8x16xf32> to vector<2x8x16xbf16>
    %c48_58 = arith.constant 48 : index
    %c0_59 = arith.constant 0 : index
    %96 = vector.load %arg4[%c48_58, %c0_59] : memref<64x64xbf16, #tpu.memory_space<vmem>>, vector<16x64xbf16>
    "tpu.trace_start"() <{level = 10 : i32, message = "bqd,de->bqe"}> : () -> ()
    %cst_60 = arith.constant dense<0.000000e+00> : vector<2x8x64xf32>
    %97 = tpu.matmul %95, %96, %cst_60 {dimension_numbers = #tpu.dot_dimension_numbers<[2], [0], [0, 1], [1], [0, 0, 0, 1, 1, 1], [], []>} : vector<2x8x16xbf16>, vector<16x64xbf16>, vector<2x8x64xf32> -> vector<2x8x64xf32>
    "tpu.trace_stop"() : () -> ()
    %98 = arith.addf %75, %97 : vector<2x8x64xf32>
    %c0_61 = arith.constant 0 : index
    %c0_62 = arith.constant 0 : index
    %c0_63 = arith.constant 0 : index
    %99 = vector.load %arg6[%c0_61, %c0_62, %c0_63] : memref<2x8x64xbf16, #tpu.memory_space<vmem>>, vector<2x8x64xbf16>
    %100 = arith.extf %99 : vector<2x8x64xbf16> to vector<2x8x64xf32>
    %101 = arith.addf %100, %98 : vector<2x8x64xf32>
    %c0_64 = arith.constant 0 : index
    %c0_65 = arith.constant 0 : index
    %102 = vector.load %arg5[%c0_64, %c0_65] : memref<1x64xf32, #tpu.memory_space<vmem>>, vector<1x64xf32>
    %103 = vector.shape_cast %102 : vector<1x64xf32> to vector<1x1x64xf32>
    %104 = vector.broadcast %103 : vector<1x1x64xf32> to vector<2x8x64xf32>
    %105 = arith.addf %101, %104 : vector<2x8x64xf32>
    %cst_66 = arith.constant dense<0.000000e+00> : vector<2x8xf32>
    %106 = vector.multi_reduction <add>, %105, %cst_66 [2] : vector<2x8x64xf32> to vector<2x8xf32>
    %107 = vector.shape_cast %106 : vector<2x8xf32> to vector<2x8x1xf32>
    %cst_67 = arith.constant 6.400000e+01 : f32
    %108 = vector.broadcast %cst_67 : f32 to vector<2x8x1xf32>
    %109 = arith.divf %107, %108 : vector<2x8x1xf32>
    %110 = vector.broadcast %109 : vector<2x8x1xf32> to vector<2x8x64xf32>
    %111 = arith.subf %105, %110 : vector<2x8x64xf32>
    %112 = arith.mulf %111, %111 : vector<2x8x64xf32>
    %cst_68 = arith.constant dense<0.000000e+00> : vector<2x8xf32>
    %113 = vector.multi_reduction <add>, %112, %cst_68 [2] : vector<2x8x64xf32> to vector<2x8xf32>
    %114 = vector.shape_cast %113 : vector<2x8xf32> to vector<2x8x1xf32>
    %cst_69 = arith.constant 6.400000e+01 : f32
    %115 = vector.broadcast %cst_69 : f32 to vector<2x8x1xf32>
    %116 = arith.divf %114, %115 : vector<2x8x1xf32>
    %117 = vector.broadcast %109 : vector<2x8x1xf32> to vector<2x8x64xf32>
    %118 = arith.subf %105, %117 : vector<2x8x64xf32>
    %cst_70 = arith.constant 9.99999974E-6 : f32
    %119 = vector.broadcast %cst_70 : f32 to vector<2x8x1xf32>
    %120 = arith.addf %116, %119 : vector<2x8x1xf32>
    %121 = math.rsqrt %120 : vector<2x8x1xf32>
    %122 = vector.broadcast %121 : vector<2x8x1xf32> to vector<2x8x64xf32>
    %123 = arith.mulf %118, %122 : vector<2x8x64xf32>
    %c0_71 = arith.constant 0 : index
    %c0_72 = arith.constant 0 : index
    %124 = vector.load %arg7[%c0_71, %c0_72] : memref<1x64xf32, #tpu.memory_space<vmem>>, vector<1x64xf32>
    %125 = vector.shape_cast %124 : vector<1x64xf32> to vector<1x1x64xf32>
    %126 = vector.broadcast %125 : vector<1x1x64xf32> to vector<2x8x64xf32>
    %127 = arith.mulf %123, %126 : vector<2x8x64xf32>
    %c0_73 = arith.constant 0 : index
    %c0_74 = arith.constant 0 : index
    %128 = vector.load %arg8[%c0_73, %c0_74] : memref<1x64xf32, #tpu.memory_space<vmem>>, vector<1x64xf32>
    %129 = vector.shape_cast %128 : vector<1x64xf32> to vector<1x1x64xf32>
    %130 = vector.broadcast %129 : vector<1x1x64xf32> to vector<2x8x64xf32>
    %131 = arith.addf %127, %130 : vector<2x8x64xf32>
    %132 = arith.truncf %131 : vector<2x8x64xf32> to vector<2x8x64xbf16>
    %c0_75 = arith.constant 0 : index
    %c0_76 = arith.constant 0 : index
    %c0_77 = arith.constant 0 : index
    %133 = vector.load %arg9[%c0_75, %c0_76, %c0_77] : memref<2x8x64xbf16, #tpu.memory_space<vmem>>, vector<2x8x64xbf16>
    tpu.vector_store %arg9[%c0_75, %c0_76, %c0_77], %132 {strides = array<i32>} : memref<2x8x64xbf16, #tpu.memory_space<vmem>>, vector<2x8x64xbf16>,
    return
  }
  func.func @transform_0(%arg0: i32) -> (i32, i32, i32) {
    %c0_i32 = arith.constant 0 : i32
    %c0_i32_0 = arith.constant 0 : i32
    %c0_i32_1 = arith.constant 0 : i32
    return %arg0, %c0_i32, %c0_i32_0 : i32, i32, i32
  }
  func.func @transform_1(%arg0: i32) -> (i32, i32) {
    %c0_i32 = arith.constant 0 : i32
    %c0_i32_0 = arith.constant 0 : i32
    %c0_i32_1 = arith.constant 0 : i32
    return %c0_i32, %c0_i32_0 : i32, i32
  }
  func.func @transform_2(%arg0: i32) -> (i32, i32, i32) {
    %c0_i32 = arith.constant 0 : i32
    %c0_i32_0 = arith.constant 0 : i32
    %c0_i32_1 = arith.constant 0 : i32
    return %arg0, %c0_i32, %c0_i32_0 : i32, i32, i32
  }
  func.func @transform_3(%arg0: i32) -> (i32, i32) {
    %c0_i32 = arith.constant 0 : i32
    %c0_i32_0 = arith.constant 0 : i32
    %c0_i32_1 = arith.constant 0 : i32
    return %c0_i32, %c0_i32_0 : i32, i32
  }
  func.func @transform_4(%arg0: i32) -> (i32, i32) {
    %c0_i32 = arith.constant 0 : i32
    %c0_i32_0 = arith.constant 0 : i32
    %c0_i32_1 = arith.constant 0 : i32
    return %c0_i32, %c0_i32_0 : i32, i32
  }
  func.func @transform_5(%arg0: i32) -> (i32, i32, i32) {
    %c0_i32 = arith.constant 0 : i32
    %c0_i32_0 = arith.constant 0 : i32
    %c0_i32_1 = arith.constant 0 : i32
    return %arg0, %c0_i32, %c0_i32_0 : i32, i32, i32
  }
  func.func @transform_6(%arg0: i32) -> (i32, i32) {
    %c0_i32 = arith.constant 0 : i32
    %c0_i32_0 = arith.constant 0 : i32
    %c0_i32_1 = arith.constant 0 : i32
    return %c0_i32, %c0_i32_0 : i32, i32
  }
  func.func @transform_7(%arg0: i32) -> (i32, i32) {
    %c0_i32 = arith.constant 0 : i32
    %c0_i32_0 = arith.constant 0 : i32
    %c0_i32_1 = arith.constant 0 : i32
    return %c0_i32, %c0_i32_0 : i32, i32
  }
  func.func @transform_8(%arg0: i32) -> (i32, i32, i32) {
    %c0_i32 = arith.constant 0 : i32
    %c0_i32_0 = arith.constant 0 : i32
    %c0_i32_1 = arith.constant 0 : i32
    return %arg0, %c0_i32, %c0_i32_0 : i32, i32, i32
  }
}

module attributes {stable_mosaic.version = 11 : i64} {
  func.func @_linear_kernel(%arg0: i32, %arg1: i32, %arg2: memref<16x64xbf16, #tpu.memory_space<vmem>>, %arg3: memref<64x128xbf16, #tpu.memory_space<vmem>>, %arg4: memref<1x128xf32, #tpu.memory_space<vmem>>, %arg5: memref<16x128xbf16, #tpu.memory_space<vmem>>) attributes {dimension_semantics = [#tpu.dimension_semantics<parallel>, #tpu.dimension_semantics<parallel>], iteration_bounds = array<i64: 1, 1>, scalar_prefetch = 0 : i64, scratch_operands = 0 : i64, tpu.core_type = #tpu.core_type<tc>, window_params = [{transform_indices = @transform_0, window_bounds = array<i64: 16, 64>}, {transform_indices = @transform_1, window_bounds = array<i64: 64, 128>}, {transform_indices = @transform_2, window_bounds = array<i64: 1, 128>}, {transform_indices = @transform_3, window_bounds = array<i64: 16, 128>}]} {
    %c0 = arith.constant 0 : index
    %c0_0 = arith.constant 0 : index
    %0 = vector.load %arg2[%c0, %c0_0] : memref<16x64xbf16, #tpu.memory_space<vmem>>, vector<16x64xbf16>
    %c0_1 = arith.constant 0 : index
    %c0_2 = arith.constant 0 : index
    %1 = vector.load %arg3[%c0_1, %c0_2] : memref<64x128xbf16, #tpu.memory_space<vmem>>, vector<64x128xbf16>
    %cst = arith.constant dense<0.000000e+00> : vector<16x128xf32>
    %2 = tpu.matmul %0, %1, %cst {dimension_numbers = #tpu.dot_dimension_numbers<[1], [0], [0], [1], [0, 0, 1, 1], [], []>} : vector<16x64xbf16>, vector<64x128xbf16>, vector<16x128xf32> -> vector<16x128xf32>
    %c0_3 = arith.constant 0 : index
    %c0_4 = arith.constant 0 : index
    %3 = vector.load %arg4[%c0_3, %c0_4] : memref<1x128xf32, #tpu.memory_space<vmem>>, vector<1x128xf32>
    %4 = vector.broadcast %3 : vector<1x128xf32> to vector<16x128xf32>
    %5 = arith.addf %2, %4 : vector<16x128xf32>
    %6 = arith.truncf %5 : vector<16x128xf32> to vector<16x128xbf16>
    %c0_5 = arith.constant 0 : index
    %c0_6 = arith.constant 0 : index
    %7 = vector.load %arg5[%c0_5, %c0_6] : memref<16x128xbf16, #tpu.memory_space<vmem>>, vector<16x128xbf16>
    tpu.vector_store %arg5[%c0_5, %c0_6], %6 {strides = array<i32>} : memref<16x128xbf16, #tpu.memory_space<vmem>>, vector<16x128xbf16>,
    return
  }
  func.func @transform_0(%arg0: i32, %arg1: i32) -> (i32, i32) {
    %c0_i32 = arith.constant 0 : i32
    %c0_i32_0 = arith.constant 0 : i32
    return %arg0, %c0_i32 : i32, i32
  }
  func.func @transform_1(%arg0: i32, %arg1: i32) -> (i32, i32) {
    %c0_i32 = arith.constant 0 : i32
    %c0_i32_0 = arith.constant 0 : i32
    return %c0_i32, %arg1 : i32, i32
  }
  func.func @transform_2(%arg0: i32, %arg1: i32) -> (i32, i32) {
    %c0_i32 = arith.constant 0 : i32
    %c0_i32_0 = arith.constant 0 : i32
    return %c0_i32, %arg1 : i32, i32
  }
  func.func @transform_3(%arg0: i32, %arg1: i32) -> (i32, i32) {
    %c0_i32 = arith.constant 0 : i32
    return %arg0, %arg1 : i32, i32
  }
}

module attributes {stable_mosaic.version = 11 : i64} {
  func.func @_linear_kernel(%arg0: i32, %arg1: i32, %arg2: memref<16x64xbf16, #tpu.memory_space<vmem>>, %arg3: memref<64x64xbf16, #tpu.memory_space<vmem>>, %arg4: memref<1x64xf32, #tpu.memory_space<vmem>>, %arg5: memref<16x64xbf16, #tpu.memory_space<vmem>>) attributes {dimension_semantics = [#tpu.dimension_semantics<parallel>, #tpu.dimension_semantics<parallel>], iteration_bounds = array<i64: 1, 1>, scalar_prefetch = 0 : i64, scratch_operands = 0 : i64, tpu.core_type = #tpu.core_type<tc>, window_params = [{transform_indices = @transform_0, window_bounds = array<i64: 16, 64>}, {transform_indices = @transform_1, window_bounds = array<i64: 64, 64>}, {transform_indices = @transform_2, window_bounds = array<i64: 1, 64>}, {transform_indices = @transform_3, window_bounds = array<i64: 16, 64>}]} {
    %c0 = arith.constant 0 : index
    %c0_0 = arith.constant 0 : index
    %0 = vector.load %arg2[%c0, %c0_0] : memref<16x64xbf16, #tpu.memory_space<vmem>>, vector<16x64xbf16>
    %c0_1 = arith.constant 0 : index
    %c0_2 = arith.constant 0 : index
    %1 = vector.load %arg3[%c0_1, %c0_2] : memref<64x64xbf16, #tpu.memory_space<vmem>>, vector<64x64xbf16>
    %cst = arith.constant dense<0.000000e+00> : vector<16x64xf32>
    %2 = tpu.matmul %0, %1, %cst {dimension_numbers = #tpu.dot_dimension_numbers<[1], [0], [0], [1], [0, 0, 1, 1], [], []>} : vector<16x64xbf16>, vector<64x64xbf16>, vector<16x64xf32> -> vector<16x64xf32>
    %c0_3 = arith.constant 0 : index
    %c0_4 = arith.constant 0 : index
    %3 = vector.load %arg4[%c0_3, %c0_4] : memref<1x64xf32, #tpu.memory_space<vmem>>, vector<1x64xf32>
    %4 = vector.broadcast %3 : vector<1x64xf32> to vector<16x64xf32>
    %5 = arith.addf %2, %4 : vector<16x64xf32>
    %6 = arith.truncf %5 : vector<16x64xf32> to vector<16x64xbf16>
    %c0_5 = arith.constant 0 : index
    %c0_6 = arith.constant 0 : index
    %7 = vector.load %arg5[%c0_5, %c0_6] : memref<16x64xbf16, #tpu.memory_space<vmem>>, vector<16x64xbf16>
    tpu.vector_store %arg5[%c0_5, %c0_6], %6 {strides = array<i32>} : memref<16x64xbf16, #tpu.memory_space<vmem>>, vector<16x64xbf16>,
    return
  }
  func.func @transform_0(%arg0: i32, %arg1: i32) -> (i32, i32) {
    %c0_i32 = arith.constant 0 : i32
    %c0_i32_0 = arith.constant 0 : i32
    return %arg0, %c0_i32 : i32, i32
  }
  func.func @transform_1(%arg0: i32, %arg1: i32) -> (i32, i32) {
    %c0_i32 = arith.constant 0 : i32
    %c0_i32_0 = arith.constant 0 : i32
    return %c0_i32, %arg1 : i32, i32
  }
  func.func @transform_2(%arg0: i32, %arg1: i32) -> (i32, i32) {
    %c0_i32 = arith.constant 0 : i32
    %c0_i32_0 = arith.constant 0 : i32
    return %c0_i32, %arg1 : i32, i32
  }
  func.func @transform_3(%arg0: i32, %arg1: i32) -> (i32, i32) {
    %c0_i32 = arith.constant 0 : i32
    return %arg0, %arg1 : i32, i32
  }
}

module attributes {stable_mosaic.version = 11 : i64} {
  func.func @_cross_attn_kernel(%arg0: i32, %arg1: memref<2x8x64xbf16, #tpu.memory_space<vmem>>, %arg2: memref<2x8x128xbf16, #tpu.memory_space<vmem>>, %arg3: memref<8x8xf32, #tpu.memory_space<vmem>>, %arg4: memref<2x1x8xf32, #tpu.memory_space<vmem>>, %arg5: memref<64x64xbf16, #tpu.memory_space<vmem>>, %arg6: memref<1x64xf32, #tpu.memory_space<vmem>>, %arg7: memref<2x8x64xbf16, #tpu.memory_space<vmem>>, %arg8: memref<1x64xf32, #tpu.memory_space<vmem>>, %arg9: memref<1x64xf32, #tpu.memory_space<vmem>>, %arg10: memref<2x8x64xbf16, #tpu.memory_space<vmem>>) attributes {dimension_semantics = [#tpu.dimension_semantics<parallel>], iteration_bounds = array<i64: 1>, scalar_prefetch = 0 : i64, scratch_operands = 0 : i64, tpu.core_type = #tpu.core_type<tc>, window_params = [{transform_indices = @transform_0, window_bounds = array<i64: 2, 8, 64>}, {transform_indices = @transform_1, window_bounds = array<i64: 2, 8, 128>}, {pipeline_mode = #tpu.pipeline_mode<synchronous>, transform_indices = @transform_2, window_bounds = array<i64: 8, 8>}, {transform_indices = @transform_3, window_bounds = array<i64: 2, 1, 8>}, {pipeline_mode = #tpu.pipeline_mode<synchronous>, transform_indices = @transform_4, window_bounds = array<i64: 64, 64>}, {pipeline_mode = #tpu.pipeline_mode<synchronous>, transform_indices = @transform_5, window_bounds = array<i64: 1, 64>}, {transform_indices = @transform_6, window_bounds = array<i64: 2, 8, 64>}, {pipeline_mode = #tpu.pipeline_mode<synchronous>, transform_indices = @transform_7, window_bounds = array<i64: 1, 64>}, {pipeline_mode = #tpu.pipeline_mode<synchronous>, transform_indices = @transform_8, window_bounds = array<i64: 1, 64>}, {transform_indices = @transform_9, window_bounds = array<i64: 2, 8, 64>}]} {
    %c0 = arith.constant 0 : index
    %c0_0 = arith.constant 0 : index
    %0 = vector.load %arg3[%c0, %c0_0] : memref<8x8xf32, #tpu.memory_space<vmem>>, vector<8x8xf32>
    %1 = vector.shape_cast %0 : vector<8x8xf32> to vector<1x8x8xf32>
    %c0_1 = arith.constant 0 : index
    %c0_2 = arith.constant 0 : index
    %c0_3 = arith.constant 0 : index
    %2 = vector.load %arg4[%c0_1, %c0_2, %c0_3] : memref<2x1x8xf32, #tpu.memory_space<vmem>>, vector<2x1x8xf32>
    %3 = vector.broadcast %1 : vector<1x8x8xf32> to vector<2x8x8xf32>
    %4 = vector.broadcast %2 : vector<2x1x8xf32> to vector<2x8x8xf32>
    %5 = arith.addf %3, %4 : vector<2x8x8xf32>
    %cst = arith.constant 0.000000e+00 : f32
    %6 = vector.broadcast %cst : f32 to vector<2x8x64xf32>
    %c0_4 = arith.constant 0 : index
    %c0_5 = arith.constant 0 : index
    %c0_6 = arith.constant 0 : index
    %7 = vector.load %arg1[%c0_4, %c0_5, %c0_6] : memref<2x8x64xbf16, #tpu.memory_space<vmem>>, vector<2x8x16xbf16>
    %c0_7 = arith.constant 0 : index
    %c0_8 = arith.constant 0 : index
    %c0_9 = arith.constant 0 : index
    %8 = vector.load %arg2[%c0_7, %c0_8, %c0_9] : memref<2x8x128xbf16, #tpu.memory_space<vmem>>, vector<2x8x16xbf16>
    %c0_10 = arith.constant 0 : index
    %c0_11 = arith.constant 0 : index
    %c64 = arith.constant 64 : index
    %9 = vector.load %arg2[%c0_10, %c0_11, %c64] : memref<2x8x128xbf16, #tpu.memory_space<vmem>>, vector<2x8x16xbf16>
    "tpu.trace_start"() <{level = 10 : i32, message = "bqd,bkd->bqk"}> : () -> ()
    %cst_12 = arith.constant dense<0.000000e+00> : vector<2x8x8xf32>
    %10 = tpu.matmul %7, %8, %cst_12 {dimension_numbers = #tpu.dot_dimension_numbers<[2], [2], [1], [1], [0, 0, 0, 1, 1, 1], [0], [0]>} : vector<2x8x16xbf16>, vector<2x8x16xbf16>, vector<2x8x8xf32> -> vector<2x8x8xf32>
    "tpu.trace_stop"() : () -> ()
    %cst_13 = arith.constant 2.500000e-01 : f32
    %11 = vector.broadcast %cst_13 : f32 to vector<2x8x8xf32>
    %12 = arith.mulf %10, %11 : vector<2x8x8xf32>
    %13 = arith.addf %12, %5 : vector<2x8x8xf32>
    %cst_14 = arith.constant dense<0xFF800000> : vector<2x8xf32>
    %14 = vector.multi_reduction <maximumf>, %13, %cst_14 [2] : vector<2x8x8xf32> to vector<2x8xf32>
    %15 = vector.shape_cast %14 : vector<2x8xf32> to vector<2x8x1xf32>
    %16 = vector.broadcast %15 : vector<2x8x1xf32> to vector<2x8x8xf32>
    %17 = arith.subf %13, %16 : vector<2x8x8xf32>
    %18 = math.exp %17 : vector<2x8x8xf32>
    %cst_15 = arith.constant dense<0.000000e+00> : vector<2x8xf32>
    %19 = vector.multi_reduction <add>, %18, %cst_15 [2] : vector<2x8x8xf32> to vector<2x8xf32>
    %20 = vector.shape_cast %19 : vector<2x8xf32> to vector<2x8x1xf32>
    %21 = tpu.reciprocal %20 {approx = true} : vector<2x8x1xf32> -> vector<2x8x1xf32>
    %22 = vector.broadcast %21 : vector<2x8x1xf32> to vector<2x8x8xf32>
    %23 = arith.mulf %18, %22 : vector<2x8x8xf32>
    %24 = arith.truncf %23 : vector<2x8x8xf32> to vector<2x8x8xbf16>
    "tpu.trace_start"() <{level = 10 : i32, message = "bqk,bkd->bqd"}> : () -> ()
    %cst_16 = arith.constant dense<0.000000e+00> : vector<2x8x16xf32>
    %25 = tpu.matmul %24, %9, %cst_16 {dimension_numbers = #tpu.dot_dimension_numbers<[2], [1], [1], [2], [0, 0, 0, 1, 1, 2], [0], [0]>} : vector<2x8x8xbf16>, vector<2x8x16xbf16>, vector<2x8x16xf32> -> vector<2x8x16xf32>
    "tpu.trace_stop"() : () -> ()
    %26 = arith.truncf %25 : vector<2x8x16xf32> to vector<2x8x16xbf16>
    %c0_17 = arith.constant 0 : index
    %c0_18 = arith.constant 0 : index
    %27 = vector.load %arg5[%c0_17, %c0_18] : memref<64x64xbf16, #tpu.memory_space<vmem>>, vector<16x64xbf16>
    "tpu.trace_start"() <{level = 10 : i32, message = "bqd,de->bqe"}> : () -> ()
    %cst_19 = arith.constant dense<0.000000e+00> : vector<2x8x64xf32>
    %28 = tpu.matmul %26, %27, %cst_19 {dimension_numbers = #tpu.dot_dimension_numbers<[2], [0], [0, 1], [1], [0, 0, 0, 1, 1, 1], [], []>} : vector<2x8x16xbf16>, vector<16x64xbf16>, vector<2x8x64xf32> -> vector<2x8x64xf32>
    "tpu.trace_stop"() : () -> ()
    %29 = arith.addf %6, %28 : vector<2x8x64xf32>
    %c0_20 = arith.constant 0 : index
    %c0_21 = arith.constant 0 : index
    %c16 = arith.constant 16 : index
    %30 = vector.load %arg1[%c0_20, %c0_21, %c16] : memref<2x8x64xbf16, #tpu.memory_space<vmem>>, vector<2x8x16xbf16>
    %c0_22 = arith.constant 0 : index
    %c0_23 = arith.constant 0 : index
    %c16_24 = arith.constant 16 : index
    %31 = vector.load %arg2[%c0_22, %c0_23, %c16_24] : memref<2x8x128xbf16, #tpu.memory_space<vmem>>, vector<2x8x16xbf16>
    %c0_25 = arith.constant 0 : index
    %c0_26 = arith.constant 0 : index
    %c80 = arith.constant 80 : index
    %32 = vector.load %arg2[%c0_25, %c0_26, %c80] : memref<2x8x128xbf16, #tpu.memory_space<vmem>>, vector<2x8x16xbf16>
    "tpu.trace_start"() <{level = 10 : i32, message = "bqd,bkd->bqk"}> : () -> ()
    %cst_27 = arith.constant dense<0.000000e+00> : vector<2x8x8xf32>
    %33 = tpu.matmul %30, %31, %cst_27 {dimension_numbers = #tpu.dot_dimension_numbers<[2], [2], [1], [1], [0, 0, 0, 1, 1, 1], [0], [0]>} : vector<2x8x16xbf16>, vector<2x8x16xbf16>, vector<2x8x8xf32> -> vector<2x8x8xf32>
    "tpu.trace_stop"() : () -> ()
    %cst_28 = arith.constant 2.500000e-01 : f32
    %34 = vector.broadcast %cst_28 : f32 to vector<2x8x8xf32>
    %35 = arith.mulf %33, %34 : vector<2x8x8xf32>
    %36 = arith.addf %35, %5 : vector<2x8x8xf32>
    %cst_29 = arith.constant dense<0xFF800000> : vector<2x8xf32>
    %37 = vector.multi_reduction <maximumf>, %36, %cst_29 [2] : vector<2x8x8xf32> to vector<2x8xf32>
    %38 = vector.shape_cast %37 : vector<2x8xf32> to vector<2x8x1xf32>
    %39 = vector.broadcast %38 : vector<2x8x1xf32> to vector<2x8x8xf32>
    %40 = arith.subf %36, %39 : vector<2x8x8xf32>
    %41 = math.exp %40 : vector<2x8x8xf32>
    %cst_30 = arith.constant dense<0.000000e+00> : vector<2x8xf32>
    %42 = vector.multi_reduction <add>, %41, %cst_30 [2] : vector<2x8x8xf32> to vector<2x8xf32>
    %43 = vector.shape_cast %42 : vector<2x8xf32> to vector<2x8x1xf32>
    %44 = tpu.reciprocal %43 {approx = true} : vector<2x8x1xf32> -> vector<2x8x1xf32>
    %45 = vector.broadcast %44 : vector<2x8x1xf32> to vector<2x8x8xf32>
    %46 = arith.mulf %41, %45 : vector<2x8x8xf32>
    %47 = arith.truncf %46 : vector<2x8x8xf32> to vector<2x8x8xbf16>
    "tpu.trace_start"() <{level = 10 : i32, message = "bqk,bkd->bqd"}> : () -> ()
    %cst_31 = arith.constant dense<0.000000e+00> : vector<2x8x16xf32>
    %48 = tpu.matmul %47, %32, %cst_31 {dimension_numbers = #tpu.dot_dimension_numbers<[2], [1], [1], [2], [0, 0, 0, 1, 1, 2], [0], [0]>} : vector<2x8x8xbf16>, vector<2x8x16xbf16>, vector<2x8x16xf32> -> vector<2x8x16xf32>
    "tpu.trace_stop"() : () -> ()
    %49 = arith.truncf %48 : vector<2x8x16xf32> to vector<2x8x16xbf16>
    %c16_32 = arith.constant 16 : index
    %c0_33 = arith.constant 0 : index
    %50 = vector.load %arg5[%c16_32, %c0_33] : memref<64x64xbf16, #tpu.memory_space<vmem>>, vector<16x64xbf16>
    "tpu.trace_start"() <{level = 10 : i32, message = "bqd,de->bqe"}> : () -> ()
    %cst_34 = arith.constant dense<0.000000e+00> : vector<2x8x64xf32>
    %51 = tpu.matmul %49, %50, %cst_34 {dimension_numbers = #tpu.dot_dimension_numbers<[2], [0], [0, 1], [1], [0, 0, 0, 1, 1, 1], [], []>} : vector<2x8x16xbf16>, vector<16x64xbf16>, vector<2x8x64xf32> -> vector<2x8x64xf32>
    "tpu.trace_stop"() : () -> ()
    %52 = arith.addf %29, %51 : vector<2x8x64xf32>
    %c0_35 = arith.constant 0 : index
    %c0_36 = arith.constant 0 : index
    %c32 = arith.constant 32 : index
    %53 = vector.load %arg1[%c0_35, %c0_36, %c32] : memref<2x8x64xbf16, #tpu.memory_space<vmem>>, vector<2x8x16xbf16>
    %c0_37 = arith.constant 0 : index
    %c0_38 = arith.constant 0 : index
    %c32_39 = arith.constant 32 : index
    %54 = vector.load %arg2[%c0_37, %c0_38, %c32_39] : memref<2x8x128xbf16, #tpu.memory_space<vmem>>, vector<2x8x16xbf16>
    %c0_40 = arith.constant 0 : index
    %c0_41 = arith.constant 0 : index
    %c96 = arith.constant 96 : index
    %55 = vector.load %arg2[%c0_40, %c0_41, %c96] : memref<2x8x128xbf16, #tpu.memory_space<vmem>>, vector<2x8x16xbf16>
    "tpu.trace_start"() <{level = 10 : i32, message = "bqd,bkd->bqk"}> : () -> ()
    %cst_42 = arith.constant dense<0.000000e+00> : vector<2x8x8xf32>
    %56 = tpu.matmul %53, %54, %cst_42 {dimension_numbers = #tpu.dot_dimension_numbers<[2], [2], [1], [1], [0, 0, 0, 1, 1, 1], [0], [0]>} : vector<2x8x16xbf16>, vector<2x8x16xbf16>, vector<2x8x8xf32> -> vector<2x8x8xf32>
    "tpu.trace_stop"() : () -> ()
    %cst_43 = arith.constant 2.500000e-01 : f32
    %57 = vector.broadcast %cst_43 : f32 to vector<2x8x8xf32>
    %58 = arith.mulf %56, %57 : vector<2x8x8xf32>
    %59 = arith.addf %58, %5 : vector<2x8x8xf32>
    %cst_44 = arith.constant dense<0xFF800000> : vector<2x8xf32>
    %60 = vector.multi_reduction <maximumf>, %59, %cst_44 [2] : vector<2x8x8xf32> to vector<2x8xf32>
    %61 = vector.shape_cast %60 : vector<2x8xf32> to vector<2x8x1xf32>
    %62 = vector.broadcast %61 : vector<2x8x1xf32> to vector<2x8x8xf32>
    %63 = arith.subf %59, %62 : vector<2x8x8xf32>
    %64 = math.exp %63 : vector<2x8x8xf32>
    %cst_45 = arith.constant dense<0.000000e+00> : vector<2x8xf32>
    %65 = vector.multi_reduction <add>, %64, %cst_45 [2] : vector<2x8x8xf32> to vector<2x8xf32>
    %66 = vector.shape_cast %65 : vector<2x8xf32> to vector<2x8x1xf32>
    %67 = tpu.reciprocal %66 {approx = true} : vector<2x8x1xf32> -> vector<2x8x1xf32>
    %68 = vector.broadcast %67 : vector<2x8x1xf32> to vector<2x8x8xf32>
    %69 = arith.mulf %64, %68 : vector<2x8x8xf32>
    %70 = arith.truncf %69 : vector<2x8x8xf32> to vector<2x8x8xbf16>
    "tpu.trace_start"() <{level = 10 : i32, message = "bqk,bkd->bqd"}> : () -> ()
    %cst_46 = arith.constant dense<0.000000e+00> : vector<2x8x16xf32>
    %71 = tpu.matmul %70, %55, %cst_46 {dimension_numbers = #tpu.dot_dimension_numbers<[2], [1], [1], [2], [0, 0, 0, 1, 1, 2], [0], [0]>} : vector<2x8x8xbf16>, vector<2x8x16xbf16>, vector<2x8x16xf32> -> vector<2x8x16xf32>
    "tpu.trace_stop"() : () -> ()
    %72 = arith.truncf %71 : vector<2x8x16xf32> to vector<2x8x16xbf16>
    %c32_47 = arith.constant 32 : index
    %c0_48 = arith.constant 0 : index
    %73 = vector.load %arg5[%c32_47, %c0_48] : memref<64x64xbf16, #tpu.memory_space<vmem>>, vector<16x64xbf16>
    "tpu.trace_start"() <{level = 10 : i32, message = "bqd,de->bqe"}> : () -> ()
    %cst_49 = arith.constant dense<0.000000e+00> : vector<2x8x64xf32>
    %74 = tpu.matmul %72, %73, %cst_49 {dimension_numbers = #tpu.dot_dimension_numbers<[2], [0], [0, 1], [1], [0, 0, 0, 1, 1, 1], [], []>} : vector<2x8x16xbf16>, vector<16x64xbf16>, vector<2x8x64xf32> -> vector<2x8x64xf32>
    "tpu.trace_stop"() : () -> ()
    %75 = arith.addf %52, %74 : vector<2x8x64xf32>
    %c0_50 = arith.constant 0 : index
    %c0_51 = arith.constant 0 : index
    %c48 = arith.constant 48 : index
    %76 = vector.load %arg1[%c0_50, %c0_51, %c48] : memref<2x8x64xbf16, #tpu.memory_space<vmem>>, vector<2x8x16xbf16>
    %c0_52 = arith.constant 0 : index
    %c0_53 = arith.constant 0 : index
    %c48_54 = arith.constant 48 : index
    %77 = vector.load %arg2[%c0_52, %c0_53, %c48_54] : memref<2x8x128xbf16, #tpu.memory_space<vmem>>, vector<2x8x16xbf16>
    %c0_55 = arith.constant 0 : index
    %c0_56 = arith.constant 0 : index
    %c112 = arith.constant 112 : index
    %78 = vector.load %arg2[%c0_55, %c0_56, %c112] : memref<2x8x128xbf16, #tpu.memory_space<vmem>>, vector<2x8x16xbf16>
    "tpu.trace_start"() <{level = 10 : i32, message = "bqd,bkd->bqk"}> : () -> ()
    %cst_57 = arith.constant dense<0.000000e+00> : vector<2x8x8xf32>
    %79 = tpu.matmul %76, %77, %cst_57 {dimension_numbers = #tpu.dot_dimension_numbers<[2], [2], [1], [1], [0, 0, 0, 1, 1, 1], [0], [0]>} : vector<2x8x16xbf16>, vector<2x8x16xbf16>, vector<2x8x8xf32> -> vector<2x8x8xf32>
    "tpu.trace_stop"() : () -> ()
    %cst_58 = arith.constant 2.500000e-01 : f32
    %80 = vector.broadcast %cst_58 : f32 to vector<2x8x8xf32>
    %81 = arith.mulf %79, %80 : vector<2x8x8xf32>
    %82 = arith.addf %81, %5 : vector<2x8x8xf32>
    %cst_59 = arith.constant dense<0xFF800000> : vector<2x8xf32>
    %83 = vector.multi_reduction <maximumf>, %82, %cst_59 [2] : vector<2x8x8xf32> to vector<2x8xf32>
    %84 = vector.shape_cast %83 : vector<2x8xf32> to vector<2x8x1xf32>
    %85 = vector.broadcast %84 : vector<2x8x1xf32> to vector<2x8x8xf32>
    %86 = arith.subf %82, %85 : vector<2x8x8xf32>
    %87 = math.exp %86 : vector<2x8x8xf32>
    %cst_60 = arith.constant dense<0.000000e+00> : vector<2x8xf32>
    %88 = vector.multi_reduction <add>, %87, %cst_60 [2] : vector<2x8x8xf32> to vector<2x8xf32>
    %89 = vector.shape_cast %88 : vector<2x8xf32> to vector<2x8x1xf32>
    %90 = tpu.reciprocal %89 {approx = true} : vector<2x8x1xf32> -> vector<2x8x1xf32>
    %91 = vector.broadcast %90 : vector<2x8x1xf32> to vector<2x8x8xf32>
    %92 = arith.mulf %87, %91 : vector<2x8x8xf32>
    %93 = arith.truncf %92 : vector<2x8x8xf32> to vector<2x8x8xbf16>
    "tpu.trace_start"() <{level = 10 : i32, message = "bqk,bkd->bqd"}> : () -> ()
    %cst_61 = arith.constant dense<0.000000e+00> : vector<2x8x16xf32>
    %94 = tpu.matmul %93, %78, %cst_61 {dimension_numbers = #tpu.dot_dimension_numbers<[2], [1], [1], [2], [0, 0, 0, 1, 1, 2], [0], [0]>} : vector<2x8x8xbf16>, vector<2x8x16xbf16>, vector<2x8x16xf32> -> vector<2x8x16xf32>
    "tpu.trace_stop"() : () -> ()
    %95 = arith.truncf %94 : vector<2x8x16xf32> to vector<2x8x16xbf16>
    %c48_62 = arith.constant 48 : index
    %c0_63 = arith.constant 0 : index
    %96 = vector.load %arg5[%c48_62, %c0_63] : memref<64x64xbf16, #tpu.memory_space<vmem>>, vector<16x64xbf16>
    "tpu.trace_start"() <{level = 10 : i32, message = "bqd,de->bqe"}> : () -> ()
    %cst_64 = arith.constant dense<0.000000e+00> : vector<2x8x64xf32>
    %97 = tpu.matmul %95, %96, %cst_64 {dimension_numbers = #tpu.dot_dimension_numbers<[2], [0], [0, 1], [1], [0, 0, 0, 1, 1, 1], [], []>} : vector<2x8x16xbf16>, vector<16x64xbf16>, vector<2x8x64xf32> -> vector<2x8x64xf32>
    "tpu.trace_stop"() : () -> ()
    %98 = arith.addf %75, %97 : vector<2x8x64xf32>
    %c0_65 = arith.constant 0 : index
    %c0_66 = arith.constant 0 : index
    %c0_67 = arith.constant 0 : index
    %99 = vector.load %arg7[%c0_65, %c0_66, %c0_67] : memref<2x8x64xbf16, #tpu.memory_space<vmem>>, vector<2x8x64xbf16>
    %100 = arith.extf %99 : vector<2x8x64xbf16> to vector<2x8x64xf32>
    %101 = arith.addf %100, %98 : vector<2x8x64xf32>
    %c0_68 = arith.constant 0 : index
    %c0_69 = arith.constant 0 : index
    %102 = vector.load %arg6[%c0_68, %c0_69] : memref<1x64xf32, #tpu.memory_space<vmem>>, vector<1x64xf32>
    %103 = vector.shape_cast %102 : vector<1x64xf32> to vector<1x1x64xf32>
    %104 = vector.broadcast %103 : vector<1x1x64xf32> to vector<2x8x64xf32>
    %105 = arith.addf %101, %104 : vector<2x8x64xf32>
    %cst_70 = arith.constant dense<0.000000e+00> : vector<2x8xf32>
    %106 = vector.multi_reduction <add>, %105, %cst_70 [2] : vector<2x8x64xf32> to vector<2x8xf32>
    %107 = vector.shape_cast %106 : vector<2x8xf32> to vector<2x8x1xf32>
    %cst_71 = arith.constant 6.400000e+01 : f32
    %108 = vector.broadcast %cst_71 : f32 to vector<2x8x1xf32>
    %109 = arith.divf %107, %108 : vector<2x8x1xf32>
    %110 = vector.broadcast %109 : vector<2x8x1xf32> to vector<2x8x64xf32>
    %111 = arith.subf %105, %110 : vector<2x8x64xf32>
    %112 = arith.mulf %111, %111 : vector<2x8x64xf32>
    %cst_72 = arith.constant dense<0.000000e+00> : vector<2x8xf32>
    %113 = vector.multi_reduction <add>, %112, %cst_72 [2] : vector<2x8x64xf32> to vector<2x8xf32>
    %114 = vector.shape_cast %113 : vector<2x8xf32> to vector<2x8x1xf32>
    %cst_73 = arith.constant 6.400000e+01 : f32
    %115 = vector.broadcast %cst_73 : f32 to vector<2x8x1xf32>
    %116 = arith.divf %114, %115 : vector<2x8x1xf32>
    %117 = vector.broadcast %109 : vector<2x8x1xf32> to vector<2x8x64xf32>
    %118 = arith.subf %105, %117 : vector<2x8x64xf32>
    %cst_74 = arith.constant 9.99999974E-6 : f32
    %119 = vector.broadcast %cst_74 : f32 to vector<2x8x1xf32>
    %120 = arith.addf %116, %119 : vector<2x8x1xf32>
    %121 = math.rsqrt %120 : vector<2x8x1xf32>
    %122 = vector.broadcast %121 : vector<2x8x1xf32> to vector<2x8x64xf32>
    %123 = arith.mulf %118, %122 : vector<2x8x64xf32>
    %c0_75 = arith.constant 0 : index
    %c0_76 = arith.constant 0 : index
    %124 = vector.load %arg8[%c0_75, %c0_76] : memref<1x64xf32, #tpu.memory_space<vmem>>, vector<1x64xf32>
    %125 = vector.shape_cast %124 : vector<1x64xf32> to vector<1x1x64xf32>
    %126 = vector.broadcast %125 : vector<1x1x64xf32> to vector<2x8x64xf32>
    %127 = arith.mulf %123, %126 : vector<2x8x64xf32>
    %c0_77 = arith.constant 0 : index
    %c0_78 = arith.constant 0 : index
    %128 = vector.load %arg9[%c0_77, %c0_78] : memref<1x64xf32, #tpu.memory_space<vmem>>, vector<1x64xf32>
    %129 = vector.shape_cast %128 : vector<1x64xf32> to vector<1x1x64xf32>
    %130 = vector.broadcast %129 : vector<1x1x64xf32> to vector<2x8x64xf32>
    %131 = arith.addf %127, %130 : vector<2x8x64xf32>
    %132 = arith.truncf %131 : vector<2x8x64xf32> to vector<2x8x64xbf16>
    %c0_79 = arith.constant 0 : index
    %c0_80 = arith.constant 0 : index
    %c0_81 = arith.constant 0 : index
    %133 = vector.load %arg10[%c0_79, %c0_80, %c0_81] : memref<2x8x64xbf16, #tpu.memory_space<vmem>>, vector<2x8x64xbf16>
    tpu.vector_store %arg10[%c0_79, %c0_80, %c0_81], %132 {strides = array<i32>} : memref<2x8x64xbf16, #tpu.memory_space<vmem>>, vector<2x8x64xbf16>,
    return
  }
  func.func @transform_0(%arg0: i32) -> (i32, i32, i32) {
    %c0_i32 = arith.constant 0 : i32
    %c0_i32_0 = arith.constant 0 : i32
    %c0_i32_1 = arith.constant 0 : i32
    return %arg0, %c0_i32, %c0_i32_0 : i32, i32, i32
  }
  func.func @transform_1(%arg0: i32) -> (i32, i32, i32) {
    %c0_i32 = arith.constant 0 : i32
    %c0_i32_0 = arith.constant 0 : i32
    %c0_i32_1 = arith.constant 0 : i32
    return %arg0, %c0_i32, %c0_i32_0 : i32, i32, i32
  }
  func.func @transform_2(%arg0: i32) -> (i32, i32) {
    %c0_i32 = arith.constant 0 : i32
    %c0_i32_0 = arith.constant 0 : i32
    %c0_i32_1 = arith.constant 0 : i32
    return %c0_i32, %c0_i32_0 : i32, i32
  }
  func.func @transform_3(%arg0: i32) -> (i32, i32, i32) {
    %c0_i32 = arith.constant 0 : i32
    %c0_i32_0 = arith.constant 0 : i32
    %c0_i32_1 = arith.constant 0 : i32
    return %arg0, %c0_i32, %c0_i32_0 : i32, i32, i32
  }
  func.func @transform_4(%arg0: i32) -> (i32, i32) {
    %c0_i32 = arith.constant 0 : i32
    %c0_i32_0 = arith.constant 0 : i32
    %c0_i32_1 = arith.constant 0 : i32
    return %c0_i32, %c0_i32_0 : i32, i32
  }
  func.func @transform_5(%arg0: i32) -> (i32, i32) {
    %c0_i32 = arith.constant 0 : i32
    %c0_i32_0 = arith.constant 0 : i32
    %c0_i32_1 = arith.constant 0 : i32
    return %c0_i32, %c0_i32_0 : i32, i32
  }
  func.func @transform_6(%arg0: i32) -> (i32, i32, i32) {
    %c0_i32 = arith.constant 0 : i32
    %c0_i32_0 = arith.constant 0 : i32
    %c0_i32_1 = arith.constant 0 : i32
    return %arg0, %c0_i32, %c0_i32_0 : i32, i32, i32
  }
  func.func @transform_7(%arg0: i32) -> (i32, i32) {
    %c0_i32 = arith.constant 0 : i32
    %c0_i32_0 = arith.constant 0 : i32
    %c0_i32_1 = arith.constant 0 : i32
    return %c0_i32, %c0_i32_0 : i32, i32
  }
  func.func @transform_8(%arg0: i32) -> (i32, i32) {
    %c0_i32 = arith.constant 0 : i32
    %c0_i32_0 = arith.constant 0 : i32
    %c0_i32_1 = arith.constant 0 : i32
    return %c0_i32, %c0_i32_0 : i32, i32
  }
  func.func @transform_9(%arg0: i32) -> (i32, i32, i32) {
    %c0_i32 = arith.constant 0 : i32
    %c0_i32_0 = arith.constant 0 : i32
    %c0_i32_1 = arith.constant 0 : i32
    return %arg0, %c0_i32, %c0_i32_0 : i32, i32, i32
  }
}

module attributes {stable_mosaic.version = 11 : i64} {
  func.func @_linear_kernel(%arg0: i32, %arg1: i32, %arg2: memref<16x64xbf16, #tpu.memory_space<vmem>>, %arg3: memref<64x100xbf16, #tpu.memory_space<vmem>>, %arg4: memref<1x100xf32, #tpu.memory_space<vmem>>, %arg5: memref<16x100xf32, #tpu.memory_space<vmem>>) attributes {dimension_semantics = [#tpu.dimension_semantics<parallel>, #tpu.dimension_semantics<parallel>], iteration_bounds = array<i64: 1, 1>, scalar_prefetch = 0 : i64, scratch_operands = 0 : i64, tpu.core_type = #tpu.core_type<tc>, window_params = [{transform_indices = @transform_0, window_bounds = array<i64: 16, 64>}, {transform_indices = @transform_1, window_bounds = array<i64: 64, 100>}, {transform_indices = @transform_2, window_bounds = array<i64: 1, 100>}, {transform_indices = @transform_3, window_bounds = array<i64: 16, 100>}]} {
    %c0 = arith.constant 0 : index
    %c0_0 = arith.constant 0 : index
    %0 = vector.load %arg2[%c0, %c0_0] : memref<16x64xbf16, #tpu.memory_space<vmem>>, vector<16x64xbf16>
    %c0_1 = arith.constant 0 : index
    %c0_2 = arith.constant 0 : index
    %1 = vector.load %arg3[%c0_1, %c0_2] : memref<64x100xbf16, #tpu.memory_space<vmem>>, vector<64x100xbf16>
    %cst = arith.constant dense<0.000000e+00> : vector<16x100xf32>
    %2 = tpu.matmul %0, %1, %cst {dimension_numbers = #tpu.dot_dimension_numbers<[1], [0], [0], [1], [0, 0, 1, 1], [], []>} : vector<16x64xbf16>, vector<64x100xbf16>, vector<16x100xf32> -> vector<16x100xf32>
    %c0_3 = arith.constant 0 : index
    %c0_4 = arith.constant 0 : index
    %3 = vector.load %arg4[%c0_3, %c0_4] : memref<1x100xf32, #tpu.memory_space<vmem>>, vector<1x100xf32>
    %4 = vector.broadcast %3 : vector<1x100xf32> to vector<16x100xf32>
    %5 = arith.addf %2, %4 : vector<16x100xf32>
    %c0_5 = arith.constant 0 : index
    %c0_6 = arith.constant 0 : index
    %6 = vector.load %arg5[%c0_5, %c0_6] : memref<16x100xf32, #tpu.memory_space<vmem>>, vector<16x100xf32>
    tpu.vector_store %arg5[%c0_5, %c0_6], %5 {strides = array<i32>} : memref<16x100xf32, #tpu.memory_space<vmem>>, vector<16x100xf32>,
    return
  }
  func.func @transform_0(%arg0: i32, %arg1: i32) -> (i32, i32) {
    %c0_i32 = arith.constant 0 : i32
    %c0_i32_0 = arith.constant 0 : i32
    return %arg0, %c0_i32 : i32, i32
  }
  func.func @transform_1(%arg0: i32, %arg1: i32) -> (i32, i32) {
    %c0_i32 = arith.constant 0 : i32
    %c0_i32_0 = arith.constant 0 : i32
    return %c0_i32, %arg1 : i32, i32
  }
  func.func @transform_2(%arg0: i32, %arg1: i32) -> (i32, i32) {
    %c0_i32 = arith.constant 0 : i32
    %c0_i32_0 = arith.constant 0 : i32
    return %c0_i32, %arg1 : i32, i32
  }
  func.func @transform_3(%arg0: i32, %arg1: i32) -> (i32, i32) {
    %c0_i32 = arith.constant 0 : i32
    return %arg0, %arg1 : i32, i32
  }
}

</mosaic_0001>

<bundles_post_ra>
// kernel: transformer_forward.19
= control target key start
LH: loop header
LB: loop body
LE: loop exit
PB: predicated region body
PF: predicated region fallthrough
CT: control target
= control target key end

     0   :  { %v178_v1 = vmov 0   ;;  %vm82_vm0 = vcmask 523264   ;;  %v27_v10 = vlaneseq  ;;  %vm141_vm1 = vcmask 1043456   ;;  %s235_s1 = inlined_call_operand.vmem [shape: bf16[64,192], index: 1, kind: input, shape index: {}]   ;;  %s236_s0 = inlined_call_operand.vmem [shape: bf16[16,64], index: 0, kind: input, shape index: {}]   ;;  %s237_s2 = inlined_call_operand.vmem [shape: f32[1,192], index: 2, kind: input, shape index: {}]   ;;  %s238_s3 = inlined_call_operand.vmem [shape: bf16[16,192], index: 3, kind: output, shape index: {}]  }
   0x1   :  { %v165_v0 = vld [vmem:[%s235_s1 + $0x4] ss:$8 sps:$4 sm:$0xff]   ;;  %118 = vmatprep.mubr.bf16.mxu0 %v178_v1  ;;  %v167_v2 = vld [vmem:[%s235_s1] ss:$8 sps:$4 sm:$0xff]   ;;  %v168_v3 = vld [vmem:[%s235_s1 + $0x14] ss:$8 sps:$4 sm:$0xff]  }
   0x2   :  { %86 = vmatprep.subr.bf16.mxu0 %v165_v0  ;;  %v170_v4 = vld [vmem:[%s235_s1 + $0x10] ss:$8 sps:$4 sm:$0xff]   ;;  %v171_v5 = vld [vmem:[%s235_s1 + $0x24] ss:$8 sps:$4 sm:$0xff]   ;;  %v173_v6 = vld [vmem:[%s235_s1 + $0x20] ss:$8 sps:$4 sm:$0xff]  }
   0x3   :  { %87 = vmatpush1.bf16.msra.mxu0 %v167_v2  ;;  %v174_v7 = vld [vmem:[%s235_s1 + $0x34] ss:$8 sps:$4 sm:$0xff]   ;;  %v176_v8 = vld [vmem:[%s235_s1 + $0x30] ss:$8 sps:$4 sm:$0xff]   ;;  %v177_v9 = vld [vmem:[%s236_s0] sm:$0xff]   ;;  %v28_v11 = vshrl.u32 %v27_v10, 7 }
   0x4   :  { %88 = vmatprep.subr.bf16.mxu0 %v168_v3  ;;  %v25_v13 = vld [vmem:[%s237_s2] sm:$0x3]  ;;  %vm142_vm2 = vcmask 523268  }
   0x5   :  { %v29_v12 = vsub.s32 0, %v28_v11  ;;  %v33_v14 = vsub.s32 1, %v28_v11  ;;  %vm143_vm3 = vmor %vm142_vm2, %vm141_vm1 }
   0x7   :  { %89 = vmatpush1.bf16.msra.mxu0 %v170_v4  ;;  %v30_v15 = vrot.slane %v25_v13, %v29_v12  ;;  %v34_v16 = vrot.slane %v25_v13, %v33_v14 }
   0x8   :  { %90 = vmatprep.subr.bf16.mxu0 %v171_v5 }
   0xb   :  { %91 = vmatpush1.bf16.msra.mxu0 %v173_v6 }
   0xc   :  { %92 = vmatprep.subr.bf16.mxu0 %v174_v7 }
   0xf   :  { %93 = vmatpush1.bf16.msra.mxu0 %v176_v8 }
  0x12   :  { %159 = vmatmul.mubr.msk.bf16.vlgmr.msra.gmra.mrb[0].mxu0 %vm82_vm0, %v177_v9 }
  0xe5   :  { %v120_v17 = vpop.f32.mrb[0].mxu0 }
  0xe6   :  { %v121_v18 = vadd.f32 %v120_v17, %v30_v15  ;;  %v122_v19 = vpop.f32.mrb[1].mxu0 }
  0xe7   :  { %v123_v20 = vadd.f32 %v122_v19, %v34_v16  ;;  %v124_v21 = vpop.f32.mrb[2].mxu0 }
  0xe8   :  { %v125_v22 = vadd.f32 %v124_v21, %v30_v15  ;;  %v126_v23 = vpop.f32.mrb[3].mxu0 }
  0xe9   :  { %v162_v24 = vpack.c.bf16 %v123_v20, %v121_v18  ;;  %v127_v25 = vadd.f32 %v126_v23, %v34_v16 }
  0xeb   :  { %144 = vst.msk [vmem:[%s238_s3] sm:$0xff] %vm143_vm3, %v162_v24  ;;  %v163_v26 = vpack.c.bf16 %v127_v25, %v125_v22 }
  0xed   :  { %145 = vst.msk [vmem:[%s238_s3 + $0x8] sm:$0xff] %vm143_vm3, %v163_v26 }

// kernel: transformer_forward.21
= control target key start
LH: loop header
LB: loop body
LE: loop exit
PB: predicated region body
PF: predicated region fallthrough
CT: control target
= control target key end

     0   :  { %v393_v0 = vmov 0.0   ;;  %vm394_vm0 = vmmov 0   ;;  %vm79_vm1 = vcmask 523264   ;;  %vm298_vm2 = vcmask 519168   ;;  %s507_s7 = inlined_call_operand.vmem [shape: f32[1,64], index: 7, kind: input, shape index: {}, may-alias: {5,7}]   ;;  %s508_s8 = inlined_call_operand.vmem [shape: f32[1,64], index: 8, kind: input, shape index: {}, may-alias: {6,8}]   ;;  %s509_s1 = inlined_call_operand.vmem [shape: bf16[64,128], index: 1, kind: input, shape index: {}]   ;;  %s510_s3 = inlined_call_operand.vmem [shape: bf16[128,64], index: 3, kind: input, shape index: {}]   ;;  %s511_s0 = inlined_call_operand.vmem [shape: bf16[16,64], index: 0, kind: input, shape index: {}]   ;;  %s512_s2 = inlined_call_operand.vmem [shape: f32[1,128], index: 2, kind: input, shape index: {}]   ;;  %s513_s4 = inlined_call_operand.vmem [shape: f32[1,64], index: 4, kind: input, shape index: {}]   ;;  %s514_s5 = inlined_call_operand.vmem [shape: f32[1,64], index: 5, kind: input, shape index: {}, may-alias: {5,7}]   ;;  %s515_s6 = inlined_call_operand.vmem [shape: f32[1,64], index: 6, kind: input, shape index: {}, may-alias: {6,8}]   ;;  %s516_s9 = inlined_call_operand.vmem [shape: bf16[16,64], index: 9, kind: output, shape index: {}]  }
   0x1   :  { %341 = vmatprep.subr.bf16.mxu0 %v393_v0  ;;  %v375_v1 = vld [vmem:[%s509_s1] sm:$0xff]   ;;  %349 = vmatprep.mubr.msk.bf16.mxu0 %vm394_vm0, %v393_v0  ;;  %v376_v2 = vld [vmem:[%s509_s1 + $0x8] sm:$0xff]   ;;  %v377_v4 = vld [vmem:[%s509_s1 + $0x10] sm:$0xff]  }
   0x2   :  { %353 = vmatprep.subr.bf16.mxu1 %v393_v0  ;;  %369 = vmatprep.mubr.msk.bf16.mxu1 %vm394_vm0, %v393_v0  ;;  %v380_v3 = vld [vmem:[%s510_s3] sm:$0xff]   ;;  %v381_v5 = vld [vmem:[%s510_s3 + $0x8] sm:$0xff]   ;;  %v378_v6 = vld [vmem:[%s509_s1 + $0x18] sm:$0xff]  }
   0x3   :  { %342 = vmatpush3.bf16.msra.mxu0 %v375_v1  ;;  %354 = vmatpush3.bf16.msra.mxu1 %v380_v3  ;;  %v33_v7 = vld [vmem:[%s511_s0] sm:$0xff]   ;;  %v382_v8 = vld [vmem:[%s510_s3 + $0x10] sm:$0xff]   ;;  %v383_v9 = vld [vmem:[%s510_s3 + $0x18] sm:$0xff]  }
   0x4   :  { %343 = vmatprep.subr.bf16.mxu0 %v393_v0  ;;  %355 = vmatprep.subr.bf16.mxu1 %v393_v0  ;;  %v384_v10 = vld [vmem:[%s510_s3 + $0x20] sm:$0xff]   ;;  %v385_v11 = vld [vmem:[%s510_s3 + $0x28] sm:$0xff]   ;;  %v386_v12 = vld [vmem:[%s510_s3 + $0x30] sm:$0xff]   ;;  %v232_v24 = vunpack.c.l.bf16 %v33_v7  ;;  %v233_v25 = vunpack.c.h.bf16 %v33_v7 }
   0x5   :  { %v387_v13 = vld [vmem:[%s510_s3 + $0x38] sm:$0xff]   ;;  %v305_v14 = vld [vmem:[%s512_s2] ss:$0 sm:$0xff] }
   0x6   :  { %v320_v27 = vld [vmem:[%s513_s4] ss:$0 sm:$0xff] }
   0x7   :  { %344 = vmatpush3.bf16.msra.mxu0 %v376_v2  ;;  %356 = vmatpush3.bf16.msra.mxu1 %v381_v5  ;;  %v321_v54 = vld [vmem:[%s514_s5] ss:$0 sm:$0xff] }
   0x8   :  { %345 = vmatprep.subr.bf16.mxu0 %v393_v0  ;;  %357 = vmatprep.subr.bf16.mxu1 %v393_v0  ;;  %v322_v56 = vld [vmem:[%s515_s6] ss:$0 sm:$0xff] }
   0xb   :  { %346 = vmatpush3.bf16.msra.mxu0 %v377_v4  ;;  %358 = vmatpush3.bf16.msra.mxu1 %v382_v8 }
   0xc   :  { %347 = vmatprep.subr.bf16.mxu0 %v393_v0  ;;  %359 = vmatprep.subr.bf16.mxu1 %v393_v0 }
   0xf   :  { %348 = vmatpush3.bf16.msra.mxu0 %v378_v6  ;;  %360 = vmatpush3.bf16.msra.mxu1 %v383_v9 }
  0x10   :  { %361 = vmatprep.subr.bf16.mxu1 %v393_v0 }
  0x12   :  { %350 = vmatmul.mubr.msk.bf16.vlgmr.msra.gmra.mrb[0].mxu0 %vm79_vm1, %v33_v7 }
  0x13   :  { %362 = vmatpush3.bf16.msra.mxu1 %v384_v10 }
  0x14   :  { %363 = vmatprep.subr.bf16.mxu1 %v393_v0 }
  0x17   :  { %364 = vmatpush3.bf16.msra.mxu1 %v385_v11 }
  0x18   :  { %365 = vmatprep.subr.bf16.mxu1 %v393_v0 }
  0x1b   :  { %366 = vmatpush3.bf16.msra.mxu1 %v386_v12 }
  0x1c   :  { %367 = vmatprep.subr.bf16.mxu1 %v393_v0 }
  0x1f   :  { %368 = vmatpush3.bf16.msra.mxu1 %v387_v13 }
  0xe5   :  { %v117_v15 = vpop.f32.mrb[0].mxu0 }
  0xe6   :  { %v118_v16 = vadd.f32 %v305_v14, %v117_v15  ;;  %v351_v17 = vpop.f32.mrb[1].mxu0 }
  0xe7   :  { %v120_v18 = vpop.f32.mrb[2].mxu0 }
  0xe8   :  { %v121_v19 = vadd.f32 %v305_v14, %v120_v18  ;;  %v352_v20 = vpop.f32.mrb[3].mxu0  ;;  %v124_v21 = vmax.f32 %v118_v16, 0.0 }
  0xea   :  { %v125_v22 = vmax.f32 %v121_v19, 0.0 }
  0xec   :  { %v126_v23 = vpack.c.bf16 %v125_v22, %v124_v21 }
  0xee   :  { %370 = vmatmul.mubr.bf16.vlgmr.msra.gmra.mrb[0].mxu1 %v126_v23 }
 0x1c1   :  { %v225_v26 = vpop.f32.mrb[0].mxu1 }
 0x1c2   :  { %v234_v28 = vadd.f32 %v232_v24, %v225_v26  ;;  %v371_v29 = vpop.f32.mrb[1].mxu1 }
 0x1c3   :  { %v228_v30 = vpop.f32.mrb[2].mxu1 }
 0x1c4   :  { %v235_v31 = vadd.f32 %v233_v25, %v228_v30  ;;  %v372_v32 = vpop.f32.mrb[3].mxu1  ;;  %v243_v33 = vadd.f32 %v320_v27, %v234_v28 }
 0x1c6   :  { %v245_v34 = vsel %vm79_vm1, %v243_v33, 0.0  ;;  %v244_v35 = vadd.f32 %v320_v27, %v235_v31 }
 0x1c7   :  { %246 = vadd.xlane.f32.xlu0 %v245_v34 }
 0x1c8   :  { %v248_v36 = vsel %vm79_vm1, %v244_v35, 0.0 }
 0x1cb   :  { %249 = vadd.xlane.f32.xlu0 %v248_v36 }
 0x254   :  { %v247_v37 = vpop.xlane.xlu0 %246 }
 0x255   :  { %v252_v38 = vmul.f32 0.015625, %v247_v37 }
 0x257   :  { %v254_v39 = vsub.f32 %v243_v33, %v252_v38 }
 0x258   :  { %v250_v40 = vpop.xlane.xlu0 %249 }
 0x259   :  { %v253_v41 = vmul.f32 0.015625, %v250_v40  ;;  %v256_v42 = vmul.f32 %v254_v39, %v254_v39 }
 0x25b   :  { %v255_v43 = vsub.f32 %v244_v35, %v253_v41  ;;  %v258_v44 = vsel %vm79_vm1, %v256_v42, 0.0 }
 0x25c   :  { %259 = vadd.xlane.f32.xlu1 %v258_v44 }
 0x25d   :  { %v257_v45 = vmul.f32 %v255_v43, %v255_v43 }
 0x25f   :  { %v261_v46 = vsel %vm79_vm1, %v257_v45, 0.0 }
 0x260   :  { %262 = vadd.xlane.f32.xlu1 %v261_v46 }
 0x2e9   :  { %v260_v47 = vpop.xlane.xlu1 %259 }
 0x2ea   :  { %v264_v48 = vmul.f32 0.015625, %v260_v47 }
 0x2ec   :  { %v266_v49 = vadd.f32 1e-05, %v264_v48 }
 0x2ed   :  { %v263_v50 = vpop.xlane.xlu1 %262 }
 0x2ee   :  { %389 = vrsqrt.f32 %v266_v49  ;;  %v265_v51 = vmul.f32 0.015625, %v263_v50 }
 0x2f0   :  { %v267_v52 = vadd.f32 1e-05, %v265_v51 }
 0x2f2   :  { %391 = vrsqrt.f32 %v267_v52 }
 0x2f8   :  { %v390_v53 = vpop.eup %389 }
 0x2f9   :  { %v270_v55 = vmul.f32 %v390_v53, %v254_v39 }
 0x2fb   :  { %v279_v57 = vmul.f32 %v321_v54, %v270_v55 }
 0x2fc   :  { %v392_v58 = vpop.eup %391 }
 0x2fd   :  { %v288_v59 = vadd.f32 %v322_v56, %v279_v57  ;;  %v271_v60 = vmul.f32 %v392_v58, %v255_v43 }
 0x2ff   :  { %v325_v61 = vpack.c.bf16 %v288_v59, %v288_v59  ;;  %v280_v62 = vmul.f32 %v321_v54, %v271_v60 }
 0x301   :  { %299 = vst.msk [vmem:[%s516_s9] sm:$0xf] %vm298_vm2, %v325_v61  ;;  %v289_v63 = vadd.f32 %v322_v56, %v280_v62 }
 0x303   :  { %v326_v0 = vpack.c.bf16 %v289_v63, %v289_v63 }
 0x305   :  { %300 = vst.msk [vmem:[%s516_s9 + $0x4] sm:$0xf] %vm298_vm2, %v326_v0 }

// kernel: transformer_forward.24
= control target key start
LH: loop header
LB: loop body
LE: loop exit
PB: predicated region body
PF: predicated region fallthrough
CT: control target
= control target key end

     0   :  { %v443_v0 = vmov 0.0   ;;  %vm444_vm0 = vmmov 0   ;;  %vm79_vm1 = vcmask 523264   ;;  %vm342_vm2 = vcmask 519168   ;;  %s567_s1 = inlined_call_operand.vmem [shape: bf16[64,128], index: 1, kind: input, shape index: {}]   ;;  %s568_s3 = inlined_call_operand.vmem [shape: bf16[128,64], index: 3, kind: input, shape index: {}]   ;;  %s569_s0 = inlined_call_operand.vmem [shape: bf16[16,64], index: 0, kind: input, shape index: {}]   ;;  %s570_s2 = inlined_call_operand.vmem [shape: f32[1,128], index: 2, kind: input, shape index: {}]   ;;  %s571_s4 = inlined_call_operand.vmem [shape: f32[1,64], index: 4, kind: input, shape index: {}]   ;;  %s572_s5 = inlined_call_operand.vmem [shape: f32[1,64], index: 5, kind: input, shape index: {}]   ;;  %s573_s6 = inlined_call_operand.vmem [shape: f32[1,64], index: 6, kind: input, shape index: {}]   ;;  %s574_s7 = inlined_call_operand.vmem [shape: f32[1,64], index: 7, kind: input, shape index: {}]   ;;  %s575_s8 = inlined_call_operand.vmem [shape: f32[1,64], index: 8, kind: input, shape index: {}]   ;;  %s576_s9 = inlined_call_operand.vmem [shape: bf16[16,64], index: 9, kind: output, shape index: {}]  }
   0x1   :  { %387 = vmatprep.subr.bf16.mxu0 %v443_v0  ;;  %v421_v1 = vld [vmem:[%s567_s1] sm:$0xff]   ;;  %395 = vmatprep.mubr.msk.bf16.mxu0 %vm444_vm0, %v443_v0  ;;  %v422_v2 = vld [vmem:[%s567_s1 + $0x8] sm:$0xff]   ;;  %v423_v4 = vld [vmem:[%s567_s1 + $0x10] sm:$0xff]  }
   0x2   :  { %399 = vmatprep.subr.bf16.mxu1 %v443_v0  ;;  %415 = vmatprep.mubr.msk.bf16.mxu1 %vm444_vm0, %v443_v0  ;;  %v426_v3 = vld [vmem:[%s568_s3] sm:$0xff]   ;;  %v427_v5 = vld [vmem:[%s568_s3 + $0x8] sm:$0xff]   ;;  %v424_v6 = vld [vmem:[%s567_s1 + $0x18] sm:$0xff]  }
   0x3   :  { %388 = vmatpush3.bf16.msra.mxu0 %v421_v1  ;;  %400 = vmatpush3.bf16.msra.mxu1 %v426_v3  ;;  %v33_v7 = vld [vmem:[%s569_s0] sm:$0xff]   ;;  %v428_v8 = vld [vmem:[%s568_s3 + $0x10] sm:$0xff]   ;;  %v429_v9 = vld [vmem:[%s568_s3 + $0x18] sm:$0xff]  }
   0x4   :  { %389 = vmatprep.subr.bf16.mxu0 %v443_v0  ;;  %401 = vmatprep.subr.bf16.mxu1 %v443_v0  ;;  %v430_v10 = vld [vmem:[%s568_s3 + $0x20] sm:$0xff]   ;;  %v431_v11 = vld [vmem:[%s568_s3 + $0x28] sm:$0xff]   ;;  %v432_v12 = vld [vmem:[%s568_s3 + $0x30] sm:$0xff]   ;;  %v232_v24 = vunpack.c.l.bf16 %v33_v7  ;;  %v233_v25 = vunpack.c.h.bf16 %v33_v7 }
   0x5   :  { %v433_v13 = vld [vmem:[%s568_s3 + $0x38] sm:$0xff]   ;;  %v349_v14 = vld [vmem:[%s570_s2] ss:$0 sm:$0xff] }
   0x6   :  { %v364_v27 = vld [vmem:[%s571_s4] ss:$0 sm:$0xff] }
   0x7   :  { %390 = vmatpush3.bf16.msra.mxu0 %v422_v2  ;;  %402 = vmatpush3.bf16.msra.mxu1 %v427_v5  ;;  %v365_v54 = vld [vmem:[%s572_s5] ss:$0 sm:$0xff] }
   0x8   :  { %391 = vmatprep.subr.bf16.mxu0 %v443_v0  ;;  %403 = vmatprep.subr.bf16.mxu1 %v443_v0  ;;  %v366_v56 = vld [vmem:[%s573_s6] ss:$0 sm:$0xff] }
   0xb   :  { %392 = vmatpush3.bf16.msra.mxu0 %v423_v4  ;;  %404 = vmatpush3.bf16.msra.mxu1 %v428_v8 }
   0xc   :  { %393 = vmatprep.subr.bf16.mxu0 %v443_v0  ;;  %405 = vmatprep.subr.bf16.mxu1 %v443_v0 }
   0xf   :  { %394 = vmatpush3.bf16.msra.mxu0 %v424_v6  ;;  %406 = vmatpush3.bf16.msra.mxu1 %v429_v9 }
  0x10   :  { %407 = vmatprep.subr.bf16.mxu1 %v443_v0 }
  0x12   :  { %396 = vmatmul.mubr.msk.bf16.vlgmr.msra.gmra.mrb[0].mxu0 %vm79_vm1, %v33_v7 }
  0x13   :  { %408 = vmatpush3.bf16.msra.mxu1 %v430_v10 }
  0x14   :  { %409 = vmatprep.subr.bf16.mxu1 %v443_v0 }
  0x17   :  { %410 = vmatpush3.bf16.msra.mxu1 %v431_v11 }
  0x18   :  { %411 = vmatprep.subr.bf16.mxu1 %v443_v0 }
  0x1b   :  { %412 = vmatpush3.bf16.msra.mxu1 %v432_v12 }
  0x1c   :  { %413 = vmatprep.subr.bf16.mxu1 %v443_v0 }
  0x1f   :  { %414 = vmatpush3.bf16.msra.mxu1 %v433_v13 }
  0xe5   :  { %v117_v15 = vpop.f32.mrb[0].mxu0 }
  0xe6   :  { %v118_v16 = vadd.f32 %v349_v14, %v117_v15  ;;  %v397_v17 = vpop.f32.mrb[1].mxu0 }
  0xe7   :  { %v120_v18 = vpop.f32.mrb[2].mxu0 }
  0xe8   :  { %v121_v19 = vadd.f32 %v349_v14, %v120_v18  ;;  %v398_v20 = vpop.f32.mrb[3].mxu0  ;;  %v124_v21 = vmax.f32 %v118_v16, 0.0  ;;  %v367_v18 = vld [vmem:[%s574_s7] ss:$0 sm:$0xff] }
  0xe9   :  { %v368_v20 = vld [vmem:[%s575_s8] ss:$0 sm:$0xff] }
  0xea   :  { %v125_v22 = vmax.f32 %v121_v19, 0.0 }
  0xec   :  { %v126_v23 = vpack.c.bf16 %v125_v22, %v124_v21 }
  0xee   :  { %416 = vmatmul.mubr.bf16.vlgmr.msra.gmra.mrb[0].mxu1 %v126_v23 }
 0x1c1   :  { %v225_v26 = vpop.f32.mrb[0].mxu1 }
 0x1c2   :  { %v234_v28 = vadd.f32 %v232_v24, %v225_v26  ;;  %v417_v29 = vpop.f32.mrb[1].mxu1 }
 0x1c3   :  { %v228_v30 = vpop.f32.mrb[2].mxu1 }
 0x1c4   :  { %v235_v31 = vadd.f32 %v233_v25, %v228_v30  ;;  %v418_v32 = vpop.f32.mrb[3].mxu1  ;;  %v243_v33 = vadd.f32 %v364_v27, %v234_v28 }
 0x1c6   :  { %v245_v34 = vsel %vm79_vm1, %v243_v33, 0.0  ;;  %v244_v35 = vadd.f32 %v364_v27, %v235_v31 }
 0x1c7   :  { %246 = vadd.xlane.f32.xlu0 %v245_v34 }
 0x1c8   :  { %v248_v36 = vsel %vm79_vm1, %v244_v35, 0.0 }
 0x1cb   :  { %249 = vadd.xlane.f32.xlu0 %v248_v36 }
 0x254   :  { %v247_v37 = vpop.xlane.xlu0 %246 }
 0x255   :  { %v252_v38 = vmul.f32 0.015625, %v247_v37 }
 0x257   :  { %v254_v39 = vsub.f32 %v243_v33, %v252_v38 }
 0x258   :  { %v250_v40 = vpop.xlane.xlu0 %249 }
 0x259   :  { %v253_v41 = vmul.f32 0.015625, %v250_v40  ;;  %v256_v42 = vmul.f32 %v254_v39, %v254_v39 }
 0x25b   :  { %v255_v43 = vsub.f32 %v244_v35, %v253_v41  ;;  %v258_v44 = vsel %vm79_vm1, %v256_v42, 0.0 }
 0x25c   :  { %259 = vadd.xlane.f32.xlu1 %v258_v44 }
 0x25d   :  { %v257_v45 = vmul.f32 %v255_v43, %v255_v43 }
 0x25f   :  { %v261_v46 = vsel %vm79_vm1, %v257_v45, 0.0 }
 0x260   :  { %262 = vadd.xlane.f32.xlu1 %v261_v46 }
 0x2e9   :  { %v260_v47 = vpop.xlane.xlu1 %259 }
 0x2ea   :  { %v264_v48 = vmul.f32 0.015625, %v260_v47 }
 0x2ec   :  { %v266_v49 = vadd.f32 1e-05, %v264_v48 }
 0x2ed   :  { %v263_v50 = vpop.xlane.xlu1 %262 }
 0x2ee   :  { %435 = vrsqrt.f32 %v266_v49  ;;  %v265_v51 = vmul.f32 0.015625, %v263_v50 }
 0x2f0   :  { %v267_v52 = vadd.f32 1e-05, %v265_v51 }
 0x2f2   :  { %437 = vrsqrt.f32 %v267_v52 }
 0x2f8   :  { %v436_v53 = vpop.eup %435 }
 0x2f9   :  { %v270_v55 = vmul.f32 %v436_v53, %v254_v39 }
 0x2fb   :  { %v279_v57 = vmul.f32 %v365_v54, %v270_v55 }
 0x2fc   :  { %v438_v58 = vpop.eup %437 }
 0x2fd   :  { %v288_v59 = vadd.f32 %v366_v56, %v279_v57  ;;  %v271_v60 = vmul.f32 %v438_v58, %v255_v43 }
 0x2ff   :  { %v290_v61 = vsel %vm79_vm1, %v288_v59, 0.0  ;;  %v280_v62 = vmul.f32 %v365_v54, %v271_v60 }
 0x300   :  { %291 = vadd.xlane.f32.xlu0 %v290_v61 }
 0x301   :  { %v289_v63 = vadd.f32 %v366_v56, %v280_v62 }
 0x303   :  { %v293_v0 = vsel %vm79_vm1, %v289_v63, 0.0 }
 0x304   :  { %294 = vadd.xlane.f32.xlu1 %v293_v0 }
 0x38d   :  { %v292_v1 = vpop.xlane.xlu0 %291 }
 0x38e   :  { %v296_v2 = vmul.f32 0.015625, %v292_v1 }
 0x390   :  { %v298_v3 = vsub.f32 %v288_v59, %v296_v2 }
 0x391   :  { %v295_v4 = vpop.xlane.xlu1 %294 }
 0x392   :  { %v297_v5 = vmul.f32 0.015625, %v295_v4  ;;  %v300_v6 = vmul.f32 %v298_v3, %v298_v3 }
 0x394   :  { %v299_v7 = vsub.f32 %v289_v63, %v297_v5  ;;  %v302_v8 = vsel %vm79_vm1, %v300_v6, 0.0 }
 0x395   :  { %303 = vadd.xlane.f32.xlu0 %v302_v8 }
 0x396   :  { %v301_v9 = vmul.f32 %v299_v7, %v299_v7 }
 0x398   :  { %v305_v10 = vsel %vm79_vm1, %v301_v9, 0.0 }
 0x399   :  { %306 = vadd.xlane.f32.xlu1 %v305_v10 }
 0x422   :  { %v304_v11 = vpop.xlane.xlu0 %303 }
 0x423   :  { %v308_v12 = vmul.f32 0.015625, %v304_v11 }
 0x425   :  { %v310_v13 = vadd.f32 1e-05, %v308_v12 }
 0x426   :  { %v307_v14 = vpop.xlane.xlu1 %306 }
 0x427   :  { %439 = vrsqrt.f32 %v310_v13  ;;  %v309_v15 = vmul.f32 0.015625, %v307_v14 }
 0x429   :  { %v311_v16 = vadd.f32 1e-05, %v309_v15 }
 0x42b   :  { %441 = vrsqrt.f32 %v311_v16 }
 0x431   :  { %v440_v17 = vpop.eup %439 }
 0x432   :  { %v314_v19 = vmul.f32 %v440_v17, %v298_v3 }
 0x434   :  { %v323_v21 = vmul.f32 %v367_v18, %v314_v19 }
 0x435   :  { %v442_v22 = vpop.eup %441 }
 0x436   :  { %v332_v23 = vadd.f32 %v368_v20, %v323_v21  ;;  %v315_v24 = vmul.f32 %v442_v22, %v299_v7 }
 0x438   :  { %v371_v25 = vpack.c.bf16 %v332_v23, %v332_v23  ;;  %v324_v26 = vmul.f32 %v367_v18, %v315_v24 }
 0x43a   :  { %343 = vst.msk [vmem:[%s576_s9] sm:$0xf] %vm342_vm2, %v371_v25  ;;  %v333_v27 = vadd.f32 %v368_v20, %v324_v26 }
 0x43c   :  { %v372_v28 = vpack.c.bf16 %v333_v27, %v333_v27 }
 0x43e   :  { %344 = vst.msk [vmem:[%s576_s9 + $0x4] sm:$0xf] %vm342_vm2, %v372_v28 }

// kernel: transformer_forward.28
= control target key start
LH: loop header
LB: loop body
LE: loop exit
PB: predicated region body
PF: predicated region fallthrough
CT: control target
= control target key end

     0   :  { %v160_v0 = vmov 0.0   ;;  %vm161_vm0 = vmmov 0   ;;  %vm61_vm1 = vcmask 523264   ;;  %s203_s1 = inlined_call_operand.vmem [shape: bf16[64,128], index: 1, kind: input, shape index: {}]   ;;  %s204_s0 = inlined_call_operand.vmem [shape: bf16[16,64], index: 0, kind: input, shape index: {}]   ;;  %s205_s2 = inlined_call_operand.vmem [shape: f32[1,128], index: 2, kind: input, shape index: {}]   ;;  %s206_s3 = inlined_call_operand.vmem [shape: bf16[16,128], index: 3, kind: output, shape index: {}]  }
   0x1   :  { %141 = vmatprep.subr.bf16.mxu0 %v160_v0  ;;  %v155_v1 = vld [vmem:[%s203_s1] sm:$0xff]   ;;  %149 = vmatprep.mubr.msk.bf16.mxu0 %vm161_vm0, %v160_v0  ;;  %v156_v2 = vld [vmem:[%s203_s1 + $0x8] sm:$0xff]   ;;  %v157_v3 = vld [vmem:[%s203_s1 + $0x10] sm:$0xff]  }
   0x2   :  { %142 = vmatpush3.bf16.msra.mxu0 %v155_v1  ;;  %v158_v4 = vld [vmem:[%s203_s1 + $0x18] sm:$0xff]   ;;  %v159_v5 = vld [vmem:[%s204_s0] sm:$0xff]  }
   0x3   :  { %143 = vmatprep.subr.bf16.mxu0 %v160_v0  ;;  %v120_v6 = vld [vmem:[%s205_s2] ss:$0 sm:$0xff] }
   0x6   :  { %144 = vmatpush3.bf16.msra.mxu0 %v156_v2 }
   0x7   :  { %145 = vmatprep.subr.bf16.mxu0 %v160_v0 }
   0xa   :  { %146 = vmatpush3.bf16.msra.mxu0 %v157_v3 }
   0xb   :  { %147 = vmatprep.subr.bf16.mxu0 %v160_v0 }
   0xe   :  { %148 = vmatpush3.bf16.msra.mxu0 %v158_v4 }
  0x11   :  { %150 = vmatmul.mubr.msk.bf16.vlgmr.msra.gmra.mrb[0].mxu0 %vm61_vm1, %v159_v5 }
  0xe4   :  { %v99_v7 = vpop.f32.mrb[0].mxu0 }
  0xe5   :  { %v151_v8 = vpop.f32.mrb[1].mxu0  ;;  %v100_v10 = vadd.f32 %v120_v6, %v99_v7 }
  0xe6   :  { %v102_v9 = vpop.f32.mrb[2].mxu0 }
  0xe7   :  { %v103_v11 = vadd.f32 %v120_v6, %v102_v9  ;;  %v152_v12 = vpop.f32.mrb[3].mxu0 }
  0xe9   :  { %v134_v13 = vpack.c.bf16 %v103_v11, %v100_v10 }
  0xeb   :  { %135 = vst [vmem:[%s206_s3] sm:$0xff] %v134_v13  }

// kernel: transformer_forward.27
= control target key start
LH: loop header
LB: loop body
LE: loop exit
PB: predicated region body
PF: predicated region fallthrough
CT: control target
= control target key end

     0   :  { %v156_v0 = vmov 0.0   ;;  %vm157_vm0 = vmmov 0   ;;  %vm61_vm1 = vcmask 523264   ;;  %vm114_vm2 = vcmask 519168   ;;  %s202_s1 = inlined_call_operand.vmem [shape: bf16[64,64], index: 1, kind: input, shape index: {}]   ;;  %s203_s0 = inlined_call_operand.vmem [shape: bf16[16,64], index: 0, kind: input, shape index: {}]   ;;  %s204_s2 = inlined_call_operand.vmem [shape: f32[1,64], index: 2, kind: input, shape index: {}]   ;;  %s205_s3 = inlined_call_operand.vmem [shape: bf16[16,64], index: 3, kind: output, shape index: {}]  }
   0x1   :  { %137 = vmatprep.subr.bf16.mxu0 %v156_v0  ;;  %v151_v1 = vld [vmem:[%s202_s1] sm:$0xff]   ;;  %145 = vmatprep.mubr.msk.bf16.mxu0 %vm157_vm0, %v156_v0  ;;  %v152_v2 = vld [vmem:[%s202_s1 + $0x8] sm:$0xff]   ;;  %v153_v3 = vld [vmem:[%s202_s1 + $0x10] sm:$0xff]  }
   0x2   :  { %138 = vmatpush3.bf16.msra.mxu0 %v151_v1  ;;  %v154_v4 = vld [vmem:[%s202_s1 + $0x18] sm:$0xff]   ;;  %v155_v5 = vld [vmem:[%s203_s0] sm:$0xff]  }
   0x3   :  { %139 = vmatprep.subr.bf16.mxu0 %v156_v0  ;;  %v121_v6 = vld [vmem:[%s204_s2] ss:$0 sm:$0xff] }
   0x6   :  { %140 = vmatpush3.bf16.msra.mxu0 %v152_v2 }
   0x7   :  { %141 = vmatprep.subr.bf16.mxu0 %v156_v0 }
   0xa   :  { %142 = vmatpush3.bf16.msra.mxu0 %v153_v3 }
   0xb   :  { %143 = vmatprep.subr.bf16.mxu0 %v156_v0 }
   0xe   :  { %144 = vmatpush3.bf16.msra.mxu0 %v154_v4 }
  0x11   :  { %146 = vmatmul.mubr.msk.bf16.vlgmr.msra.gmra.mrb[0].mxu0 %vm61_vm1, %v155_v5 }
  0xe4   :  { %v99_v7 = vpop.f32.mrb[0].mxu0 }
  0xe5   :  { %v100_v8 = vadd.f32 %v121_v6, %v99_v7  ;;  %v147_v9 = vpop.f32.mrb[1].mxu0 }
  0xe6   :  { %v102_v10 = vpop.f32.mrb[2].mxu0 }
  0xe7   :  { %v130_v11 = vpack.c.bf16 %v100_v8, %v100_v8  ;;  %v103_v12 = vadd.f32 %v121_v6, %v102_v10  ;;  %v148_v13 = vpop.f32.mrb[3].mxu0 }
  0xe9   :  { %115 = vst.msk [vmem:[%s205_s3] sm:$0xf] %vm114_vm2, %v130_v11  ;;  %v131_v14 = vpack.c.bf16 %v103_v12, %v103_v12 }
  0xeb   :  { %116 = vst.msk [vmem:[%s205_s3 + $0x4] sm:$0xf] %vm114_vm2, %v131_v14 }

// kernel: transformer_forward.20
= control target key start
LH: loop header
LB: loop body
LE: loop exit
PB: predicated region body
PF: predicated region fallthrough
CT: control target
= control target key end

     0   :  { %v1584_v2 = vmov 0.0   ;;  %vm1585_vm0 = vmmov 0   ;;  %s1586_s9 = smov 64   ;;  %vm56_vm1 = vcmask 130048   ;;  %vm158_vm2 = vcmask 64512   ;;  %s1587_s16 = smov 48   ;;  %s1886_s0 = inlined_call_operand.vmem [shape: bf16[2,8,192], index: 0, kind: input, shape index: {}]   ;;  %s1887_s1 = inlined_call_operand.vmem [shape: f32[8,8], index: 1, kind: input, shape index: {}]   ;;  %s1888_s2 = inlined_call_operand.vmem [shape: f32[2,1,8], index: 2, kind: input, shape index: {}]   ;;  %s1889_s3 = inlined_call_operand.vmem [shape: bf16[64,64], index: 3, kind: input, shape index: {}]   ;;  %s1890_s5 = inlined_call_operand.vmem [shape: bf16[2,8,64], index: 5, kind: input, shape index: {}]   ;;  %s1891_s4 = inlined_call_operand.vmem [shape: f32[1,64], index: 4, kind: input, shape index: {}]   ;;  %s1892_s6 = inlined_call_operand.vmem [shape: f32[1,64], index: 6, kind: input, shape index: {}]   ;;  %s1893_s7 = inlined_call_operand.vmem [shape: f32[1,64], index: 7, kind: input, shape index: {}]   ;;  %s1894_s8 = inlined_call_operand.vmem [shape: bf16[2,8,64], index: 8, kind: output, shape index: {}]  }
   0x1   :  { %v47_v0 = vld [vmem:[%s1886_s0] sm:$0xf]  ;;  %v48_v1 = vld [vmem:[%s1886_s0 + $0x8] sm:$0xf]  ;;  %1401 = vmatprep.subr.bf16.mxu0 %v1584_v2  ;;  %1407 = vmatprep.subr.bf16.mxu1 %v1584_v2  ;;  %v49_v40 = vld [vmem:[%s1886_s0 + $0x4] sm:$0xf] }
   0x2   :  { %v1308_v3 = vcombine.low %v47_v0, %v47_v0  ;;  %1403 = vmatprep.mubr.msk.bf16.mxu0 %vm1585_vm0, %v1584_v2  ;;  %1409 = vmatprep.mubr.msk.bf16.mxu1 %vm1585_vm0, %v1584_v2  ;;  %v1310_v4 = vcombine.low %v48_v1, %v48_v1  ;;  %v30_v9 = vld [vmem:[%s1887_s1] sm:$0xff]  ;;  %v1533_v29 = vld [vmem:[%s1886_s0 + $0x8] ss:$0 sps:$4 sm:$0xff]   ;;  %vm186_vm3 = vcmask 1043456   ;;  %s1588_s21 = smov 112   ;;  %s1589_s28 = smov 32  }
   0x3   :  { %v1306_v10 = vld [vmem:[%s1888_s2] ss:$0 sm:$0xff]  ;;  %v1307_v13 = vld [vmem:[%s1888_s2 + $0x1] ss:$0 sm:$0xff]  ;;  %v188_v41 = vsel %vm186_vm3, %v49_v40, 0  ;;  %s1590_s11 = smov 96  }
   0x4   :  { %54 = vrot.lane.b32.xlu0 %v1308_v3, %s1586_s9  ;;  %v1666_v11 = vadd.f32 %v1306_v10, %v30_v9  ;;  %v1672_v19 = vadd.f32 %v1307_v13, %v30_v9  ;;  %v1532_v28 = vld [vmem:[%s1886_s0] ss:$0 sps:$4 sm:$0xff]   ;;  %v50_v42 = vld [vmem:[%s1886_s0 + $0xc] sm:$0xf]  ;;  %s1591_s18 = smov 16   ;;  %s1592_s19 = smov 80  }
   0x5   :  { %v234_v43 = vsel %vm186_vm3, %v50_v42, 0  ;;  %v1539_v42 = vld [vmem:[%s1889_s3 + $0x8] sm:$0xff]   ;;  %vm1251_vm4 = vcmask 523264   ;;  %vm1299_vm5 = vcmask 519168  }
   0x8   :  { %106 = vrot.lane.b32.xlu0 %v1310_v4, %s1586_s9 }
  0x76   :  { %v55_v5 = vpop.permute.xlu0 %54 }
  0x77   :  { %v61_v6 = vsel %vm56_vm1, %v55_v5, 0 }
  0x78   :  { %1402 = vmatpush3.bf16.xpose.msra.mxu0 %v61_v6 }
  0x79   :  { %1413 = vmatprep.subr.bf16.mxu0 %v1584_v2 }
  0x7a   :  { %v107_v7 = vpop.permute.xlu0 %106 }
  0x7b   :  { %v112_v8 = vsel %vm56_vm1, %v107_v7, 0 }
  0x7c   :  { %1408 = vmatpush3.bf16.xpose.msra.mxu1 %v112_v8 }
  0x7d   :  { %1419 = vmatprep.subr.bf16.mxu1 %v1584_v2 }
  0x7f   :  { %1404 = vmatmul.mubr.msk.bf16.vlgmr.msra.gmra.mrb[0].mxu0 %vm56_vm1, %v47_v0 }
  0x80   :  { %1415 = vmatprep.mubr.msk.bf16.mxu0 %vm1585_vm0, %v1584_v2  ;;  %1414 = vmatpush3.bf16.msra.mxu0 %v188_v41 }
  0x81   :  { %1425 = vmatprep.subr.bf16.mxu0 %v1584_v2 }
  0x83   :  { %1410 = vmatmul.mubr.msk.bf16.vlgmr.msra.gmra.mrb[0].mxu1 %vm56_vm1, %v48_v1 }
  0x84   :  { %1421 = vmatprep.mubr.msk.bf16.mxu1 %vm1585_vm0, %v1584_v2  ;;  %1420 = vmatpush3.bf16.msra.mxu1 %v234_v43 }
  0x85   :  { %1431 = vmatprep.subr.bf16.mxu1 %v1584_v2 }
 0x152   :  { %v97_v12 = vpop.f32.mrb[0].mxu0 }
 0x153   :  { %v154_v14 = vmul.f32 0.25, %v97_v12  ;;  %v1405_v15 = vpop.f32.mrb[1].mxu0 }
 0x154   :  { %v100_v16 = vpop.f32.mrb[2].mxu0 }
 0x155   :  { %v1406_v17 = vpop.f32.mrb[3].mxu0  ;;  %v156_v18 = vadd.f32 %v154_v14, %v1666_v11 }
 0x156   :  { %v148_v20 = vpop.f32.mrb[0].mxu1 }
 0x157   :  { %v155_v21 = vmul.f32 0.25, %v148_v20  ;;  %v1411_v22 = vpop.f32.mrb[1].mxu1  ;;  %v159_v23 = vsel %vm158_vm2, %v156_v18, -inf  ;;  %v1534_v20 = vld [vmem:[%s1886_s0 + $0x4] ss:$0 sps:$4 sm:$0xff]  }
 0x158   :  { %160 = vmax.xlane.f32.xlu1 %v159_v23  ;;  %v151_v24 = vpop.f32.mrb[2].mxu1 }
 0x159   :  { %v1412_v25 = vpop.f32.mrb[3].mxu1  ;;  %v157_v26 = vadd.f32 %v155_v21, %v1672_v19  ;;  %v1536_v21 = vld [vmem:[%s1886_s0 + $0x8] ss:$0 sps:$4 sm:$0xff]  }
 0x15b   :  { %v162_v27 = vsel %vm158_vm2, %v157_v26, -inf }
 0x15c   :  { %163 = vmax.xlane.f32.xlu1 %v162_v27 }
 0x16d   :  { %289 = vrot.lane.b32.xlu1 %v1532_v28, %s1587_s16 }
 0x171   :  { %342 = vrot.lane.b32.xlu1 %v1533_v29, %s1587_s16 }
 0x1e5   :  { %v161_v30 = vpop.xlane.xlu1 %160 }
 0x1e6   :  { %v165_v31 = vsub.f32 %v156_v18, %v161_v30 }
 0x1e8   :  { %v167_v32 = vmul.f32 1.442695, %v165_v31 }
 0x1e9   :  { %v164_v33 = vpop.xlane.xlu1 %163 }
 0x1ea   :  { %1548 = vpow2.f32 %v167_v32  ;;  %v166_v34 = vsub.f32 %v157_v26, %v164_v33 }
 0x1ec   :  { %v169_v35 = vmul.f32 1.442695, %v166_v34  ;;  %v1535_v34 = vld [vmem:[%s1886_s0 + $0xc] ss:$0 sps:$4 sm:$0xff]  }
 0x1ed   :  { %v290_v44 = vpop.permute.xlu1 %289 }
 0x1ee   :  { %1550 = vpow2.f32 %v169_v35  ;;  %v295_v52 = vsel %vm56_vm1, %v290_v44, 0  ;;  %v1537_v35 = vld [vmem:[%s1886_s0] ss:$0 sps:$4 sm:$0xff]  }
 0x1f1   :  { %v343_v45 = vpop.permute.xlu1 %342 }
 0x1f2   :  { %v348_v56 = vsel %vm56_vm1, %v343_v45, 0 }
 0x1f4   :  { %v1549_v36 = vpop.eup %1548 }
 0x1f5   :  { %v171_v37 = vsel %vm158_vm2, %v1549_v36, 0.0 }
 0x1f6   :  { %172 = vadd.xlane.f32.xlu0 %v171_v37 }
 0x1f8   :  { %v1551_v38 = vpop.eup %1550 }
 0x1f9   :  { %v174_v39 = vsel %vm158_vm2, %v1551_v38, 0.0 }
 0x1fa   :  { %175 = vadd.xlane.f32.xlu1 %v174_v39 }
 0x20b   :  { %287 = vrot.lane.b32.xlu1 %v1532_v28, %s1588_s21 }
 0x20f   :  { %340 = vrot.lane.b32.xlu1 %v1533_v29, %s1588_s21 }
 0x283   :  { %v173_v46 = vpop.xlane.xlu0 %172 }
 0x284   :  { %1552 = vrcp.f32 %v173_v46  ;;  %v1538_v46 = vld [vmem:[%s1889_s3] sm:$0xff]  }
 0x287   :  { %v176_v47 = vpop.xlane.xlu1 %175 }
 0x288   :  { %1554 = vrcp.f32 %v176_v47 }
 0x28b   :  { %v288_v55 = vpop.permute.xlu1 %287 }
 0x28e   :  { %v1553_v48 = vpop.eup %1552 }
 0x28f   :  { %v179_v49 = vmul.f32 %v1553_v48, %v1549_v36  ;;  %v341_v57 = vpop.permute.xlu1 %340 }
 0x291   :  { %v181_v50 = vpack.c.bf16 %v179_v49, %v179_v49 }
 0x292   :  { %v1555_v51 = vpop.eup %1554 }
 0x293   :  { %v180_v53 = vmul.f32 %v1555_v51, %v1551_v38  ;;  %1416 = vmatmul.mubr.msk.bf16.vlgmr.msra.gmra.mrb[4].mxu0 %vm158_vm2, %v181_v50 }
 0x294   :  { %1426 = vmatpush3.bf16.xpose.msra.mxu0 %v295_v52  ;;  %1427 = vmatprep.mubr.msk.bf16.mxu0 %vm1585_vm0, %v1584_v2 }
 0x295   :  { %v182_v54 = vpack.c.bf16 %v180_v53, %v180_v53  ;;  %1437 = vmatprep.subr.bf16.mxu0 %v1584_v2 }
 0x297   :  { %1422 = vmatmul.mubr.msk.bf16.vlgmr.msra.gmra.mrb[4].mxu1 %vm158_vm2, %v182_v54 }
 0x298   :  { %1432 = vmatpush3.bf16.xpose.msra.mxu1 %v348_v56  ;;  %1433 = vmatprep.mubr.msk.bf16.mxu1 %vm1585_vm0, %v1584_v2 }
 0x299   :  { %1443 = vmatprep.subr.bf16.mxu1 %v1584_v2 }
 0x29b   :  { %1428 = vmatmul.mubr.msk.bf16.vlgmr.msra.gmra.mrb[8].mxu0 %vm56_vm1, %v288_v55 }
 0x29c   :  { %1439 = vmatprep.mubr.msk.bf16.mxu0 %vm1585_vm0, %v1584_v2 }
 0x29f   :  { %1434 = vmatmul.mubr.msk.bf16.vlgmr.msra.gmra.mrb[8].mxu1 %vm56_vm1, %v341_v57 }
 0x2a0   :  { %1445 = vmatprep.mubr.msk.bf16.mxu1 %vm1585_vm0, %v1584_v2 }
 0x366   :  { %v1713_v58 = vpop.f32.mrb[4].mxu0 }
 0x367   :  { %v1417_v59 = vpop.f32.mrb[5].mxu0 }
 0x368   :  { %v227_v60 = vpop.f32.mrb[6].mxu0 }
 0x369   :  { %v1418_v61 = vpop.f32.mrb[7].mxu0 }
 0x36a   :  { %v1715_v62 = vpop.f32.mrb[4].mxu1 }
 0x36b   :  { %v1354_v63 = vpack.c.bf16 %v1715_v62, %v1713_v58  ;;  %v1423_v0 = vpop.f32.mrb[5].mxu1 }
 0x36c   :  { %v273_v1 = vpop.f32.mrb[6].mxu1 }
 0x36d   :  { %v1424_v3 = vpop.f32.mrb[7].mxu1 }
 0x36e   :  { %v331_v4 = vpop.f32.mrb[8].mxu0 }
 0x36f   :  { %v390_v5 = vmul.f32 0.25, %v331_v4  ;;  %v1429_v6 = vpop.f32.mrb[9].mxu0 }
 0x370   :  { %v334_v7 = vpop.f32.mrb[10].mxu0 }
 0x371   :  { %v1430_v8 = vpop.f32.mrb[11].mxu0  ;;  %v392_v9 = vadd.f32 %v390_v5, %v1666_v11 }
 0x372   :  { %v384_v10 = vpop.f32.mrb[8].mxu1 }
 0x373   :  { %v391_v12 = vmul.f32 0.25, %v384_v10  ;;  %v1435_v13 = vpop.f32.mrb[9].mxu1  ;;  %v394_v14 = vsel %vm158_vm2, %v392_v9, -inf }
 0x374   :  { %v387_v15 = vpop.f32.mrb[10].mxu1  ;;  %395 = vmax.xlane.f32.xlu0 %v394_v14 }
 0x375   :  { %v1436_v16 = vpop.f32.mrb[11].mxu1  ;;  %v393_v17 = vadd.f32 %v391_v12, %v1672_v19  ;;  %v1540_v12 = vld [vmem:[%s1886_s0 + $0xc] ss:$0 sps:$4 sm:$0xff]  }
 0x377   :  { %v397_v18 = vsel %vm158_vm2, %v393_v17, -inf }
 0x378   :  { %398 = vmax.xlane.f32.xlu1 %v397_v18 }
 0x389   :  { %696 = vrot.lane.b32.xlu1 %v1536_v21, %s1589_s28 }
 0x38a   :  { %421 = vrot.lane.b32.xlu0 %v1534_v20, %s1588_s21 }
 0x401   :  { %v396_v22 = vpop.xlane.xlu0 %395 }
 0x402   :  { %v400_v23 = vsub.f32 %v392_v9, %v396_v22 }
 0x404   :  { %v402_v24 = vmul.f32 1.442695, %v400_v23 }
 0x405   :  { %v399_v25 = vpop.xlane.xlu1 %398  ;;  %v422_v26 = vpop.permute.xlu0 %421 }
 0x406   :  { %1556 = vpow2.f32 %v402_v24  ;;  %v401_v27 = vsub.f32 %v393_v17, %v399_v25  ;;  %v427_v28 = vsel %vm186_vm3, %v422_v26, 0 }
 0x407   :  { %1438 = vmatpush3.bf16.msra.mxu0 %v427_v28 }
 0x408   :  { %v404_v29 = vmul.f32 1.442695, %v401_v27  ;;  %1449 = vmatprep.subr.bf16.mxu0 %v1584_v2 }
 0x409   :  { %v697_v49 = vpop.permute.xlu1 %696 }
 0x40a   :  { %1558 = vpow2.f32 %v404_v29  ;;  %v702_v50 = vsel %vm56_vm1, %v697_v49, 0 }
 0x410   :  { %v1557_v30 = vpop.eup %1556 }
 0x411   :  { %v406_v31 = vsel %vm158_vm2, %v1557_v30, 0.0 }
 0x412   :  { %407 = vadd.xlane.f32.xlu0 %v406_v31 }
 0x414   :  { %v1559_v32 = vpop.eup %1558 }
 0x415   :  { %v409_v33 = vsel %vm158_vm2, %v1559_v32, 0.0 }
 0x416   :  { %410 = vadd.xlane.f32.xlu0 %v409_v33 }
 0x42c   :  { %472 = vrot.lane.b32.xlu0 %v1535_v34, %s1588_s21  ;;  %v1542_v34 = vld [vmem:[%s1886_s0] ss:$0 sps:$4 sm:$0xff]  }
 0x430   :  { %643 = vrot.lane.b32.xlu0 %v1537_v35, %s1589_s28 }
 0x434   :  { %641 = vrot.lane.b32.xlu0 %v1537_v35, %s1590_s11 }
 0x438   :  { %694 = vrot.lane.b32.xlu0 %v1536_v21, %s1590_s11 }
 0x49f   :  { %v408_v36 = vpop.xlane.xlu0 %407 }
 0x4a0   :  { %1560 = vrcp.f32 %v408_v36 }
 0x4a3   :  { %v411_v37 = vpop.xlane.xlu0 %410 }
 0x4a4   :  { %1562 = vrcp.f32 %v411_v37 }
 0x4a7   :  { %v473_v38 = vpop.permute.xlu0 %472 }
 0x4a8   :  { %v478_v39 = vsel %vm186_vm3, %v473_v38, 0 }
 0x4a9   :  { %1444 = vmatpush3.bf16.msra.mxu1 %v478_v39 }
 0x4aa   :  { %v1561_v40 = vpop.eup %1560  ;;  %1455 = vmatprep.subr.bf16.mxu1 %v1584_v2 }
 0x4ab   :  { %v414_v41 = vmul.f32 %v1561_v40, %v1557_v30  ;;  %v644_v48 = vpop.permute.xlu0 %643 }
 0x4ac   :  { %v649_v61 = vsel %vm56_vm1, %v644_v48, 0 }
 0x4ad   :  { %v416_v43 = vpack.c.bf16 %v414_v41, %v414_v41 }
 0x4ae   :  { %v1563_v44 = vpop.eup %1562 }
 0x4af   :  { %v415_v45 = vmul.f32 %v1563_v44, %v1559_v32  ;;  %1440 = vmatmul.mubr.msk.bf16.vlgmr.msra.gmra.mrb[12].mxu0 %vm158_vm2, %v416_v43  ;;  %v642_v51 = vpop.permute.xlu0 %641  ;;  %v1541_v44 = vld [vmem:[%s1886_s0 + $0x4] ss:$0 sps:$4 sm:$0xff]  }
 0x4b0   :  { %1450 = vmatpush3.bf16.msra.mxu0 %v1539_v42  ;;  %1451 = vmatprep.mubr.msk.bf16.mxu0 %vm1585_vm0, %v1584_v2 }
 0x4b1   :  { %v417_v47 = vpack.c.bf16 %v415_v45, %v415_v45  ;;  %1461 = vmatprep.subr.bf16.mxu0 %v1584_v2 }
 0x4b3   :  { %1446 = vmatmul.mubr.msk.bf16.vlgmr.msra.gmra.mrb[12].mxu1 %vm158_vm2, %v417_v47  ;;  %v695_v52 = vpop.permute.xlu0 %694  ;;  %v1543_v47 = vld [vmem:[%s1886_s0 + $0x8] ss:$0 sps:$4 sm:$0xff]  }
 0x4b4   :  { %1456 = vmatpush3.bf16.msra.mxu1 %v1538_v46  ;;  %1457 = vmatprep.mubr.msk.bf16.mxu1 %vm1585_vm0, %v1584_v2 }
 0x4b5   :  { %1467 = vmatprep.subr.bf16.mxu1 %v1584_v2 }
 0x4bb   :  { %1458 = vmatmul.mubr.msk.bf16.vlgmr.msra.gmra.mrb[16].mxu1 %vm56_vm1, %v1354_v63 }
 0x4bc   :  { %1469 = vmatprep.mubr.msk.bf16.mxu1 %vm1585_vm0, %v1584_v2 }
 0x4bd   :  { %1468 = vmatpush3.bf16.xpose.msra.mxu1 %v702_v50 }
 0x4be   :  { %1479 = vmatprep.subr.bf16.mxu1 %v1584_v2 }
 0x4c4   :  { %1470 = vmatmul.mubr.msk.bf16.vlgmr.msra.gmra.mrb[20].mxu1 %vm56_vm1, %v695_v52 }
 0x4c5   :  { %1481 = vmatprep.mubr.msk.bf16.mxu1 %vm1585_vm0, %v1584_v2 }
 0x582   :  { %v463_v53 = vpop.f32.mrb[12].mxu0 }
 0x583   :  { %v1441_v54 = vpop.f32.mrb[13].mxu0 }
 0x584   :  { %v466_v55 = vpop.f32.mrb[14].mxu0  ;;  %v1544_v54 = vld [vmem:[%s1889_s3 + $0x10] sm:$0xff]  }
 0x585   :  { %v1442_v56 = vpop.f32.mrb[15].mxu0 }
 0x586   :  { %v514_v57 = vpop.f32.mrb[12].mxu1 }
 0x587   :  { %v1353_v58 = vpack.c.bf16 %v514_v57, %v463_v53  ;;  %v1447_v59 = vpop.f32.mrb[13].mxu1 }
 0x588   :  { %v517_v60 = vpop.f32.mrb[14].mxu1 }
 0x589   :  { %v1448_v62 = vpop.f32.mrb[15].mxu1  ;;  %1452 = vmatmul.mubr.msk.bf16.vlgmr.msra.gmra.mrb[16].mxu0 %vm56_vm1, %v1353_v58 }
 0x58a   :  { %1462 = vmatpush3.bf16.xpose.msra.mxu0 %v649_v61  ;;  %1463 = vmatprep.mubr.msk.bf16.mxu0 %vm1585_vm0, %v1584_v2 }
 0x58b   :  { %1473 = vmatprep.subr.bf16.mxu0 %v1584_v2 }
 0x58e   :  { %v627_v63 = vpop.f32.mrb[16].mxu1 }
 0x58f   :  { %v1459_v0 = vpop.f32.mrb[17].mxu1 }
 0x590   :  { %v630_v1 = vpop.f32.mrb[18].mxu1 }
 0x591   :  { %v1460_v3 = vpop.f32.mrb[19].mxu1  ;;  %1464 = vmatmul.mubr.msk.bf16.vlgmr.msra.gmra.mrb[20].mxu0 %vm56_vm1, %v642_v51 }
 0x592   :  { %1475 = vmatprep.mubr.msk.bf16.mxu0 %vm1585_vm0, %v1584_v2 }
 0x597   :  { %v738_v4 = vpop.f32.mrb[20].mxu1 }
 0x598   :  { %v745_v5 = vmul.f32 0.25, %v738_v4  ;;  %v1471_v6 = vpop.f32.mrb[21].mxu1 }
 0x599   :  { %v741_v7 = vpop.f32.mrb[22].mxu1 }
 0x59a   :  { %v747_v8 = vadd.f32 %v745_v5, %v1672_v19  ;;  %v1472_v9 = vpop.f32.mrb[23].mxu1 }
 0x59c   :  { %v751_v10 = vsel %vm158_vm2, %v747_v8, -inf }
 0x59d   :  { %752 = vmax.xlane.f32.xlu1 %v751_v10 }
 0x5ae   :  { %826 = vrot.lane.b32.xlu1 %v1540_v12, %s1590_s11 }
 0x5b2   :  { %944 = vrot.lane.b32.xlu1 %v1542_v34, %s1591_s18 }
 0x5b6   :  { %942 = vrot.lane.b32.xlu1 %v1542_v34, %s1592_s19 }
 0x62a   :  { %v753_v13 = vpop.xlane.xlu1 %752 }
 0x62b   :  { %v755_v14 = vsub.f32 %v747_v8, %v753_v13 }
 0x62d   :  { %v758_v15 = vmul.f32 1.442695, %v755_v14 }
 0x62e   :  { %v827_v32 = vpop.permute.xlu1 %826 }
 0x62f   :  { %1564 = vpow2.f32 %v758_v15  ;;  %v832_v33 = vsel %vm186_vm3, %v827_v32, 0 }
 0x630   :  { %1480 = vmatpush3.bf16.msra.mxu1 %v832_v33 }
 0x631   :  { %1491 = vmatprep.subr.bf16.mxu1 %v1584_v2 }
 0x632   :  { %v945_v45 = vpop.permute.xlu1 %944 }
 0x633   :  { %v950_v46 = vsel %vm56_vm1, %v945_v45, 0 }
 0x636   :  { %v943_v48 = vpop.permute.xlu1 %942 }
 0x639   :  { %v1565_v29 = vpop.eup %1564 }
 0x63a   :  { %v763_v31 = vsel %vm158_vm2, %v1565_v29, 0.0 }
 0x65c   :  { %v572_v16 = vpop.f32.mrb[16].mxu0 }
 0x65d   :  { %v1784_v17 = vadd.f32 %v627_v63, %v572_v16  ;;  %v1453_v18 = vpop.f32.mrb[17].mxu0 }
 0x65e   :  { %v575_v20 = vpop.f32.mrb[18].mxu0 }
 0x65f   :  { %v1786_v21 = vadd.f32 %v630_v1, %v575_v20  ;;  %v1454_v22 = vpop.f32.mrb[19].mxu0 }
 0x664   :  { %v685_v23 = vpop.f32.mrb[20].mxu0 }
 0x665   :  { %v744_v24 = vmul.f32 0.25, %v685_v23  ;;  %v1465_v25 = vpop.f32.mrb[21].mxu0 }
 0x666   :  { %v688_v26 = vpop.f32.mrb[22].mxu0 }
 0x667   :  { %v1466_v27 = vpop.f32.mrb[23].mxu0  ;;  %v746_v28 = vadd.f32 %v744_v24, %v1666_v11 }
 0x669   :  { %v748_v30 = vsel %vm158_vm2, %v746_v28, -inf }
 0x66a   :  { %749 = vmax.xlane.f32.xlu0 %v748_v30 }
 0x66e   :  { %764 = vadd.xlane.f32.xlu0 %v763_v31 }
 0x6f7   :  { %v750_v35 = vpop.xlane.xlu0 %749 }
 0x6f8   :  { %v754_v36 = vsub.f32 %v746_v28, %v750_v35 }
 0x6fa   :  { %v756_v37 = vmul.f32 1.442695, %v754_v36 }
 0x6fb   :  { %v765_v38 = vpop.xlane.xlu0 %764 }
 0x6fc   :  { %1566 = vpow2.f32 %v756_v37 }
 0x6fd   :  { %1568 = vrcp.f32 %v765_v38 }
 0x706   :  { %v1567_v39 = vpop.eup %1566 }
 0x707   :  { %v1569_v40 = vpop.eup %1568  ;;  %v760_v41 = vsel %vm158_vm2, %v1567_v39, 0.0 }
 0x708   :  { %v769_v42 = vmul.f32 %v1569_v40, %v1565_v29  ;;  %761 = vadd.xlane.f32.xlu0 %v760_v41 }
 0x70a   :  { %v771_v43 = vpack.c.bf16 %v769_v42, %v769_v42  ;;  %v1546_v42 = vld [vmem:[%s1886_s0 + $0xc] ss:$0 sps:$4 sm:$0xff]  }
 0x70c   :  { %1482 = vmatmul.mubr.msk.bf16.vlgmr.msra.gmra.mrb[24].mxu1 %vm158_vm2, %v771_v43  ;;  %v1547_v43 = vld [vmem:[%s1889_s3 + $0x18] sm:$0xff]  }
 0x70d   :  { %1493 = vmatprep.mubr.msk.bf16.mxu1 %vm1585_vm0, %v1584_v2  ;;  %1492 = vmatpush3.bf16.xpose.msra.mxu1 %v950_v46 }
 0x70e   :  { %1503 = vmatprep.subr.bf16.mxu1 %v1584_v2 }
 0x714   :  { %1494 = vmatmul.mubr.msk.bf16.vlgmr.msra.gmra.mrb[28].mxu1 %vm56_vm1, %v943_v48 }
 0x715   :  { %1505 = vmatprep.mubr.msk.bf16.mxu1 %vm1585_vm0, %v1584_v2 }
 0x71e   :  { %775 = vrot.lane.b32.xlu0 %v1541_v44, %s1590_s11 }
 0x722   :  { %997 = vrot.lane.b32.xlu0 %v1543_v47, %s1591_s18 }
 0x726   :  { %995 = vrot.lane.b32.xlu0 %v1543_v47, %s1592_s19 }
 0x795   :  { %v762_v49 = vpop.xlane.xlu0 %761 }
 0x796   :  { %1570 = vrcp.f32 %v762_v49 }
 0x799   :  { %v776_v50 = vpop.permute.xlu0 %775 }
 0x79a   :  { %v781_v51 = vsel %vm186_vm3, %v776_v50, 0 }
 0x79b   :  { %1474 = vmatpush3.bf16.msra.mxu0 %v781_v51 }
 0x79c   :  { %1485 = vmatprep.subr.bf16.mxu0 %v1584_v2 }
 0x79d   :  { %v998_v4 = vpop.permute.xlu0 %997 }
 0x79e   :  { %v1003_v7 = vsel %vm56_vm1, %v998_v4, 0 }
 0x7a0   :  { %v1571_v52 = vpop.eup %1570 }
 0x7a1   :  { %v768_v53 = vmul.f32 %v1571_v52, %v1567_v39 }
 0x7a3   :  { %v770_v55 = vpack.c.bf16 %v768_v53, %v768_v53 }
 0x7a5   :  { %1476 = vmatmul.mubr.msk.bf16.vlgmr.msra.gmra.mrb[24].mxu0 %vm158_vm2, %v770_v55 }
 0x7a6   :  { %1486 = vmatpush3.bf16.msra.mxu0 %v1544_v54  ;;  %1487 = vmatprep.mubr.msk.bf16.mxu0 %vm1585_vm0, %v1584_v2 }
 0x7a7   :  { %1497 = vmatprep.subr.bf16.mxu0 %v1584_v2 }
 0x7df   :  { %v868_v56 = vpop.f32.mrb[24].mxu1 }
 0x7e0   :  { %v1483_v57 = vpop.f32.mrb[25].mxu1 }
 0x7e1   :  { %v871_v58 = vpop.f32.mrb[26].mxu1 }
 0x7e2   :  { %v1484_v59 = vpop.f32.mrb[27].mxu1  ;;  %v1358_v58 = vld [vmem:[%s1890_s5] sm:$0xff]  }
 0x7e3   :  { %v1359_v59 = vunpack.c.l.bf16 %v1358_v58 }
 0x7e7   :  { %v986_v60 = vpop.f32.mrb[28].mxu1 }
 0x7e8   :  { %v1045_v61 = vmul.f32 0.25, %v986_v60  ;;  %v1495_v62 = vpop.f32.mrb[29].mxu1 }
 0x7e9   :  { %v989_v63 = vpop.f32.mrb[30].mxu1 }
 0x7ea   :  { %v1047_v0 = vadd.f32 %v1045_v61, %v1666_v11  ;;  %v1496_v1 = vpop.f32.mrb[31].mxu1  ;;  %v996_v11 = vpop.permute.xlu0 %995  ;;  %v1360_v63 = vunpack.c.h.bf16 %v1358_v58 }
 0x7eb   :  { %v1350_v1 = vld [vmem:[%s1891_s4] ss:$0 sm:$0xff] }
 0x7ec   :  { %v1049_v3 = vsel %vm158_vm2, %v1047_v0, -inf }
 0x7ed   :  { %1050 = vmax.xlane.f32.xlu1 %v1049_v3 }
 0x878   :  { %v817_v5 = vpop.f32.mrb[24].mxu0 }
 0x879   :  { %v1355_v6 = vpack.c.bf16 %v868_v56, %v817_v5  ;;  %v1477_v8 = vpop.f32.mrb[25].mxu0 }
 0x87a   :  { %v820_v9 = vpop.f32.mrb[26].mxu0  ;;  %v1051_v12 = vpop.xlane.xlu1 %1050 }
 0x87b   :  { %v1478_v10 = vpop.f32.mrb[27].mxu0  ;;  %1488 = vmatmul.mubr.msk.bf16.vlgmr.msra.gmra.mrb[28].mxu0 %vm56_vm1, %v1355_v6  ;;  %v1055_v13 = vsub.f32 %v1047_v0, %v1051_v12 }
 0x87c   :  { %1498 = vmatpush3.bf16.xpose.msra.mxu0 %v1003_v7  ;;  %1499 = vmatprep.mubr.msk.bf16.mxu0 %vm1585_vm0, %v1584_v2 }
 0x87d   :  { %1509 = vmatprep.subr.bf16.mxu0 %v1584_v2  ;;  %v1057_v14 = vmul.f32 1.442695, %v1055_v13 }
 0x87f   :  { %1572 = vpow2.f32 %v1057_v14 }
 0x883   :  { %1500 = vmatmul.mubr.msk.bf16.vlgmr.msra.gmra.mrb[32].mxu0 %vm56_vm1, %v996_v11 }
 0x884   :  { %1511 = vmatprep.mubr.msk.bf16.mxu0 %vm1585_vm0, %v1584_v2 }
 0x889   :  { %v1573_v30 = vpop.eup %1572 }
 0x94e   :  { %v926_v15 = vpop.f32.mrb[28].mxu0 }
 0x94f   :  { %v1834_v16 = vadd.f32 %v926_v15, %v1784_v17  ;;  %v1489_v18 = vpop.f32.mrb[29].mxu0  ;;  %v1061_v17 = vsel %vm158_vm2, %v1573_v30, 0.0 }
 0x950   :  { %v929_v20 = vpop.f32.mrb[30].mxu0 }
 0x951   :  { %v1837_v22 = vadd.f32 %v929_v20, %v1786_v21  ;;  %v1490_v23 = vpop.f32.mrb[31].mxu0  ;;  %v1545_v21 = vld [vmem:[%s1886_s0 + $0x4] ss:$0 sps:$4 sm:$0xff]  }
 0x956   :  { %v1039_v24 = vpop.f32.mrb[32].mxu0 }
 0x957   :  { %v1046_v25 = vmul.f32 0.25, %v1039_v24  ;;  %v1501_v26 = vpop.f32.mrb[33].mxu0 }
 0x958   :  { %v1042_v27 = vpop.f32.mrb[34].mxu0 }
 0x959   :  { %v1502_v28 = vpop.f32.mrb[35].mxu0  ;;  %v1048_v29 = vadd.f32 %v1046_v25, %v1672_v19 }
 0x95b   :  { %v1052_v31 = vsel %vm158_vm2, %v1048_v29, -inf }
 0x95c   :  { %1053 = vmax.xlane.f32.xlu0 %v1052_v31  ;;  %v1351_v31 = vld [vmem:[%s1892_s6] ss:$0 sm:$0xff] }
 0x960   :  { %1062 = vadd.xlane.f32.xlu0 %v1061_v17 }
 0x976   :  { %1076 = vrot.lane.b32.xlu0 %v1545_v21, %s1592_s19 }
 0x9e9   :  { %v1054_v32 = vpop.xlane.xlu0 %1053 }
 0x9ea   :  { %v1056_v33 = vsub.f32 %v1048_v29, %v1054_v32  ;;  %v1352_v32 = vld [vmem:[%s1893_s7] ss:$0 sm:$0xff] }
 0x9ec   :  { %v1059_v34 = vmul.f32 1.442695, %v1056_v33 }
 0x9ed   :  { %v1063_v35 = vpop.xlane.xlu0 %1062 }
 0x9ee   :  { %1574 = vpow2.f32 %v1059_v34 }
 0x9ef   :  { %1576 = vrcp.f32 %v1063_v35 }
 0x9f1   :  { %v1077_v19 = vpop.permute.xlu0 %1076 }
 0x9f2   :  { %v1082_v36 = vsel %vm186_vm3, %v1077_v19, 0 }
 0x9f3   :  { %1504 = vmatpush3.bf16.msra.mxu1 %v1082_v36 }
 0x9f4   :  { %1515 = vmatprep.subr.bf16.mxu1 %v1584_v2 }
 0x9f8   :  { %v1575_v37 = vpop.eup %1574 }
 0x9f9   :  { %v1577_v38 = vpop.eup %1576  ;;  %v1064_v39 = vsel %vm158_vm2, %v1575_v37, 0.0 }
 0x9fa   :  { %v1069_v40 = vmul.f32 %v1577_v38, %v1573_v30  ;;  %1065 = vadd.xlane.f32.xlu1 %v1064_v39 }
 0x9fc   :  { %v1071_v41 = vpack.c.bf16 %v1069_v40, %v1069_v40 }
 0x9fe   :  { %1506 = vmatmul.mubr.msk.bf16.vlgmr.msra.gmra.mrb[32].mxu1 %vm158_vm2, %v1071_v41 }
 0x9ff   :  { %1517 = vmatprep.mubr.msk.bf16.mxu1 %vm1585_vm0, %v1584_v2  ;;  %1516 = vmatpush3.bf16.msra.mxu1 %v1547_v43 }
 0xa0b   :  { %1127 = vrot.lane.b32.xlu1 %v1546_v42, %s1592_s19 }
 0xa87   :  { %v1066_v44 = vpop.xlane.xlu1 %1065 }
 0xa88   :  { %1578 = vrcp.f32 %v1066_v44 }
 0xa8b   :  { %v1128_v45 = vpop.permute.xlu1 %1127 }
 0xa8c   :  { %v1133_v46 = vsel %vm186_vm3, %v1128_v45, 0 }
 0xa8d   :  { %1510 = vmatpush3.bf16.msra.mxu0 %v1133_v46 }
 0xa92   :  { %v1579_v47 = vpop.eup %1578 }
 0xa93   :  { %v1070_v48 = vmul.f32 %v1579_v47, %v1575_v37 }
 0xa95   :  { %v1072_v2 = vpack.c.bf16 %v1070_v48, %v1070_v48 }
 0xa97   :  { %1512 = vmatmul.mubr.msk.bf16.vlgmr.msra.gmra.mrb[36].mxu0 %vm158_vm2, %v1072_v2 }
 0xad1   :  { %v1118_v49 = vpop.f32.mrb[32].mxu1 }
 0xad2   :  { %v1507_v50 = vpop.f32.mrb[33].mxu1 }
 0xad3   :  { %v1121_v51 = vpop.f32.mrb[34].mxu1 }
 0xad4   :  { %v1508_v52 = vpop.f32.mrb[35].mxu1 }
 0xb6a   :  { %v1169_v53 = vpop.f32.mrb[36].mxu0 }
 0xb6b   :  { %v1356_v54 = vpack.c.bf16 %v1169_v53, %v1118_v49  ;;  %v1513_v55 = vpop.f32.mrb[37].mxu0 }
 0xb6c   :  { %v1172_v56 = vpop.f32.mrb[38].mxu0 }
 0xb6d   :  { %v1514_v57 = vpop.f32.mrb[39].mxu0  ;;  %1518 = vmatmul.mubr.msk.bf16.vlgmr.msra.gmra.mrb[36].mxu1 %vm56_vm1, %v1356_v54 }
 0xc40   :  { %v1227_v60 = vpop.f32.mrb[36].mxu1 }
 0xc41   :  { %v1234_v61 = vadd.f32 %v1227_v60, %v1834_v16  ;;  %v1519_v62 = vpop.f32.mrb[37].mxu1 }
 0xc42   :  { %v1230_v0 = vpop.f32.mrb[38].mxu1 }
 0xc43   :  { %v1240_v3 = vadd.f32 %v1359_v59, %v1234_v61  ;;  %v1235_v4 = vadd.f32 %v1230_v0, %v1837_v22  ;;  %v1520_v5 = vpop.f32.mrb[39].mxu1 }
 0xc45   :  { %v1241_v6 = vadd.f32 %v1360_v63, %v1235_v4  ;;  %v1249_v7 = vadd.f32 %v1350_v1, %v1240_v3 }
 0xc47   :  { %v1252_v8 = vsel %vm1251_vm4, %v1249_v7, 0.0  ;;  %v1250_v9 = vadd.f32 %v1350_v1, %v1241_v6 }
 0xc48   :  { %1253 = vadd.xlane.f32.xlu1 %v1252_v8 }
 0xc49   :  { %v1255_v10 = vsel %vm1251_vm4, %v1250_v9, 0.0 }
 0xc4a   :  { %1256 = vadd.xlane.f32.xlu0 %v1255_v10 }
 0xcd5   :  { %v1254_v11 = vpop.xlane.xlu1 %1253 }
 0xcd6   :  { %v1259_v12 = vmul.f32 0.015625, %v1254_v11 }
 0xcd7   :  { %v1257_v13 = vpop.xlane.xlu0 %1256 }
 0xcd8   :  { %v1261_v14 = vsub.f32 %v1249_v7, %v1259_v12  ;;  %v1260_v15 = vmul.f32 0.015625, %v1257_v13 }
 0xcda   :  { %v1262_v16 = vsub.f32 %v1250_v9, %v1260_v15  ;;  %v1263_v18 = vmul.f32 %v1261_v14, %v1261_v14 }
 0xcdc   :  { %v1265_v20 = vsel %vm1251_vm4, %v1263_v18, 0.0  ;;  %v1264_v22 = vmul.f32 %v1262_v16, %v1262_v16 }
 0xcdd   :  { %1266 = vadd.xlane.f32.xlu0 %v1265_v20 }
 0xcde   :  { %v1268_v23 = vsel %vm1251_vm4, %v1264_v22, 0.0 }
 0xcdf   :  { %1269 = vadd.xlane.f32.xlu1 %v1268_v23 }
 0xd6a   :  { %v1267_v24 = vpop.xlane.xlu0 %1266 }
 0xd6b   :  { %v1271_v25 = vmul.f32 0.015625, %v1267_v24 }
 0xd6c   :  { %v1270_v26 = vpop.xlane.xlu1 %1269 }
 0xd6d   :  { %v1273_v27 = vadd.f32 1e-05, %v1271_v25  ;;  %v1272_v28 = vmul.f32 0.015625, %v1270_v26 }
 0xd6f   :  { %1580 = vrsqrt.f32 %v1273_v27  ;;  %v1274_v29 = vadd.f32 1e-05, %v1272_v28 }
 0xd71   :  { %1582 = vrsqrt.f32 %v1274_v29 }
 0xd79   :  { %v1581_v30 = vpop.eup %1580 }
 0xd7a   :  { %v1277_v17 = vmul.f32 %v1581_v30, %v1261_v14 }
 0xd7b   :  { %v1583_v21 = vpop.eup %1582 }
 0xd7c   :  { %v1286_v33 = vmul.f32 %v1351_v31, %v1277_v17  ;;  %v1278_v34 = vmul.f32 %v1583_v21, %v1262_v16 }
 0xd7e   :  { %v1295_v35 = vadd.f32 %v1352_v32, %v1286_v33  ;;  %v1287_v19 = vmul.f32 %v1351_v31, %v1278_v34 }
 0xd80   :  { %v1297_v36 = vpack.c.bf16 %v1295_v35, %v1295_v35  ;;  %v1296_v37 = vadd.f32 %v1352_v32, %v1287_v19 }
 0xd82   :  { %1300 = vst.msk [vmem:[%s1894_s8] sm:$0xf] %vm1299_vm5, %v1297_v36  ;;  %v1298_v38 = vpack.c.bf16 %v1296_v37, %v1296_v37 }
 0xd84   :  { %1301 = vst.msk [vmem:[%s1894_s8 + $0x4] sm:$0xf] %vm1299_vm5, %v1298_v38 }

// kernel: transformer_forward.37
= control target key start
LH: loop header
LB: loop body
LE: loop exit
PB: predicated region body
PF: predicated region fallthrough
CT: control target
= control target key end

     0   :  { %v144_v0 = vmov 0.0   ;;  %vm145_vm0 = vmmov 0   ;;  %vm61_vm1 = vcmask 523264   ;;  %vm106_vm2 = vcmask 818176   ;;  %s190_s1 = inlined_call_operand.vmem [shape: bf16[64,100], index: 1, kind: input, shape index: {}]   ;;  %s191_s0 = inlined_call_operand.vmem [shape: bf16[16,64], index: 0, kind: input, shape index: {}]   ;;  %s192_s2 = inlined_call_operand.vmem [shape: f32[1,100], index: 2, kind: input, shape index: {}]   ;;  %s193_s3 = inlined_call_operand.vmem [shape: f32[16,100], index: 3, kind: output, shape index: {}]  }
   0x1   :  { %125 = vmatprep.subr.bf16.mxu0 %v144_v0  ;;  %v139_v1 = vld [vmem:[%s190_s1] sm:$0xff]   ;;  %133 = vmatprep.mubr.msk.bf16.mxu0 %vm145_vm0, %v144_v0  ;;  %v140_v2 = vld [vmem:[%s190_s1 + $0x8] sm:$0xff]   ;;  %v141_v3 = vld [vmem:[%s190_s1 + $0x10] sm:$0xff]  }
   0x2   :  { %126 = vmatpush3.bf16.msra.mxu0 %v139_v1  ;;  %v142_v4 = vld [vmem:[%s190_s1 + $0x18] sm:$0xff]   ;;  %v143_v5 = vld [vmem:[%s191_s0] sm:$0xff]  }
   0x3   :  { %127 = vmatprep.subr.bf16.mxu0 %v144_v0  ;;  %v113_v6 = vld [vmem:[%s192_s2] ss:$0 sm:$0xff] }
   0x6   :  { %128 = vmatpush3.bf16.msra.mxu0 %v140_v2 }
   0x7   :  { %129 = vmatprep.subr.bf16.mxu0 %v144_v0 }
   0xa   :  { %130 = vmatpush3.bf16.msra.mxu0 %v141_v3 }
   0xb   :  { %131 = vmatprep.subr.bf16.mxu0 %v144_v0 }
   0xe   :  { %132 = vmatpush3.bf16.msra.mxu0 %v142_v4 }
  0x11   :  { %134 = vmatmul.mubr.msk.bf16.vlgmr.msra.gmra.mrb[0].mxu0 %vm61_vm1, %v143_v5 }
  0xe4   :  { %v99_v7 = vpop.f32.mrb[0].mxu0 }
  0xe5   :  { %v100_v8 = vadd.f32 %v113_v6, %v99_v7  ;;  %v135_v9 = vpop.f32.mrb[1].mxu0 }
  0xe6   :  { %v102_v10 = vpop.f32.mrb[2].mxu0 }
  0xe7   :  { %107 = vst.msk [vmem:[%s193_s3] sm:$0xff] %vm106_vm2, %v100_v8  ;;  %v103_v11 = vadd.f32 %v113_v6, %v102_v10  ;;  %v136_v12 = vpop.f32.mrb[3].mxu0 }
  0xe9   :  { %108 = vst.msk [vmem:[%s193_s3 + $0x8] sm:$0xff] %vm106_vm2, %v103_v11 }

// kernel: transformer_forward.29
= control target key start
LH: loop header
LB: loop body
LE: loop exit
PB: predicated region body
PF: predicated region fallthrough
CT: control target
= control target key end

     0   :  { %vm54_vm0 = vcmask 130048   ;;  %v1587_v0 = vmov 0.0   ;;  %vm1588_vm1 = vmmov 0   ;;  %s1589_s17 = smov 64   ;;  %s1590_s20 = smov 112   ;;  %vm151_vm2 = vcmask 64512   ;;  %s1905_s1 = inlined_call_operand.vmem [shape: bf16[2,8,128], index: 1, kind: input, shape index: {}]   ;;  %s1906_s0 = inlined_call_operand.vmem [shape: bf16[2,8,64], index: 0, kind: input, shape index: {}]   ;;  %s1907_s2 = inlined_call_operand.vmem [shape: f32[8,8], index: 2, kind: input, shape index: {}]   ;;  %s1908_s3 = inlined_call_operand.vmem [shape: f32[2,1,8], index: 3, kind: input, shape index: {}]   ;;  %s1909_s4 = inlined_call_operand.vmem [shape: bf16[64,64], index: 4, kind: input, shape index: {}]   ;;  %s1910_s6 = inlined_call_operand.vmem [shape: bf16[2,8,64], index: 6, kind: input, shape index: {}]   ;;  %s1911_s5 = inlined_call_operand.vmem [shape: f32[1,64], index: 5, kind: input, shape index: {}]   ;;  %s1912_s7 = inlined_call_operand.vmem [shape: f32[1,64], index: 7, kind: input, shape index: {}]   ;;  %s1913_s8 = inlined_call_operand.vmem [shape: f32[1,64], index: 8, kind: input, shape index: {}]   ;;  %s1914_s9 = inlined_call_operand.vmem [shape: bf16[2,8,64], index: 9, kind: output, shape index: {}]  }
   0x1   :  { %1404 = vmatprep.subr.bf16.mxu0 %v1587_v0  ;;  %v52_v1 = vld [vmem:[%s1905_s1] sm:$0xf]  ;;  %1410 = vmatprep.subr.bf16.mxu1 %v1587_v0  ;;  %v53_v2 = vld [vmem:[%s1905_s1 + $0x4] sm:$0xf]  ;;  %vm184_vm3 = vcmask 1043456   ;;  %s1591_s10 = smov 48  }
   0x2   :  { %v59_v3 = vsel %vm54_vm0, %v52_v1, 0  ;;  %v105_v4 = vsel %vm54_vm0, %v53_v2, 0  ;;  %1406 = vmatprep.mubr.msk.bf16.mxu0 %vm1588_vm1, %v1587_v0  ;;  %1412 = vmatprep.mubr.msk.bf16.mxu1 %vm1588_vm1, %v1587_v0  ;;  %v50_v5 = vld [vmem:[%s1906_s0] sm:$0xf]  ;;  %v51_v6 = vld [vmem:[%s1906_s0 + $0x4] sm:$0xf]  ;;  %v1315_v7 = vcombine.low %v53_v2, %v53_v2  ;;  %v1313_v28 = vcombine.low %v52_v1, %v52_v1 }
   0x3   :  { %1405 = vmatpush3.bf16.xpose.msra.mxu0 %v59_v3  ;;  %1411 = vmatpush3.bf16.xpose.msra.mxu1 %v105_v4  ;;  %v1677_v8 = vld [vmem:[%s1905_s1] ss:$0 sps:$4 sm:$0xff]   ;;  %v1310_v11 = vld [vmem:[%s1908_s3 + $0x1] ss:$0 sm:$0xff]  ;;  %v1536_v42 = vld [vmem:[%s1905_s1 + $0x4] ss:$0 sps:$4 sm:$0xff]  }
   0x4   :  { %1422 = vmatprep.subr.bf16.mxu1 %v1587_v0  ;;  %1416 = vmatprep.subr.bf16.mxu0 %v1587_v0  ;;  %v33_v9 = vld [vmem:[%s1907_s2] sm:$0xff]  ;;  %s1592_s13 = smov 96   ;;  %s1593_s24 = smov 32   ;;  %vm1254_vm4 = vcmask 523264   ;;  %vm1302_vm5 = vcmask 519168  }
   0x5   :  { %231 = vrot.lane.b32.xlu1 %v1315_v7, %s1589_s17  ;;  %v1309_v10 = vld [vmem:[%s1908_s3] ss:$0 sm:$0xff]  ;;  %v1692_v13 = vadd.f32 %v1310_v11, %v33_v9  ;;  %v1538_v45 = vld [vmem:[%s1906_s0 + $0x4] ss:$0 sps:$4 sm:$0xff]   ;;  %s1594_s2 = smov 80   ;;  %s1595_s11 = smov 16  }
   0x6   :  { %v1690_v12 = vadd.f32 %v1309_v10, %v33_v9  ;;  %v1537_v29 = vld [vmem:[%s1906_s0] ss:$0 sps:$4 sm:$0xff]  }
   0x9   :  { %295 = vrot.lane.b32.xlu1 %v1677_v8, %s1590_s20 }
   0xa   :  { %1407 = vmatmul.mubr.msk.bf16.vlgmr.msra.gmra.mrb[0].mxu0 %vm54_vm0, %v50_v5  ;;  %1413 = vmatmul.mubr.msk.bf16.vlgmr.msra.gmra.mrb[0].mxu1 %vm54_vm0, %v51_v6 }
   0xb   :  { %1418 = vmatprep.mubr.msk.bf16.mxu0 %vm1588_vm1, %v1587_v0  ;;  %1424 = vmatprep.mubr.msk.bf16.mxu1 %vm1588_vm1, %v1587_v0 }
  0x77   :  { %v232_v30 = vpop.permute.xlu1 %231 }
  0x78   :  { %v237_v31 = vsel %vm184_vm3, %v232_v30, 0 }
  0x79   :  { %1423 = vmatpush3.bf16.msra.mxu1 %v237_v31 }
  0x7a   :  { %1434 = vmatprep.subr.bf16.mxu1 %v1587_v0 }
  0x7b   :  { %v296_v46 = vpop.permute.xlu1 %295 }
  0x7c   :  { %v301_v54 = vsel %vm54_vm0, %v296_v46, 0 }
  0xdd   :  { %v95_v14 = vpop.f32.mrb[0].mxu0  ;;  %v141_v15 = vpop.f32.mrb[0].mxu1 }
  0xde   :  { %v147_v16 = vmul.f32 0.25, %v95_v14  ;;  %v1408_v17 = vpop.f32.mrb[1].mxu0  ;;  %v148_v18 = vmul.f32 0.25, %v141_v15  ;;  %v1414_v19 = vpop.f32.mrb[1].mxu1 }
  0xdf   :  { %v98_v20 = vpop.f32.mrb[2].mxu0  ;;  %v144_v21 = vpop.f32.mrb[2].mxu1 }
  0xe0   :  { %v1409_v22 = vpop.f32.mrb[3].mxu0  ;;  %v1415_v23 = vpop.f32.mrb[3].mxu1  ;;  %v149_v24 = vadd.f32 %v147_v16, %v1690_v12  ;;  %v150_v25 = vadd.f32 %v148_v18, %v1692_v13 }
  0xe1   :  { %v1745_v23 = vld [vmem:[%s1905_s1] ss:$0 sps:$4 sm:$0xff]  }
  0xe2   :  { %v152_v26 = vsel %vm151_vm2, %v149_v24, -inf  ;;  %v155_v27 = vsel %vm151_vm2, %v150_v25, -inf }
  0xe3   :  { %153 = vmax.xlane.f32.xlu0 %v152_v26 }
  0xe7   :  { %156 = vmax.xlane.f32.xlu0 %v155_v27 }
  0xfd   :  { %179 = vrot.lane.b32.xlu0 %v1313_v28, %s1589_s17 }
 0x101   :  { %290 = vrot.lane.b32.xlu0 %v1537_v29, %s1590_s20 }
 0x170   :  { %v154_v32 = vpop.xlane.xlu0 %153 }
 0x171   :  { %v158_v33 = vsub.f32 %v149_v24, %v154_v32  ;;  %v1751_v24 = vld [vmem:[%s1905_s1 + $0x4] ss:$0 sps:$4 sm:$0xff]  }
 0x173   :  { %v160_v34 = vmul.f32 1.442695, %v158_v33 }
 0x174   :  { %v157_v35 = vpop.xlane.xlu0 %156 }
 0x175   :  { %1551 = vpow2.f32 %v160_v34  ;;  %v159_v36 = vsub.f32 %v150_v25, %v157_v35  ;;  %v1541_v25 = vld [vmem:[%s1906_s0 + $0x4] ss:$0 sps:$4 sm:$0xff]  }
 0x177   :  { %v162_v37 = vmul.f32 1.442695, %v159_v36 }
 0x178   :  { %v180_v43 = vpop.permute.xlu0 %179 }
 0x179   :  { %1553 = vpow2.f32 %v162_v37  ;;  %v186_v44 = vsel %vm184_vm3, %v180_v43, 0 }
 0x17a   :  { %1417 = vmatpush3.bf16.msra.mxu0 %v186_v44  ;;  %v1544_v44 = vld [vmem:[%s1909_s4 + $0x8] sm:$0xff]  }
 0x17b   :  { %1428 = vmatprep.subr.bf16.mxu0 %v1587_v0 }
 0x17c   :  { %v291_v58 = vpop.permute.xlu0 %290 }
 0x17f   :  { %v1552_v38 = vpop.eup %1551 }
 0x180   :  { %v164_v39 = vsel %vm151_vm2, %v1552_v38, 0.0 }
 0x181   :  { %165 = vadd.xlane.f32.xlu1 %v164_v39 }
 0x183   :  { %v1554_v40 = vpop.eup %1553 }
 0x184   :  { %v167_v41 = vsel %vm151_vm2, %v1554_v40, 0.0 }
 0x185   :  { %168 = vadd.xlane.f32.xlu1 %v167_v41 }
 0x196   :  { %351 = vrot.lane.b32.xlu1 %v1536_v42, %s1590_s20 }
 0x19a   :  { %346 = vrot.lane.b32.xlu1 %v1538_v45, %s1590_s20 }
 0x20e   :  { %v166_v47 = vpop.xlane.xlu1 %165 }
 0x20f   :  { %1555 = vrcp.f32 %v166_v47 }
 0x212   :  { %v169_v48 = vpop.xlane.xlu1 %168 }
 0x213   :  { %1557 = vrcp.f32 %v169_v48  ;;  %v1542_v48 = vld [vmem:[%s1909_s4] sm:$0xff]  }
 0x216   :  { %v352_v53 = vpop.permute.xlu1 %351 }
 0x217   :  { %v357_v56 = vsel %vm54_vm0, %v352_v53, 0 }
 0x219   :  { %v1556_v49 = vpop.eup %1555 }
 0x21a   :  { %v172_v50 = vmul.f32 %v1556_v49, %v1552_v38  ;;  %v347_v59 = vpop.permute.xlu1 %346  ;;  %v1543_v38 = vld [vmem:[%s1906_s0] ss:$0 sps:$4 sm:$0xff]  }
 0x21c   :  { %v174_v51 = vpack.c.bf16 %v172_v50, %v172_v50 }
 0x21d   :  { %v1558_v52 = vpop.eup %1557 }
 0x21e   :  { %v173_v55 = vmul.f32 %v1558_v52, %v1554_v40  ;;  %1419 = vmatmul.mubr.msk.bf16.vlgmr.msra.gmra.mrb[4].mxu0 %vm151_vm2, %v174_v51 }
 0x21f   :  { %1429 = vmatpush3.bf16.xpose.msra.mxu0 %v301_v54  ;;  %1430 = vmatprep.mubr.msk.bf16.mxu0 %vm1588_vm1, %v1587_v0 }
 0x220   :  { %v175_v57 = vpack.c.bf16 %v173_v55, %v173_v55  ;;  %1440 = vmatprep.subr.bf16.mxu0 %v1587_v0 }
 0x222   :  { %1425 = vmatmul.mubr.msk.bf16.vlgmr.msra.gmra.mrb[4].mxu1 %vm151_vm2, %v175_v57 }
 0x223   :  { %1435 = vmatpush3.bf16.xpose.msra.mxu1 %v357_v56  ;;  %1436 = vmatprep.mubr.msk.bf16.mxu1 %vm1588_vm1, %v1587_v0 }
 0x224   :  { %1446 = vmatprep.subr.bf16.mxu1 %v1587_v0 }
 0x226   :  { %1431 = vmatmul.mubr.msk.bf16.vlgmr.msra.gmra.mrb[8].mxu0 %vm54_vm0, %v291_v58 }
 0x227   :  { %1442 = vmatprep.mubr.msk.bf16.mxu0 %vm1588_vm1, %v1587_v0 }
 0x22a   :  { %1437 = vmatmul.mubr.msk.bf16.vlgmr.msra.gmra.mrb[8].mxu1 %vm54_vm0, %v347_v59 }
 0x22b   :  { %1448 = vmatprep.mubr.msk.bf16.mxu1 %vm1588_vm1, %v1587_v0 }
 0x2f1   :  { %v1732_v60 = vpop.f32.mrb[4].mxu0 }
 0x2f2   :  { %v1420_v61 = vpop.f32.mrb[5].mxu0 }
 0x2f3   :  { %v225_v62 = vpop.f32.mrb[6].mxu0 }
 0x2f4   :  { %v1421_v63 = vpop.f32.mrb[7].mxu0 }
 0x2f5   :  { %v1734_v1 = vpop.f32.mrb[4].mxu1 }
 0x2f6   :  { %v1357_v2 = vpack.c.bf16 %v1734_v1, %v1732_v60  ;;  %v1426_v3 = vpop.f32.mrb[5].mxu1 }
 0x2f7   :  { %v276_v4 = vpop.f32.mrb[6].mxu1 }
 0x2f8   :  { %v1427_v5 = vpop.f32.mrb[7].mxu1 }
 0x2f9   :  { %v337_v6 = vpop.f32.mrb[8].mxu0 }
 0x2fa   :  { %v399_v7 = vmul.f32 0.25, %v337_v6  ;;  %v1432_v9 = vpop.f32.mrb[9].mxu0 }
 0x2fb   :  { %v340_v10 = vpop.f32.mrb[10].mxu0 }
 0x2fc   :  { %v1433_v11 = vpop.f32.mrb[11].mxu0  ;;  %v401_v14 = vadd.f32 %v399_v7, %v1690_v12 }
 0x2fd   :  { %v393_v15 = vpop.f32.mrb[8].mxu1 }
 0x2fe   :  { %v400_v16 = vmul.f32 0.25, %v393_v15  ;;  %v1438_v17 = vpop.f32.mrb[9].mxu1  ;;  %v403_v18 = vsel %vm151_vm2, %v401_v14, -inf }
 0x2ff   :  { %v396_v19 = vpop.f32.mrb[10].mxu1  ;;  %404 = vmax.xlane.f32.xlu0 %v403_v18 }
 0x300   :  { %v1439_v20 = vpop.f32.mrb[11].mxu1  ;;  %v402_v21 = vadd.f32 %v400_v16, %v1692_v13 }
 0x302   :  { %v406_v22 = vsel %vm151_vm2, %v402_v21, -inf }
 0x303   :  { %407 = vmax.xlane.f32.xlu1 %v406_v22 }
 0x314   :  { %475 = vrot.lane.b32.xlu1 %v1536_v42, %s1591_s10 }
 0x318   :  { %649 = vrot.lane.b32.xlu1 %v1745_v23, %s1592_s13 }
 0x31c   :  { %705 = vrot.lane.b32.xlu1 %v1751_v24, %s1592_s13 }
 0x320   :  { %700 = vrot.lane.b32.xlu1 %v1541_v25, %s1592_s13 }
 0x38c   :  { %v405_v26 = vpop.xlane.xlu0 %404 }
 0x38d   :  { %v409_v27 = vsub.f32 %v401_v14, %v405_v26 }
 0x38f   :  { %v411_v28 = vmul.f32 1.442695, %v409_v27 }
 0x390   :  { %v408_v29 = vpop.xlane.xlu1 %407 }
 0x391   :  { %1559 = vpow2.f32 %v411_v28  ;;  %v410_v30 = vsub.f32 %v402_v21, %v408_v29 }
 0x393   :  { %v413_v31 = vmul.f32 1.442695, %v410_v30 }
 0x394   :  { %v476_v36 = vpop.permute.xlu1 %475 }
 0x395   :  { %1561 = vpow2.f32 %v413_v31  ;;  %v481_v37 = vsel %vm184_vm3, %v476_v36, 0 }
 0x396   :  { %1447 = vmatpush3.bf16.msra.mxu1 %v481_v37  ;;  %v1816_v37 = vld [vmem:[%s1905_s1] ss:$0 sps:$4 sm:$0xff]  }
 0x397   :  { %1458 = vmatprep.subr.bf16.mxu1 %v1587_v0 }
 0x398   :  { %v650_v50 = vpop.permute.xlu1 %649 }
 0x399   :  { %v655_v62 = vsel %vm54_vm0, %v650_v50, 0  ;;  %v1548_v50 = vld [vmem:[%s1906_s0 + $0x4] ss:$0 sps:$4 sm:$0xff]  }
 0x39b   :  { %v1560_v32 = vpop.eup %1559 }
 0x39c   :  { %v415_v33 = vsel %vm151_vm2, %v1560_v32, 0.0  ;;  %v706_v51 = vpop.permute.xlu1 %705 }
 0x39d   :  { %416 = vadd.xlane.f32.xlu0 %v415_v33  ;;  %v711_v52 = vsel %vm54_vm0, %v706_v51, 0 }
 0x39f   :  { %v1562_v34 = vpop.eup %1561 }
 0x3a0   :  { %v418_v35 = vsel %vm151_vm2, %v1562_v34, 0.0  ;;  %v701_v53 = vpop.permute.xlu1 %700 }
 0x3a1   :  { %419 = vadd.xlane.f32.xlu0 %v418_v35 }
 0x3b7   :  { %427 = vrot.lane.b32.xlu0 %v1677_v8, %s1591_s10 }
 0x3bb   :  { %644 = vrot.lane.b32.xlu0 %v1543_v38, %s1592_s13 }
 0x42a   :  { %v417_v39 = vpop.xlane.xlu0 %416 }
 0x42b   :  { %1563 = vrcp.f32 %v417_v39 }
 0x42e   :  { %v420_v40 = vpop.xlane.xlu0 %419 }
 0x42f   :  { %1565 = vrcp.f32 %v420_v40 }
 0x432   :  { %v428_v41 = vpop.permute.xlu0 %427 }
 0x433   :  { %v433_v42 = vsel %vm184_vm3, %v428_v41, 0 }
 0x434   :  { %1441 = vmatpush3.bf16.msra.mxu0 %v433_v42 }
 0x435   :  { %v1564_v8 = vpop.eup %1563  ;;  %1452 = vmatprep.subr.bf16.mxu0 %v1587_v0 }
 0x436   :  { %v423_v43 = vmul.f32 %v1564_v8, %v1560_v32 }
 0x438   :  { %v425_v45 = vpack.c.bf16 %v423_v43, %v423_v43 }
 0x439   :  { %v1566_v46 = vpop.eup %1565 }
 0x43a   :  { %v424_v47 = vmul.f32 %v1566_v46, %v1562_v34  ;;  %1443 = vmatmul.mubr.msk.bf16.vlgmr.msra.gmra.mrb[12].mxu0 %vm151_vm2, %v425_v45 }
 0x43b   :  { %1453 = vmatpush3.bf16.msra.mxu0 %v1544_v44  ;;  %1454 = vmatprep.mubr.msk.bf16.mxu0 %vm1588_vm1, %v1587_v0 }
 0x43c   :  { %v426_v49 = vpack.c.bf16 %v424_v47, %v424_v47  ;;  %1464 = vmatprep.subr.bf16.mxu0 %v1587_v0 }
 0x43e   :  { %1449 = vmatmul.mubr.msk.bf16.vlgmr.msra.gmra.mrb[12].mxu1 %vm151_vm2, %v426_v49  ;;  %v1833_v49 = vld [vmem:[%s1905_s1 + $0x4] ss:$0 sps:$4 sm:$0xff]  }
 0x43f   :  { %1459 = vmatpush3.bf16.msra.mxu1 %v1542_v48  ;;  %1460 = vmatprep.mubr.msk.bf16.mxu1 %vm1588_vm1, %v1587_v0  ;;  %v1546_v48 = vld [vmem:[%s1906_s0] ss:$0 sps:$4 sm:$0xff]  }
 0x440   :  { %1470 = vmatprep.subr.bf16.mxu1 %v1587_v0 }
 0x446   :  { %1461 = vmatmul.mubr.msk.bf16.vlgmr.msra.gmra.mrb[16].mxu1 %vm54_vm0, %v1357_v2  ;;  %v645_v2 = vpop.permute.xlu0 %644 }
 0x447   :  { %1472 = vmatprep.mubr.msk.bf16.mxu1 %vm1588_vm1, %v1587_v0 }
 0x448   :  { %1471 = vmatpush3.bf16.xpose.msra.mxu1 %v711_v52 }
 0x449   :  { %1482 = vmatprep.subr.bf16.mxu1 %v1587_v0 }
 0x44f   :  { %1473 = vmatmul.mubr.msk.bf16.vlgmr.msra.gmra.mrb[20].mxu1 %vm54_vm0, %v701_v53 }
 0x450   :  { %1484 = vmatprep.mubr.msk.bf16.mxu1 %vm1588_vm1, %v1587_v0 }
 0x50d   :  { %v469_v54 = vpop.f32.mrb[12].mxu0 }
 0x50e   :  { %v1444_v55 = vpop.f32.mrb[13].mxu0 }
 0x50f   :  { %v472_v56 = vpop.f32.mrb[14].mxu0 }
 0x510   :  { %v1445_v57 = vpop.f32.mrb[15].mxu0 }
 0x511   :  { %v517_v58 = vpop.f32.mrb[12].mxu1 }
 0x512   :  { %v1356_v59 = vpack.c.bf16 %v517_v58, %v469_v54  ;;  %v1450_v60 = vpop.f32.mrb[13].mxu1 }
 0x513   :  { %v520_v61 = vpop.f32.mrb[14].mxu1 }
 0x514   :  { %v1451_v63 = vpop.f32.mrb[15].mxu1  ;;  %1455 = vmatmul.mubr.msk.bf16.vlgmr.msra.gmra.mrb[16].mxu0 %vm54_vm0, %v1356_v59  ;;  %v1549_v61 = vld [vmem:[%s1909_s4 + $0x10] sm:$0xff]  }
 0x515   :  { %1465 = vmatpush3.bf16.xpose.msra.mxu0 %v655_v62  ;;  %1466 = vmatprep.mubr.msk.bf16.mxu0 %vm1588_vm1, %v1587_v0 }
 0x516   :  { %1476 = vmatprep.subr.bf16.mxu0 %v1587_v0 }
 0x519   :  { %v630_v1 = vpop.f32.mrb[16].mxu1 }
 0x51a   :  { %v1462_v3 = vpop.f32.mrb[17].mxu1 }
 0x51b   :  { %v633_v4 = vpop.f32.mrb[18].mxu1 }
 0x51c   :  { %v1463_v5 = vpop.f32.mrb[19].mxu1  ;;  %1467 = vmatmul.mubr.msk.bf16.vlgmr.msra.gmra.mrb[20].mxu0 %vm54_vm0, %v645_v2 }
 0x51d   :  { %1478 = vmatprep.mubr.msk.bf16.mxu0 %vm1588_vm1, %v1587_v0 }
 0x522   :  { %v747_v6 = vpop.f32.mrb[20].mxu1 }
 0x523   :  { %v754_v7 = vmul.f32 0.25, %v747_v6  ;;  %v1474_v9 = vpop.f32.mrb[21].mxu1 }
 0x524   :  { %v750_v10 = vpop.f32.mrb[22].mxu1 }
 0x525   :  { %v756_v11 = vadd.f32 %v754_v7, %v1692_v13  ;;  %v1475_v14 = vpop.f32.mrb[23].mxu1 }
 0x527   :  { %v760_v15 = vsel %vm151_vm2, %v756_v11, -inf }
 0x528   :  { %761 = vmax.xlane.f32.xlu1 %v760_v15 }
 0x539   :  { %829 = vrot.lane.b32.xlu1 %v1751_v24, %s1593_s24 }
 0x53d   :  { %950 = vrot.lane.b32.xlu1 %v1816_v37, %s1594_s2 }
 0x541   :  { %1006 = vrot.lane.b32.xlu1 %v1833_v49, %s1594_s2 }
 0x545   :  { %1001 = vrot.lane.b32.xlu1 %v1548_v50, %s1594_s2  ;;  %v1550_v50 = vld [vmem:[%s1909_s4 + $0x18] sm:$0xff]  }
 0x5b5   :  { %v762_v16 = vpop.xlane.xlu1 %761 }
 0x5b6   :  { %v764_v17 = vsub.f32 %v756_v11, %v762_v16 }
 0x5b8   :  { %v767_v18 = vmul.f32 1.442695, %v764_v17 }
 0x5b9   :  { %v830_v35 = vpop.permute.xlu1 %829 }
 0x5ba   :  { %1567 = vpow2.f32 %v767_v18  ;;  %v835_v36 = vsel %vm184_vm3, %v830_v35, 0 }
 0x5bb   :  { %1483 = vmatpush3.bf16.msra.mxu1 %v835_v36 }
 0x5bc   :  { %1494 = vmatprep.subr.bf16.mxu1 %v1587_v0 }
 0x5bd   :  { %v951_v44 = vpop.permute.xlu1 %950 }
 0x5be   :  { %v956_v47 = vsel %vm54_vm0, %v951_v44, 0 }
 0x5c1   :  { %v1007_v6 = vpop.permute.xlu1 %1006 }
 0x5c2   :  { %v1012_v10 = vsel %vm54_vm0, %v1007_v6, 0 }
 0x5c4   :  { %v1568_v24 = vpop.eup %1567 }
 0x5c5   :  { %v772_v34 = vsel %vm151_vm2, %v1568_v24, 0.0 }
 0x5e7   :  { %v575_v19 = vpop.f32.mrb[16].mxu0 }
 0x5e8   :  { %v1804_v20 = vadd.f32 %v630_v1, %v575_v19  ;;  %v1456_v21 = vpop.f32.mrb[17].mxu0 }
 0x5e9   :  { %v578_v22 = vpop.f32.mrb[18].mxu0 }
 0x5ea   :  { %v1806_v25 = vadd.f32 %v633_v4, %v578_v22  ;;  %v1457_v26 = vpop.f32.mrb[19].mxu0 }
 0x5ef   :  { %v691_v27 = vpop.f32.mrb[20].mxu0 }
 0x5f0   :  { %v753_v28 = vmul.f32 0.25, %v691_v27  ;;  %v1468_v29 = vpop.f32.mrb[21].mxu0 }
 0x5f1   :  { %v694_v30 = vpop.f32.mrb[22].mxu0 }
 0x5f2   :  { %v1469_v31 = vpop.f32.mrb[23].mxu0  ;;  %v755_v32 = vadd.f32 %v753_v28, %v1690_v12 }
 0x5f4   :  { %v757_v33 = vsel %vm151_vm2, %v755_v32, -inf }
 0x5f5   :  { %758 = vmax.xlane.f32.xlu0 %v757_v33 }
 0x5f9   :  { %773 = vadd.xlane.f32.xlu0 %v772_v34 }
 0x682   :  { %v759_v38 = vpop.xlane.xlu0 %758 }
 0x683   :  { %v763_v39 = vsub.f32 %v755_v32, %v759_v38 }
 0x685   :  { %v765_v40 = vmul.f32 1.442695, %v763_v39 }
 0x686   :  { %v774_v41 = vpop.xlane.xlu0 %773 }
 0x687   :  { %1569 = vpow2.f32 %v765_v40 }
 0x688   :  { %1571 = vrcp.f32 %v774_v41 }
 0x691   :  { %v1570_v42 = vpop.eup %1569 }
 0x692   :  { %v1572_v8 = vpop.eup %1571  ;;  %v769_v43 = vsel %vm151_vm2, %v1570_v42, 0.0 }
 0x693   :  { %v778_v45 = vmul.f32 %v1572_v8, %v1568_v24  ;;  %770 = vadd.xlane.f32.xlu0 %v769_v43 }
 0x695   :  { %v780_v46 = vpack.c.bf16 %v778_v45, %v778_v45 }
 0x697   :  { %1485 = vmatmul.mubr.msk.bf16.vlgmr.msra.gmra.mrb[24].mxu1 %vm151_vm2, %v780_v46 }
 0x698   :  { %1495 = vmatpush3.bf16.xpose.msra.mxu1 %v956_v47  ;;  %1496 = vmatprep.mubr.msk.bf16.mxu1 %vm1588_vm1, %v1587_v0 }
 0x699   :  { %1506 = vmatprep.subr.bf16.mxu1 %v1587_v0 }
 0x6a9   :  { %781 = vrot.lane.b32.xlu0 %v1745_v23, %s1593_s24 }
 0x6ad   :  { %945 = vrot.lane.b32.xlu0 %v1546_v48, %s1594_s2 }
 0x720   :  { %v771_v51 = vpop.xlane.xlu0 %770 }
 0x721   :  { %1573 = vrcp.f32 %v771_v51 }
 0x724   :  { %v782_v23 = vpop.permute.xlu0 %781 }
 0x725   :  { %v787_v52 = vsel %vm184_vm3, %v782_v23, 0 }
 0x726   :  { %1477 = vmatpush3.bf16.msra.mxu0 %v787_v52 }
 0x727   :  { %1488 = vmatprep.subr.bf16.mxu0 %v1587_v0 }
 0x728   :  { %v946_v53 = vpop.permute.xlu0 %945 }
 0x729   :  { %1497 = vmatmul.mubr.msk.bf16.vlgmr.msra.gmra.mrb[28].mxu1 %vm54_vm0, %v946_v53 }
 0x72a   :  { %1508 = vmatprep.mubr.msk.bf16.mxu1 %vm1588_vm1, %v1587_v0 }
 0x72b   :  { %v1574_v54 = vpop.eup %1573 }
 0x72c   :  { %v777_v55 = vmul.f32 %v1574_v54, %v1570_v42 }
 0x72e   :  { %v779_v56 = vpack.c.bf16 %v777_v55, %v777_v55 }
 0x730   :  { %1479 = vmatmul.mubr.msk.bf16.vlgmr.msra.gmra.mrb[24].mxu0 %vm151_vm2, %v779_v56 }
 0x731   :  { %1490 = vmatprep.mubr.msk.bf16.mxu0 %vm1588_vm1, %v1587_v0  ;;  %1489 = vmatpush3.bf16.msra.mxu0 %v1549_v61 }
 0x732   :  { %1500 = vmatprep.subr.bf16.mxu0 %v1587_v0 }
 0x76a   :  { %v871_v57 = vpop.f32.mrb[24].mxu1 }
 0x76b   :  { %v1486_v58 = vpop.f32.mrb[25].mxu1 }
 0x76c   :  { %v874_v59 = vpop.f32.mrb[26].mxu1 }
 0x76d   :  { %v1487_v60 = vpop.f32.mrb[27].mxu1 }
 0x7fc   :  { %v992_v62 = vpop.f32.mrb[28].mxu1 }
 0x7fd   :  { %v1054_v63 = vmul.f32 0.25, %v992_v62  ;;  %v1498_v1 = vpop.f32.mrb[29].mxu1 }
 0x7fe   :  { %v995_v2 = vpop.f32.mrb[30].mxu1 }
 0x7ff   :  { %v1056_v3 = vadd.f32 %v1054_v63, %v1690_v12  ;;  %v1499_v4 = vpop.f32.mrb[31].mxu1  ;;  %v1002_v12 = vpop.permute.xlu1 %1001  ;;  %v1353_v2 = vld [vmem:[%s1911_s5] ss:$0 sm:$0xff] }
 0x801   :  { %v1058_v5 = vsel %vm151_vm2, %v1056_v3, -inf }
 0x802   :  { %1059 = vmax.xlane.f32.xlu0 %v1058_v5 }
 0x803   :  { %v823_v7 = vpop.f32.mrb[24].mxu0 }
 0x804   :  { %v1358_v9 = vpack.c.bf16 %v871_v57, %v823_v7  ;;  %v1480_v11 = vpop.f32.mrb[25].mxu0 }
 0x805   :  { %v826_v14 = vpop.f32.mrb[26].mxu0 }
 0x806   :  { %v1481_v15 = vpop.f32.mrb[27].mxu0  ;;  %1491 = vmatmul.mubr.msk.bf16.vlgmr.msra.gmra.mrb[28].mxu0 %vm54_vm0, %v1358_v9 }
 0x807   :  { %1501 = vmatpush3.bf16.xpose.msra.mxu0 %v1012_v10  ;;  %1502 = vmatprep.mubr.msk.bf16.mxu0 %vm1588_vm1, %v1587_v0 }
 0x808   :  { %1512 = vmatprep.subr.bf16.mxu0 %v1587_v0 }
 0x80e   :  { %1503 = vmatmul.mubr.msk.bf16.vlgmr.msra.gmra.mrb[32].mxu0 %vm54_vm0, %v1002_v12 }
 0x80f   :  { %1514 = vmatprep.mubr.msk.bf16.mxu0 %vm1588_vm1, %v1587_v0 }
 0x88f   :  { %v1060_v16 = vpop.xlane.xlu0 %1059 }
 0x890   :  { %v1064_v17 = vsub.f32 %v1056_v3, %v1060_v16 }
 0x892   :  { %v1066_v18 = vmul.f32 1.442695, %v1064_v17 }
 0x894   :  { %1575 = vpow2.f32 %v1066_v18 }
 0x89e   :  { %v1576_v19 = vpop.eup %1575 }
 0x89f   :  { %v1070_v21 = vsel %vm151_vm2, %v1576_v19, 0.0 }
 0x8a0   :  { %1071 = vadd.xlane.f32.xlu0 %v1070_v21 }
 0x8d9   :  { %v929_v22 = vpop.f32.mrb[28].mxu0 }
 0x8da   :  { %v936_v26 = vadd.f32 %v929_v22, %v1804_v20  ;;  %v1492_v27 = vpop.f32.mrb[29].mxu0 }
 0x8db   :  { %v932_v28 = vpop.f32.mrb[30].mxu0 }
 0x8dc   :  { %v1864_v29 = vadd.f32 %v932_v28, %v1806_v25  ;;  %v1493_v30 = vpop.f32.mrb[31].mxu0 }
 0x8e1   :  { %v1048_v31 = vpop.f32.mrb[32].mxu0 }
 0x8e2   :  { %v1055_v32 = vmul.f32 0.25, %v1048_v31  ;;  %v1504_v24 = vpop.f32.mrb[33].mxu0 }
 0x8e3   :  { %v1051_v33 = vpop.f32.mrb[34].mxu0 }
 0x8e4   :  { %v1505_v34 = vpop.f32.mrb[35].mxu0  ;;  %v1057_v35 = vadd.f32 %v1055_v32, %v1692_v13  ;;  %v1354_v33 = vld [vmem:[%s1912_s7] ss:$0 sm:$0xff] }
 0x8e6   :  { %v1061_v36 = vsel %vm151_vm2, %v1057_v35, -inf }
 0x8e7   :  { %1062 = vmax.xlane.f32.xlu1 %v1061_v36  ;;  %v1355_v36 = vld [vmem:[%s1913_s8] ss:$0 sm:$0xff] }
 0x8f8   :  { %1130 = vrot.lane.b32.xlu1 %v1833_v49, %s1595_s11 }
 0x92d   :  { %v1072_v13 = vpop.xlane.xlu0 %1071 }
 0x974   :  { %v1063_v20 = vpop.xlane.xlu1 %1062 }
 0x975   :  { %v1065_v38 = vsub.f32 %v1057_v35, %v1063_v20 }
 0x977   :  { %v1068_v39 = vmul.f32 1.442695, %v1065_v38 }
 0x978   :  { %v1131_v41 = vpop.permute.xlu1 %1130 }
 0x979   :  { %1577 = vpow2.f32 %v1068_v39  ;;  %v1136_v42 = vsel %vm184_vm3, %v1131_v41, 0 }
 0x97a   :  { %1513 = vmatpush3.bf16.msra.mxu0 %v1136_v42  ;;  %1579 = vrcp.f32 %v1072_v13 }
 0x983   :  { %v1578_v25 = vpop.eup %1577 }
 0x984   :  { %v1073_v40 = vsel %vm151_vm2, %v1578_v25, 0.0  ;;  %v1580_v8 = vpop.eup %1579 }
 0x985   :  { %1074 = vadd.xlane.f32.xlu0 %v1073_v40  ;;  %v1078_v44 = vmul.f32 %v1580_v8, %v1576_v19 }
 0x987   :  { %v1080_v47 = vpack.c.bf16 %v1078_v44, %v1078_v44 }
 0x99b   :  { %1082 = vrot.lane.b32.xlu0 %v1816_v37, %s1595_s11 }
 0xa12   :  { %v1075_v43 = vpop.xlane.xlu0 %1074 }
 0xa13   :  { %1581 = vrcp.f32 %v1075_v43 }
 0xa16   :  { %v1083_v45 = vpop.permute.xlu0 %1082 }
 0xa17   :  { %v1088_v46 = vsel %vm184_vm3, %v1083_v45, 0 }
 0xa18   :  { %1507 = vmatpush3.bf16.msra.mxu1 %v1088_v46 }
 0xa19   :  { %1518 = vmatprep.subr.bf16.mxu1 %v1587_v0 }
 0xa1b   :  { %1509 = vmatmul.mubr.msk.bf16.vlgmr.msra.gmra.mrb[32].mxu1 %vm151_vm2, %v1080_v47 }
 0xa1c   :  { %1520 = vmatprep.mubr.msk.bf16.mxu1 %vm1588_vm1, %v1587_v0  ;;  %1519 = vmatpush3.bf16.msra.mxu1 %v1550_v50  ;;  %v1361_v0 = vld [vmem:[%s1910_s6] sm:$0xff]  }
 0xa1d   :  { %v1582_v37 = vpop.eup %1581  ;;  %v1362_v59 = vunpack.c.l.bf16 %v1361_v0  ;;  %v1363_v63 = vunpack.c.h.bf16 %v1361_v0 }
 0xa1e   :  { %v1079_v48 = vmul.f32 %v1582_v37, %v1578_v25 }
 0xa20   :  { %v1081_v49 = vpack.c.bf16 %v1079_v48, %v1079_v48 }
 0xa22   :  { %1515 = vmatmul.mubr.msk.bf16.vlgmr.msra.gmra.mrb[36].mxu0 %vm151_vm2, %v1081_v49 }
 0xaee   :  { %v1124_v51 = vpop.f32.mrb[32].mxu1 }
 0xaef   :  { %v1510_v23 = vpop.f32.mrb[33].mxu1 }
 0xaf0   :  { %v1127_v52 = vpop.f32.mrb[34].mxu1 }
 0xaf1   :  { %v1511_v53 = vpop.f32.mrb[35].mxu1 }
 0xaf5   :  { %v1172_v54 = vpop.f32.mrb[36].mxu0 }
 0xaf6   :  { %v1359_v55 = vpack.c.bf16 %v1172_v54, %v1124_v51  ;;  %v1516_v56 = vpop.f32.mrb[37].mxu0 }
 0xaf7   :  { %v1175_v57 = vpop.f32.mrb[38].mxu0 }
 0xaf8   :  { %v1517_v58 = vpop.f32.mrb[39].mxu0  ;;  %1521 = vmatmul.mubr.msk.bf16.vlgmr.msra.gmra.mrb[36].mxu1 %vm54_vm0, %v1359_v55 }
 0xbcb   :  { %v1230_v60 = vpop.f32.mrb[36].mxu1 }
 0xbcc   :  { %v1237_v61 = vadd.f32 %v1230_v60, %v936_v26  ;;  %v1522_v62 = vpop.f32.mrb[37].mxu1 }
 0xbcd   :  { %v1233_v1 = vpop.f32.mrb[38].mxu1 }
 0xbce   :  { %v1243_v3 = vadd.f32 %v1362_v59, %v1237_v61  ;;  %v1238_v4 = vadd.f32 %v1233_v1, %v1864_v29  ;;  %v1523_v5 = vpop.f32.mrb[39].mxu1 }
 0xbd0   :  { %v1244_v6 = vadd.f32 %v1363_v63, %v1238_v4  ;;  %v1252_v7 = vadd.f32 %v1353_v2, %v1243_v3 }
 0xbd2   :  { %v1255_v9 = vsel %vm1254_vm4, %v1252_v7, 0.0  ;;  %v1253_v10 = vadd.f32 %v1353_v2, %v1244_v6 }
 0xbd3   :  { %1256 = vadd.xlane.f32.xlu1 %v1255_v9 }
 0xbd4   :  { %v1258_v11 = vsel %vm1254_vm4, %v1253_v10, 0.0 }
 0xbd5   :  { %1259 = vadd.xlane.f32.xlu0 %v1258_v11 }
 0xc60   :  { %v1257_v14 = vpop.xlane.xlu1 %1256 }
 0xc61   :  { %v1262_v15 = vmul.f32 0.015625, %v1257_v14 }
 0xc62   :  { %v1260_v12 = vpop.xlane.xlu0 %1259 }
 0xc63   :  { %v1264_v16 = vsub.f32 %v1252_v7, %v1262_v15  ;;  %v1263_v17 = vmul.f32 0.015625, %v1260_v12 }
 0xc65   :  { %v1265_v18 = vsub.f32 %v1253_v10, %v1263_v17  ;;  %v1266_v19 = vmul.f32 %v1264_v16, %v1264_v16 }
 0xc67   :  { %v1268_v21 = vsel %vm1254_vm4, %v1266_v19, 0.0  ;;  %v1267_v22 = vmul.f32 %v1265_v18, %v1265_v18 }
 0xc68   :  { %1269 = vadd.xlane.f32.xlu0 %v1268_v21 }
 0xc69   :  { %v1271_v26 = vsel %vm1254_vm4, %v1267_v22, 0.0 }
 0xc6a   :  { %1272 = vadd.xlane.f32.xlu1 %v1271_v26 }
 0xcf5   :  { %v1270_v27 = vpop.xlane.xlu0 %1269 }
 0xcf6   :  { %v1274_v28 = vmul.f32 0.015625, %v1270_v27 }
 0xcf7   :  { %v1273_v29 = vpop.xlane.xlu1 %1272 }
 0xcf8   :  { %v1276_v30 = vadd.f32 1e-05, %v1274_v28  ;;  %v1275_v31 = vmul.f32 0.015625, %v1273_v29 }
 0xcfa   :  { %1583 = vrsqrt.f32 %v1276_v30  ;;  %v1277_v32 = vadd.f32 1e-05, %v1275_v31 }
 0xcfc   :  { %1585 = vrsqrt.f32 %v1277_v32 }
 0xd04   :  { %v1584_v24 = vpop.eup %1583 }
 0xd05   :  { %v1280_v34 = vmul.f32 %v1584_v24, %v1264_v16 }
 0xd06   :  { %v1586_v35 = vpop.eup %1585 }
 0xd07   :  { %v1289_v20 = vmul.f32 %v1354_v33, %v1280_v34  ;;  %v1281_v38 = vmul.f32 %v1586_v35, %v1265_v18 }
 0xd09   :  { %v1298_v39 = vadd.f32 %v1355_v36, %v1289_v20  ;;  %v1290_v25 = vmul.f32 %v1354_v33, %v1281_v38 }
 0xd0b   :  { %v1300_v40 = vpack.c.bf16 %v1298_v39, %v1298_v39  ;;  %v1299_v41 = vadd.f32 %v1355_v36, %v1290_v25 }
 0xd0d   :  { %1303 = vst.msk [vmem:[%s1914_s9] sm:$0xf] %vm1302_vm5, %v1300_v40  ;;  %v1301_v42 = vpack.c.bf16 %v1299_v41, %v1299_v41 }
 0xd0f   :  { %1304 = vst.msk [vmem:[%s1914_s9 + $0x4] sm:$0xf] %vm1302_vm5, %v1301_v42 }

</bundles_post_ra>
